<compile_context>
chip_gen: v6e
topology: v6e:2x2x1
jax: 0.10.0
libtpu: 0.0.40
codegen_flags: <defaults>
</compile_context>

<pallas_src>
import functools

import numpy as np
import jax
import jax.numpy as jnp
from jax import lax
from jax.experimental import pallas as pl
from jax.experimental.pallas import tpu as pltpu

LANE = 128                       # lane width / padded output-channel count
VMEM_LIMIT = 32 * 1024 * 1024    # portable scoped-VMEM cap (v7x: 64 MiB phys)


def _params(grid_len):
    return pltpu.CompilerParams(
        dimension_semantics=("parallel",) * grid_len,
        vmem_limit_bytes=VMEM_LIMIT)


# ------------------------- backbone conv kernel -----------------------------

def _conv3x3s2_kernel(xs_ref, w_ref, b_ref, o_ref, *, ho, wo, silu):
    """Fused 3x3 stride-2 conv + bias + SiLU on a space-to-depth input (1 img).

    xs_ref : (ho+1, wo+1, 4*cin) bf16  -- xs[i,j, pb*cin+c] = xpad[2i+pi, 2j+pj, c]
    w_ref  : (4, 4*cin, 128)     bf16  -- one packed weight per (dy//2, dx//2)
    b_ref  : (1, 128)            f32
    o_ref  : (ho*wo, 128)        bf16  -- lane-dense (Cout padded to 128)
    """
    offs = ((0, 0), (0, 1), (1, 0), (1, 1))
    if wo % 8 == 0:
        # flatten (ho, wo) -> M; layout-friendly because wo % 8 == 0
        acc = jnp.zeros((ho * wo, LANE), jnp.float32)
        for g, (gi, gj) in enumerate(offs):
            patch = xs_ref[gi:gi + ho, gj:gj + wo, :]
            patch = patch.reshape(ho * wo, patch.shape[-1])
            acc += jnp.dot(patch, w_ref[g], preferred_element_type=jnp.float32)
        acc += b_ref[...]
        if silu:
            acc = acc * jax.nn.sigmoid(acc)
        o_ref[...] = acc.astype(o_ref.dtype)
    else:
        # small spatial tail: one 2-D matmul row-block per output row
        for oi in range(ho):
            acc = jnp.zeros((wo, LANE), jnp.float32)
            for g, (gi, gj) in enumerate(offs):
                patch = xs_ref[oi + gi, gj:gj + wo, :]
                acc += jnp.dot(patch, w_ref[g],
                               preferred_element_type=jnp.float32)
            acc += b_ref[...]
            if silu:
                acc = acc * jax.nn.sigmoid(acc)
            o_ref[pl.ds(oi * wo, wo), :] = acc.astype(o_ref.dtype)


def conv3x3_s2_silu(x, w4, b, *, cout, silu=True):
    """x: (B, H, W, Cin) bf16 NHWC.  Returns (B, H//2, W//2, cout) bf16."""
    B, H, W, C = x.shape
    assert H % 2 == 0 and W % 2 == 0
    ho, wo = H // 2, W // 2
    # pad=1 halo + space-to-depth (1x traffic, free reshape/transpose in XLA):
    xp = jnp.pad(x, ((0, 0), (1, 1), (1, 1), (0, 0)))
    xs = xp.reshape(B, ho + 1, 2, wo + 1, 2, C)
    xs = jnp.transpose(xs, (0, 1, 3, 2, 4, 5)).reshape(B, ho + 1, wo + 1, 4 * C)

    out = pl.pallas_call(
        functools.partial(_conv3x3s2_kernel, ho=ho, wo=wo, silu=silu),
        out_shape=jax.ShapeDtypeStruct((B, ho * wo, LANE), jnp.bfloat16),
        grid=(B,),
        in_specs=[
            pl.BlockSpec((None, ho + 1, wo + 1, 4 * C), lambda bq: (bq, 0, 0, 0)),
            pl.BlockSpec((4, 4 * C, LANE), lambda bq: (0, 0, 0)),
            pl.BlockSpec((1, LANE), lambda bq: (0, 0)),
        ],
        out_specs=pl.BlockSpec((None, ho * wo, LANE), lambda bq: (bq, 0, 0)),
        compiler_params=_params(1),
    )(xs, w4, b)
    # slice off lane padding -> real channel count, back to NHWC
    return out[:, :, :cout].reshape(B, ho, wo, cout)


# --------------------- fused Detect head + decode kernel --------------------

def _head_decode_kernel(f_ref, w_ref, b_ref, o_ref, *, wgrid, stride, aw, ah):
    """1x1 head conv + sigmoid + YOLOv5 box decode for one image.

    Head columns are packed anchor-major with a 16-lane stride per anchor
    (col = a*16 + field) so field/anchor indices are cheap bit ops.
    f_ref: (M, Cin) bf16, w_ref: (Cin, 128) bf16, b_ref: (1, 128) f32,
    o_ref: (M, 128) f32.  M = H*W; the cell grid is generated in-kernel.
    """
    acc = jnp.dot(f_ref[...], w_ref[...], preferred_element_type=jnp.float32)
    p = jax.nn.sigmoid(acc + b_ref[...])                       # (M, 128)

    col = lax.broadcasted_iota(jnp.int32, p.shape, 1)
    row = lax.broadcasted_iota(jnp.int32, p.shape, 0)
    field = col & 15                                           # col % 16
    anchor = col >> 4                                          # col // 16

    m_f = row.astype(jnp.float32)
    gy = jnp.floor(m_f / float(wgrid))
    gx = m_f - gy * float(wgrid)

    g = jnp.where(field == 0, gx, gy)
    xy = (p * 2.0 - 0.5 + g) * stride
    aw_v = jnp.where(anchor == 0, aw[0], jnp.where(anchor == 1, aw[1], aw[2]))
    ah_v = jnp.where(anchor == 0, ah[0], jnp.where(anchor == 1, ah[1], ah[2]))
    wh = (p * 2.0) ** 2 * jnp.where(field == 2, aw_v, ah_v)

    o_ref[...] = jnp.where(field < 2, xy, jnp.where(field < 4, wh, p))


def head_decode(f, w, b, *, stride, na, no, anchors):
    """f: (B, H, W, Cin) bf16 -> decoded (B, na*H*W, no) f32 for one level."""
    B, H, W, C = f.shape
    M = H * W
    fm = f.reshape(B, M, C)
    aw = tuple(float(a[0]) for a in anchors)
    ah = tuple(float(a[1]) for a in anchors)
    out = pl.pallas_call(
        functools.partial(_head_decode_kernel, wgrid=W, stride=float(stride),
                          aw=aw, ah=ah),
        out_shape=jax.ShapeDtypeStruct((B, M, LANE), jnp.float32),
        grid=(B,),
        in_specs=[
            pl.BlockSpec((None, M, C), lambda bq: (bq, 0, 0)),
            pl.BlockSpec((C, LANE), lambda bq: (0, 0)),
            pl.BlockSpec((1, LANE), lambda bq: (0, 0)),
        ],
        out_specs=pl.BlockSpec((None, M, LANE), lambda bq: (bq, 0, 0)),
        compiler_params=_params(1),
    )(fm, w, b)
    # un-pad columns: col = a*16 + field, keep field < no, anchor < na
    lvl = out[:, :, :na * 16].reshape(B, M, na, 16)[..., :no]
    return jnp.transpose(lvl, (0, 2, 1, 3)).reshape(B, na * M, no)


# ------------------------------ hiding loss ---------------------------------

def _hiding_loss_kernel(obj_ref, cls_ref, o_ref):
    # obj_ref/cls_ref: (B, N) f32 with the detection axis on the lanes.
    m = jnp.max(obj_ref[...] * cls_ref[...])
    o_ref[0, 0] = -jnp.log(jnp.maximum(1.0 - m, 1e-6))        # eps-clamped


def hiding_loss(pred, attack_target):
    """loss = -log(1 - max(pred[...,4] * pred[...,5+attack_target]))."""
    t = int(attack_target)                  # static Python int (jit-safe)
    obj = pred[..., 4]                      # (B, N) -- N on the lane axis
    cls = pred[..., 5 + t]
    # TODO(synk): at real detection counts (N ~ 25k) grid over N with a
    # running max finalized under pl.when instead of one whole-array block.
    out = pl.pallas_call(
        _hiding_loss_kernel,
        out_shape=jax.ShapeDtypeStruct((1, 1), jnp.float32),
        in_specs=[pl.BlockSpec(memory_space=pltpu.MemorySpace.VMEM)] * 2,
        out_specs=pl.BlockSpec(memory_space=pltpu.MemorySpace.VMEM),
    )(obj, cls)
    return out[0, 0]


# ------------------------------- model glue ---------------------------------

class YOLOv5Pallas:
    """Synthetic, deterministic stand-in for attempt_load('yolov5m.pt')."""

    def __init__(self, key, nc=8, na=3):
        self.nc, self.na = nc, na
        self.no = nc + 5
        self.nl = 2
        self.strides = (8, 16)
        self.anchors = (
            ((10., 13.), (16., 30.), (33., 23.)),
            ((30., 61.), (62., 45.), (59., 119.)),
        )
        self.conf_thres = 0.25
        assert self.no <= 16 and self.na * 16 <= LANE

        # backbone: four 3x3 stride-2 convs (stride 16 total); last two = P3/P4
        self.chans = [(3, 8), (8, 16), (16, 32), (32, 64)]
        self.backbone = []
        for i, (ci, co) in enumerate(self.chans):
            w = 0.1 * jax.random.normal(jax.random.fold_in(key, i),
                                        (co, ci, 3, 3), jnp.float32)
            b = jnp.zeros((co,), jnp.float32)
            self.backbone.append(self._pack_conv(np.asarray(w), np.asarray(b),
                                                 ci, co))

        # Detect head: 1x1 convs to na*no channels per level (P3:32ch, P4:64ch)
        self.heads = []
        for i, ci in enumerate((32, 64)):
            w = 0.1 * jax.random.normal(jax.random.fold_in(key, 100 + i),
                                        (self.na * self.no, ci, 1, 1),
                                        jnp.float32)
            b = jnp.zeros((self.na * self.no,), jnp.float32)
            self.heads.append(self._pack_head(np.asarray(w), np.asarray(b), ci))

    # ---- weight packing: PyTorch layouts -> lane-dense Pallas matmul layouts
    def _pack_conv(self, w, b, cin, cout):
        # w: (cout, cin, 3, 3).  Space-to-depth groups g = (dy//2)*2 + dx//2,
        # phase blocks pb = (dy%2)*2 + dx%2 along the packed-K axis.
        w4 = np.zeros((4, 4 * cin, LANE), np.float32)
        for dy in range(3):
            for dx in range(3):
                g = (dy // 2) * 2 + (dx // 2)
                pb = (dy % 2) * 2 + (dx % 2)
                w4[g, pb * cin:(pb + 1) * cin, :cout] = w[:, :, dy, dx].T
        bp = np.zeros((1, LANE), np.float32)
        bp[0, :cout] = b
        return (jnp.asarray(w4, jnp.bfloat16), jnp.asarray(bp, jnp.float32),
                cout)

    def _pack_head(self, w, b, cin):
        # torch output channel o = a*no + f  ->  matmul column c = a*16 + f
        wm = np.zeros((cin, LANE), np.float32)
        bm = np.zeros((1, LANE), np.float32)
        for a in range(self.na):
            for f in range(self.no):
                wm[:, a * 16 + f] = w[a * self.no + f, :, 0, 0]
                bm[0, a * 16 + f] = b[a * self.no + f]
        return jnp.asarray(wm, jnp.bfloat16), jnp.asarray(bm, jnp.float32)

    # ---- forward pieces
    def _features(self, x_nchw):
        x = jnp.transpose(x_nchw, (0, 2, 3, 1)).astype(jnp.bfloat16)  # -> NHWC
        feats = []
        for i, (w4, b, cout) in enumerate(self.backbone):
            x = conv3x3_s2_silu(x, w4, b, cout=cout, silu=True)
            if i >= 2:
                feats.append(x)
        return feats   # [P3 (stride 8), P4 (stride 16)]

    def _detect(self, feats):
        preds = []
        for i, f in enumerate(feats):
            w, b = self.heads[i]
            preds.append(head_decode(f, w, b, stride=self.strides[i],
                                     na=self.na, no=self.no,
                                     anchors=self.anchors[i]))
        return jnp.concatenate(preds, axis=1)   # (B, sum(na*H*W), 5+nc)

    def forward(self, x, y=None, reverse=False, hiding=False,
                attack_target=None):
        pred = self._detect(self._features(x))
        if y is None:
            # TODO(synk): non_max_suppression (tv.ops.nms) is data-dependent and
            # sequential; returning decoded pre-NMS predictions instead.
            return pred
        elif hiding:
            if attack_target is None:
                # requires a concrete y; under jit pass attack_target explicitly
                attack_target = int(y[0, 1])
            return hiding_loss(pred, attack_target)
        else:
            # TODO(synk): ComputeLoss/build_targets needs dynamic-shape gathers
            # and data-dependent target assembly; no clean Pallas equivalent.
            raise NotImplementedError


if __name__ == "__main__":
    key = jax.random.PRNGKey(0)
    model = YOLOv5Pallas(jax.random.fold_in(key, 1))

    x = jax.random.normal(jax.random.fold_in(key, 2), (2, 3, 32, 32),
                          jnp.float32)
    y = jnp.array([[0.0, 2.0, 0.5, 0.5, 0.2, 0.2]], jnp.float32)  # [img,cls,xywh]
    attack_target = int(y[0, 1])            # static (jit-safe) attack class

    infer = jax.jit(lambda xi: model.forward(xi))
    hide = jax.jit(lambda xi, yi: model.forward(xi, yi, hiding=True,
                                                attack_target=attack_target))

    pred = infer(x)                         # inference path (pre-NMS preds)
    loss = hide(x, y)                       # hiding adversarial loss path
    jax.block_until_ready((pred, loss))

    assert pred.shape == (2, 3 * (4 * 4 + 2 * 2), 13)
    assert bool(jnp.isfinite(pred).all())
    assert bool(jnp.isfinite(loss))
    print("KERNEL_OK")
</pallas_src>

<mosaic_0001>
module attributes {stable_mosaic.version = 11 : i64} {
  func.func @_conv3x3s2_kernel(%arg0: i32, %arg1: memref<1x17x17x12xbf16, #tpu.memory_space<vmem>>, %arg2: memref<4x12x128xbf16, #tpu.memory_space<vmem>>, %arg3: memref<1x128xf32, #tpu.memory_space<vmem>>, %arg4: memref<1x256x128xbf16, #tpu.memory_space<vmem>>) attributes {dimension_semantics = [#tpu.dimension_semantics<parallel>], iteration_bounds = array<i64: 2>, scalar_prefetch = 0 : i64, scratch_operands = 0 : i64, tpu.core_type = #tpu.core_type<tc>, window_params = [{transform_indices = @transform_0, window_bounds = array<i64: 1, 17, 17, 12>}, {pipeline_mode = #tpu.pipeline_mode<synchronous>, transform_indices = @transform_1, window_bounds = array<i64: 4, 12, 128>}, {pipeline_mode = #tpu.pipeline_mode<synchronous>, transform_indices = @transform_2, window_bounds = array<i64: 1, 128>}, {transform_indices = @transform_3, window_bounds = array<i64: 1, 256, 128>}]} {
    %cst = arith.constant 0.000000e+00 : f32
    %0 = vector.broadcast %cst : f32 to vector<256x128xf32>
    %c0 = arith.constant 0 : index
    %c0_0 = arith.constant 0 : index
    %c0_1 = arith.constant 0 : index
    %c0_2 = arith.constant 0 : index
    %1 = vector.load %arg1[%c0, %c0_0, %c0_1, %c0_2] : memref<1x17x17x12xbf16, #tpu.memory_space<vmem>>, vector<1x16x16x12xbf16>
    %2 = vector.shape_cast %1 : vector<1x16x16x12xbf16> to vector<16x16x12xbf16>
    %3 = vector.shape_cast %2 : vector<16x16x12xbf16> to vector<256x12xbf16>
    %c0_3 = arith.constant 0 : index
    %c0_4 = arith.constant 0 : index
    %c0_5 = arith.constant 0 : index
    %4 = vector.load %arg2[%c0_3, %c0_4, %c0_5] : memref<4x12x128xbf16, #tpu.memory_space<vmem>>, vector<1x12x128xbf16>
    %5 = vector.shape_cast %4 : vector<1x12x128xbf16> to vector<12x128xbf16>
    %cst_6 = arith.constant dense<0.000000e+00> : vector<256x128xf32>
    %6 = tpu.matmul %3, %5, %cst_6 {dimension_numbers = #tpu.dot_dimension_numbers<[1], [0], [0], [1], [0, 0, 1, 1], [], []>} : vector<256x12xbf16>, vector<12x128xbf16>, vector<256x128xf32> -> vector<256x128xf32>
    %7 = arith.addf %0, %6 : vector<256x128xf32>
    %c0_7 = arith.constant 0 : index
    %c0_8 = arith.constant 0 : index
    %c1 = arith.constant 1 : index
    %c0_9 = arith.constant 0 : index
    %8 = vector.load %arg1[%c0_7, %c0_8, %c1, %c0_9] : memref<1x17x17x12xbf16, #tpu.memory_space<vmem>>, vector<1x16x16x12xbf16>
    %9 = vector.shape_cast %8 : vector<1x16x16x12xbf16> to vector<16x16x12xbf16>
    %10 = vector.shape_cast %9 : vector<16x16x12xbf16> to vector<256x12xbf16>
    %c1_10 = arith.constant 1 : index
    %c0_11 = arith.constant 0 : index
    %c0_12 = arith.constant 0 : index
    %11 = vector.load %arg2[%c1_10, %c0_11, %c0_12] : memref<4x12x128xbf16, #tpu.memory_space<vmem>>, vector<1x12x128xbf16>
    %12 = vector.shape_cast %11 : vector<1x12x128xbf16> to vector<12x128xbf16>
    %cst_13 = arith.constant dense<0.000000e+00> : vector<256x128xf32>
    %13 = tpu.matmul %10, %12, %cst_13 {dimension_numbers = #tpu.dot_dimension_numbers<[1], [0], [0], [1], [0, 0, 1, 1], [], []>} : vector<256x12xbf16>, vector<12x128xbf16>, vector<256x128xf32> -> vector<256x128xf32>
    %14 = arith.addf %7, %13 : vector<256x128xf32>
    %c0_14 = arith.constant 0 : index
    %c1_15 = arith.constant 1 : index
    %c0_16 = arith.constant 0 : index
    %c0_17 = arith.constant 0 : index
    %15 = vector.load %arg1[%c0_14, %c1_15, %c0_16, %c0_17] : memref<1x17x17x12xbf16, #tpu.memory_space<vmem>>, vector<1x16x16x12xbf16>
    %16 = vector.shape_cast %15 : vector<1x16x16x12xbf16> to vector<16x16x12xbf16>
    %17 = vector.shape_cast %16 : vector<16x16x12xbf16> to vector<256x12xbf16>
    %c2 = arith.constant 2 : index
    %c0_18 = arith.constant 0 : index
    %c0_19 = arith.constant 0 : index
    %18 = vector.load %arg2[%c2, %c0_18, %c0_19] : memref<4x12x128xbf16, #tpu.memory_space<vmem>>, vector<1x12x128xbf16>
    %19 = vector.shape_cast %18 : vector<1x12x128xbf16> to vector<12x128xbf16>
    %cst_20 = arith.constant dense<0.000000e+00> : vector<256x128xf32>
    %20 = tpu.matmul %17, %19, %cst_20 {dimension_numbers = #tpu.dot_dimension_numbers<[1], [0], [0], [1], [0, 0, 1, 1], [], []>} : vector<256x12xbf16>, vector<12x128xbf16>, vector<256x128xf32> -> vector<256x128xf32>
    %21 = arith.addf %14, %20 : vector<256x128xf32>
    %c0_21 = arith.constant 0 : index
    %c1_22 = arith.constant 1 : index
    %c1_23 = arith.constant 1 : index
    %c0_24 = arith.constant 0 : index
    %22 = vector.load %arg1[%c0_21, %c1_22, %c1_23, %c0_24] : memref<1x17x17x12xbf16, #tpu.memory_space<vmem>>, vector<1x16x16x12xbf16>
    %23 = vector.shape_cast %22 : vector<1x16x16x12xbf16> to vector<16x16x12xbf16>
    %24 = vector.shape_cast %23 : vector<16x16x12xbf16> to vector<256x12xbf16>
    %c3 = arith.constant 3 : index
    %c0_25 = arith.constant 0 : index
    %c0_26 = arith.constant 0 : index
    %25 = vector.load %arg2[%c3, %c0_25, %c0_26] : memref<4x12x128xbf16, #tpu.memory_space<vmem>>, vector<1x12x128xbf16>
    %26 = vector.shape_cast %25 : vector<1x12x128xbf16> to vector<12x128xbf16>
    %cst_27 = arith.constant dense<0.000000e+00> : vector<256x128xf32>
    %27 = tpu.matmul %24, %26, %cst_27 {dimension_numbers = #tpu.dot_dimension_numbers<[1], [0], [0], [1], [0, 0, 1, 1], [], []>} : vector<256x12xbf16>, vector<12x128xbf16>, vector<256x128xf32> -> vector<256x128xf32>
    %28 = arith.addf %21, %27 : vector<256x128xf32>
    %c0_28 = arith.constant 0 : index
    %c0_29 = arith.constant 0 : index
    %29 = vector.load %arg3[%c0_28, %c0_29] : memref<1x128xf32, #tpu.memory_space<vmem>>, vector<1x128xf32>
    %30 = vector.broadcast %29 : vector<1x128xf32> to vector<256x128xf32>
    %31 = arith.addf %28, %30 : vector<256x128xf32>
    %32 = arith.negf %31 : vector<256x128xf32>
    %33 = math.exp %32 : vector<256x128xf32>
    %cst_30 = arith.constant 1.000000e+00 : f32
    %34 = vector.broadcast %cst_30 : f32 to vector<256x128xf32>
    %35 = arith.addf %34, %33 : vector<256x128xf32>
    %36 = arith.divf %34, %35 : vector<256x128xf32>
    %37 = arith.mulf %31, %36 : vector<256x128xf32>
    %38 = arith.truncf %37 : vector<256x128xf32> to vector<256x128xbf16>
    %c0_31 = arith.constant 0 : index
    %c0_32 = arith.constant 0 : index
    %c0_33 = arith.constant 0 : index
    %39 = vector.load %arg4[%c0_31, %c0_32, %c0_33] : memref<1x256x128xbf16, #tpu.memory_space<vmem>>, vector<1x256x128xbf16>
    %40 = vector.shape_cast %39 : vector<1x256x128xbf16> to vector<256x128xbf16>
    %41 = vector.shape_cast %38 : vector<256x128xbf16> to vector<1x256x128xbf16>
    tpu.vector_store %arg4[%c0_31, %c0_32, %c0_33], %41 {strides = array<i32>} : memref<1x256x128xbf16, #tpu.memory_space<vmem>>, vector<1x256x128xbf16>,
    return
  }
  func.func @transform_0(%arg0: i32) -> (i32, i32, i32, i32) {
    %c0_i32 = arith.constant 0 : i32
    %c0_i32_0 = arith.constant 0 : i32
    %c0_i32_1 = arith.constant 0 : i32
    %c0_i32_2 = arith.constant 0 : i32
    return %arg0, %c0_i32, %c0_i32_0, %c0_i32_1 : i32, i32, i32, i32
  }
  func.func @transform_1(%arg0: i32) -> (i32, i32, i32) {
    %c0_i32 = arith.constant 0 : i32
    %c0_i32_0 = arith.constant 0 : i32
    %c0_i32_1 = arith.constant 0 : i32
    %c0_i32_2 = arith.constant 0 : i32
    return %c0_i32, %c0_i32_0, %c0_i32_1 : i32, i32, i32
  }
  func.func @transform_2(%arg0: i32) -> (i32, i32) {
    %c0_i32 = arith.constant 0 : i32
    %c0_i32_0 = arith.constant 0 : i32
    %c0_i32_1 = arith.constant 0 : i32
    return %c0_i32, %c0_i32_0 : i32, i32
  }
  func.func @transform_3(%arg0: i32) -> (i32, i32, i32) {
    %c0_i32 = arith.constant 0 : i32
    %c0_i32_0 = arith.constant 0 : i32
    %c0_i32_1 = arith.constant 0 : i32
    return %arg0, %c0_i32, %c0_i32_0 : i32, i32, i32
  }
}

module attributes {stable_mosaic.version = 11 : i64} {
  func.func @_conv3x3s2_kernel(%arg0: i32, %arg1: memref<1x9x9x32xbf16, #tpu.memory_space<vmem>>, %arg2: memref<4x32x128xbf16, #tpu.memory_space<vmem>>, %arg3: memref<1x128xf32, #tpu.memory_space<vmem>>, %arg4: memref<1x64x128xbf16, #tpu.memory_space<vmem>>) attributes {dimension_semantics = [#tpu.dimension_semantics<parallel>], iteration_bounds = array<i64: 2>, scalar_prefetch = 0 : i64, scratch_operands = 0 : i64, tpu.core_type = #tpu.core_type<tc>, window_params = [{transform_indices = @transform_0, window_bounds = array<i64: 1, 9, 9, 32>}, {pipeline_mode = #tpu.pipeline_mode<synchronous>, transform_indices = @transform_1, window_bounds = array<i64: 4, 32, 128>}, {pipeline_mode = #tpu.pipeline_mode<synchronous>, transform_indices = @transform_2, window_bounds = array<i64: 1, 128>}, {transform_indices = @transform_3, window_bounds = array<i64: 1, 64, 128>}]} {
    %cst = arith.constant 0.000000e+00 : f32
    %0 = vector.broadcast %cst : f32 to vector<64x128xf32>
    %c0 = arith.constant 0 : index
    %c0_0 = arith.constant 0 : index
    %c0_1 = arith.constant 0 : index
    %c0_2 = arith.constant 0 : index
    %1 = vector.load %arg1[%c0, %c0_0, %c0_1, %c0_2] : memref<1x9x9x32xbf16, #tpu.memory_space<vmem>>, vector<1x8x8x32xbf16>
    %2 = vector.shape_cast %1 : vector<1x8x8x32xbf16> to vector<8x8x32xbf16>
    %3 = vector.shape_cast %2 : vector<8x8x32xbf16> to vector<64x32xbf16>
    %c0_3 = arith.constant 0 : index
    %c0_4 = arith.constant 0 : index
    %c0_5 = arith.constant 0 : index
    %4 = vector.load %arg2[%c0_3, %c0_4, %c0_5] : memref<4x32x128xbf16, #tpu.memory_space<vmem>>, vector<1x32x128xbf16>
    %5 = vector.shape_cast %4 : vector<1x32x128xbf16> to vector<32x128xbf16>
    %cst_6 = arith.constant dense<0.000000e+00> : vector<64x128xf32>
    %6 = tpu.matmul %3, %5, %cst_6 {dimension_numbers = #tpu.dot_dimension_numbers<[1], [0], [0], [1], [0, 0, 1, 1], [], []>} : vector<64x32xbf16>, vector<32x128xbf16>, vector<64x128xf32> -> vector<64x128xf32>
    %7 = arith.addf %0, %6 : vector<64x128xf32>
    %c0_7 = arith.constant 0 : index
    %c0_8 = arith.constant 0 : index
    %c1 = arith.constant 1 : index
    %c0_9 = arith.constant 0 : index
    %8 = vector.load %arg1[%c0_7, %c0_8, %c1, %c0_9] : memref<1x9x9x32xbf16, #tpu.memory_space<vmem>>, vector<1x8x8x32xbf16>
    %9 = vector.shape_cast %8 : vector<1x8x8x32xbf16> to vector<8x8x32xbf16>
    %10 = vector.shape_cast %9 : vector<8x8x32xbf16> to vector<64x32xbf16>
    %c1_10 = arith.constant 1 : index
    %c0_11 = arith.constant 0 : index
    %c0_12 = arith.constant 0 : index
    %11 = vector.load %arg2[%c1_10, %c0_11, %c0_12] : memref<4x32x128xbf16, #tpu.memory_space<vmem>>, vector<1x32x128xbf16>
    %12 = vector.shape_cast %11 : vector<1x32x128xbf16> to vector<32x128xbf16>
    %cst_13 = arith.constant dense<0.000000e+00> : vector<64x128xf32>
    %13 = tpu.matmul %10, %12, %cst_13 {dimension_numbers = #tpu.dot_dimension_numbers<[1], [0], [0], [1], [0, 0, 1, 1], [], []>} : vector<64x32xbf16>, vector<32x128xbf16>, vector<64x128xf32> -> vector<64x128xf32>
    %14 = arith.addf %7, %13 : vector<64x128xf32>
    %c0_14 = arith.constant 0 : index
    %c1_15 = arith.constant 1 : index
    %c0_16 = arith.constant 0 : index
    %c0_17 = arith.constant 0 : index
    %15 = vector.load %arg1[%c0_14, %c1_15, %c0_16, %c0_17] : memref<1x9x9x32xbf16, #tpu.memory_space<vmem>>, vector<1x8x8x32xbf16>
    %16 = vector.shape_cast %15 : vector<1x8x8x32xbf16> to vector<8x8x32xbf16>
    %17 = vector.shape_cast %16 : vector<8x8x32xbf16> to vector<64x32xbf16>
    %c2 = arith.constant 2 : index
    %c0_18 = arith.constant 0 : index
    %c0_19 = arith.constant 0 : index
    %18 = vector.load %arg2[%c2, %c0_18, %c0_19] : memref<4x32x128xbf16, #tpu.memory_space<vmem>>, vector<1x32x128xbf16>
    %19 = vector.shape_cast %18 : vector<1x32x128xbf16> to vector<32x128xbf16>
    %cst_20 = arith.constant dense<0.000000e+00> : vector<64x128xf32>
    %20 = tpu.matmul %17, %19, %cst_20 {dimension_numbers = #tpu.dot_dimension_numbers<[1], [0], [0], [1], [0, 0, 1, 1], [], []>} : vector<64x32xbf16>, vector<32x128xbf16>, vector<64x128xf32> -> vector<64x128xf32>
    %21 = arith.addf %14, %20 : vector<64x128xf32>
    %c0_21 = arith.constant 0 : index
    %c1_22 = arith.constant 1 : index
    %c1_23 = arith.constant 1 : index
    %c0_24 = arith.constant 0 : index
    %22 = vector.load %arg1[%c0_21, %c1_22, %c1_23, %c0_24] : memref<1x9x9x32xbf16, #tpu.memory_space<vmem>>, vector<1x8x8x32xbf16>
    %23 = vector.shape_cast %22 : vector<1x8x8x32xbf16> to vector<8x8x32xbf16>
    %24 = vector.shape_cast %23 : vector<8x8x32xbf16> to vector<64x32xbf16>
    %c3 = arith.constant 3 : index
    %c0_25 = arith.constant 0 : index
    %c0_26 = arith.constant 0 : index
    %25 = vector.load %arg2[%c3, %c0_25, %c0_26] : memref<4x32x128xbf16, #tpu.memory_space<vmem>>, vector<1x32x128xbf16>
    %26 = vector.shape_cast %25 : vector<1x32x128xbf16> to vector<32x128xbf16>
    %cst_27 = arith.constant dense<0.000000e+00> : vector<64x128xf32>
    %27 = tpu.matmul %24, %26, %cst_27 {dimension_numbers = #tpu.dot_dimension_numbers<[1], [0], [0], [1], [0, 0, 1, 1], [], []>} : vector<64x32xbf16>, vector<32x128xbf16>, vector<64x128xf32> -> vector<64x128xf32>
    %28 = arith.addf %21, %27 : vector<64x128xf32>
    %c0_28 = arith.constant 0 : index
    %c0_29 = arith.constant 0 : index
    %29 = vector.load %arg3[%c0_28, %c0_29] : memref<1x128xf32, #tpu.memory_space<vmem>>, vector<1x128xf32>
    %30 = vector.broadcast %29 : vector<1x128xf32> to vector<64x128xf32>
    %31 = arith.addf %28, %30 : vector<64x128xf32>
    %32 = arith.negf %31 : vector<64x128xf32>
    %33 = math.exp %32 : vector<64x128xf32>
    %cst_30 = arith.constant 1.000000e+00 : f32
    %34 = vector.broadcast %cst_30 : f32 to vector<64x128xf32>
    %35 = arith.addf %34, %33 : vector<64x128xf32>
    %36 = arith.divf %34, %35 : vector<64x128xf32>
    %37 = arith.mulf %31, %36 : vector<64x128xf32>
    %38 = arith.truncf %37 : vector<64x128xf32> to vector<64x128xbf16>
    %c0_31 = arith.constant 0 : index
    %c0_32 = arith.constant 0 : index
    %c0_33 = arith.constant 0 : index
    %39 = vector.load %arg4[%c0_31, %c0_32, %c0_33] : memref<1x64x128xbf16, #tpu.memory_space<vmem>>, vector<1x64x128xbf16>
    %40 = vector.shape_cast %39 : vector<1x64x128xbf16> to vector<64x128xbf16>
    %41 = vector.shape_cast %38 : vector<64x128xbf16> to vector<1x64x128xbf16>
    tpu.vector_store %arg4[%c0_31, %c0_32, %c0_33], %41 {strides = array<i32>} : memref<1x64x128xbf16, #tpu.memory_space<vmem>>, vector<1x64x128xbf16>,
    return
  }
  func.func @transform_0(%arg0: i32) -> (i32, i32, i32, i32) {
    %c0_i32 = arith.constant 0 : i32
    %c0_i32_0 = arith.constant 0 : i32
    %c0_i32_1 = arith.constant 0 : i32
    %c0_i32_2 = arith.constant 0 : i32
    return %arg0, %c0_i32, %c0_i32_0, %c0_i32_1 : i32, i32, i32, i32
  }
  func.func @transform_1(%arg0: i32) -> (i32, i32, i32) {
    %c0_i32 = arith.constant 0 : i32
    %c0_i32_0 = arith.constant 0 : i32
    %c0_i32_1 = arith.constant 0 : i32
    %c0_i32_2 = arith.constant 0 : i32
    return %c0_i32, %c0_i32_0, %c0_i32_1 : i32, i32, i32
  }
  func.func @transform_2(%arg0: i32) -> (i32, i32) {
    %c0_i32 = arith.constant 0 : i32
    %c0_i32_0 = arith.constant 0 : i32
    %c0_i32_1 = arith.constant 0 : i32
    return %c0_i32, %c0_i32_0 : i32, i32
  }
  func.func @transform_3(%arg0: i32) -> (i32, i32, i32) {
    %c0_i32 = arith.constant 0 : i32
    %c0_i32_0 = arith.constant 0 : i32
    %c0_i32_1 = arith.constant 0 : i32
    return %arg0, %c0_i32, %c0_i32_0 : i32, i32, i32
  }
}

module attributes {stable_mosaic.version = 11 : i64} {
  func.func @_conv3x3s2_kernel(%arg0: i32, %arg1: memref<1x5x5x64xbf16, #tpu.memory_space<vmem>>, %arg2: memref<4x64x128xbf16, #tpu.memory_space<vmem>>, %arg3: memref<1x128xf32, #tpu.memory_space<vmem>>, %arg4: memref<1x16x128xbf16, #tpu.memory_space<vmem>>) attributes {dimension_semantics = [#tpu.dimension_semantics<parallel>], iteration_bounds = array<i64: 2>, scalar_prefetch = 0 : i64, scratch_operands = 0 : i64, tpu.core_type = #tpu.core_type<tc>, window_params = [{transform_indices = @transform_0, window_bounds = array<i64: 1, 5, 5, 64>}, {pipeline_mode = #tpu.pipeline_mode<synchronous>, transform_indices = @transform_1, window_bounds = array<i64: 4, 64, 128>}, {pipeline_mode = #tpu.pipeline_mode<synchronous>, transform_indices = @transform_2, window_bounds = array<i64: 1, 128>}, {transform_indices = @transform_3, window_bounds = array<i64: 1, 16, 128>}]} {
    %cst = arith.constant 0.000000e+00 : f32
    %0 = vector.broadcast %cst : f32 to vector<4x128xf32>
    %c0 = arith.constant 0 : index
    %c0_0 = arith.constant 0 : index
    %c0_1 = arith.constant 0 : index
    %c0_2 = arith.constant 0 : index
    %1 = vector.load %arg1[%c0, %c0_0, %c0_1, %c0_2] : memref<1x5x5x64xbf16, #tpu.memory_space<vmem>>, vector<1x1x4x64xbf16>
    %2 = vector.shape_cast %1 : vector<1x1x4x64xbf16> to vector<4x64xbf16>
    %c0_3 = arith.constant 0 : index
    %c0_4 = arith.constant 0 : index
    %c0_5 = arith.constant 0 : index
    %3 = vector.load %arg2[%c0_3, %c0_4, %c0_5] : memref<4x64x128xbf16, #tpu.memory_space<vmem>>, vector<1x64x128xbf16>
    %4 = vector.shape_cast %3 : vector<1x64x128xbf16> to vector<64x128xbf16>
    %cst_6 = arith.constant dense<0.000000e+00> : vector<4x128xf32>
    %5 = tpu.matmul %2, %4, %cst_6 {dimension_numbers = #tpu.dot_dimension_numbers<[1], [0], [0], [1], [0, 0, 1, 1], [], []>} : vector<4x64xbf16>, vector<64x128xbf16>, vector<4x128xf32> -> vector<4x128xf32>
    %6 = arith.addf %0, %5 : vector<4x128xf32>
    %c0_7 = arith.constant 0 : index
    %c0_8 = arith.constant 0 : index
    %c1 = arith.constant 1 : index
    %c0_9 = arith.constant 0 : index
    %7 = vector.load %arg1[%c0_7, %c0_8, %c1, %c0_9] : memref<1x5x5x64xbf16, #tpu.memory_space<vmem>>, vector<1x1x4x64xbf16>
    %8 = vector.shape_cast %7 : vector<1x1x4x64xbf16> to vector<4x64xbf16>
    %c1_10 = arith.constant 1 : index
    %c0_11 = arith.constant 0 : index
    %c0_12 = arith.constant 0 : index
    %9 = vector.load %arg2[%c1_10, %c0_11, %c0_12] : memref<4x64x128xbf16, #tpu.memory_space<vmem>>, vector<1x64x128xbf16>
    %10 = vector.shape_cast %9 : vector<1x64x128xbf16> to vector<64x128xbf16>
    %cst_13 = arith.constant dense<0.000000e+00> : vector<4x128xf32>
    %11 = tpu.matmul %8, %10, %cst_13 {dimension_numbers = #tpu.dot_dimension_numbers<[1], [0], [0], [1], [0, 0, 1, 1], [], []>} : vector<4x64xbf16>, vector<64x128xbf16>, vector<4x128xf32> -> vector<4x128xf32>
    %12 = arith.addf %6, %11 : vector<4x128xf32>
    %c0_14 = arith.constant 0 : index
    %c1_15 = arith.constant 1 : index
    %c0_16 = arith.constant 0 : index
    %c0_17 = arith.constant 0 : index
    %13 = vector.load %arg1[%c0_14, %c1_15, %c0_16, %c0_17] : memref<1x5x5x64xbf16, #tpu.memory_space<vmem>>, vector<1x1x4x64xbf16>
    %14 = vector.shape_cast %13 : vector<1x1x4x64xbf16> to vector<4x64xbf16>
    %c2 = arith.constant 2 : index
    %c0_18 = arith.constant 0 : index
    %c0_19 = arith.constant 0 : index
    %15 = vector.load %arg2[%c2, %c0_18, %c0_19] : memref<4x64x128xbf16, #tpu.memory_space<vmem>>, vector<1x64x128xbf16>
    %16 = vector.shape_cast %15 : vector<1x64x128xbf16> to vector<64x128xbf16>
    %cst_20 = arith.constant dense<0.000000e+00> : vector<4x128xf32>
    %17 = tpu.matmul %14, %16, %cst_20 {dimension_numbers = #tpu.dot_dimension_numbers<[1], [0], [0], [1], [0, 0, 1, 1], [], []>} : vector<4x64xbf16>, vector<64x128xbf16>, vector<4x128xf32> -> vector<4x128xf32>
    %18 = arith.addf %12, %17 : vector<4x128xf32>
    %c0_21 = arith.constant 0 : index
    %c1_22 = arith.constant 1 : index
    %c1_23 = arith.constant 1 : index
    %c0_24 = arith.constant 0 : index
    %19 = vector.load %arg1[%c0_21, %c1_22, %c1_23, %c0_24] : memref<1x5x5x64xbf16, #tpu.memory_space<vmem>>, vector<1x1x4x64xbf16>
    %20 = vector.shape_cast %19 : vector<1x1x4x64xbf16> to vector<4x64xbf16>
    %c3 = arith.constant 3 : index
    %c0_25 = arith.constant 0 : index
    %c0_26 = arith.constant 0 : index
    %21 = vector.load %arg2[%c3, %c0_25, %c0_26] : memref<4x64x128xbf16, #tpu.memory_space<vmem>>, vector<1x64x128xbf16>
    %22 = vector.shape_cast %21 : vector<1x64x128xbf16> to vector<64x128xbf16>
    %cst_27 = arith.constant dense<0.000000e+00> : vector<4x128xf32>
    %23 = tpu.matmul %20, %22, %cst_27 {dimension_numbers = #tpu.dot_dimension_numbers<[1], [0], [0], [1], [0, 0, 1, 1], [], []>} : vector<4x64xbf16>, vector<64x128xbf16>, vector<4x128xf32> -> vector<4x128xf32>
    %24 = arith.addf %18, %23 : vector<4x128xf32>
    %c0_28 = arith.constant 0 : index
    %c0_29 = arith.constant 0 : index
    %25 = vector.load %arg3[%c0_28, %c0_29] : memref<1x128xf32, #tpu.memory_space<vmem>>, vector<1x128xf32>
    %26 = vector.broadcast %25 : vector<1x128xf32> to vector<4x128xf32>
    %27 = arith.addf %24, %26 : vector<4x128xf32>
    %28 = arith.negf %27 : vector<4x128xf32>
    %29 = math.exp %28 : vector<4x128xf32>
    %cst_30 = arith.constant 1.000000e+00 : f32
    %30 = vector.broadcast %cst_30 : f32 to vector<4x128xf32>
    %31 = arith.addf %30, %29 : vector<4x128xf32>
    %32 = arith.divf %30, %31 : vector<4x128xf32>
    %33 = arith.mulf %27, %32 : vector<4x128xf32>
    %34 = arith.truncf %33 : vector<4x128xf32> to vector<4x128xbf16>
    %c0_31 = arith.constant 0 : index
    %c0_32 = arith.constant 0 : index
    %c0_33 = arith.constant 0 : index
    %35 = vector.load %arg4[%c0_31, %c0_32, %c0_33] : memref<1x16x128xbf16, #tpu.memory_space<vmem>>, vector<1x4x128xbf16>
    %36 = vector.shape_cast %35 : vector<1x4x128xbf16> to vector<4x128xbf16>
    %37 = vector.shape_cast %34 : vector<4x128xbf16> to vector<1x4x128xbf16>
    tpu.vector_store %arg4[%c0_31, %c0_32, %c0_33], %37 {strides = array<i32>} : memref<1x16x128xbf16, #tpu.memory_space<vmem>>, vector<1x4x128xbf16>,
    %cst_34 = arith.constant 0.000000e+00 : f32
    %38 = vector.broadcast %cst_34 : f32 to vector<4x128xf32>
    %c0_35 = arith.constant 0 : index
    %c1_36 = arith.constant 1 : index
    %c0_37 = arith.constant 0 : index
    %c0_38 = arith.constant 0 : index
    %39 = vector.load %arg1[%c0_35, %c1_36, %c0_37, %c0_38] : memref<1x5x5x64xbf16, #tpu.memory_space<vmem>>, vector<1x1x4x64xbf16>
    %40 = vector.shape_cast %39 : vector<1x1x4x64xbf16> to vector<4x64xbf16>
    %c0_39 = arith.constant 0 : index
    %c0_40 = arith.constant 0 : index
    %c0_41 = arith.constant 0 : index
    %41 = vector.load %arg2[%c0_39, %c0_40, %c0_41] : memref<4x64x128xbf16, #tpu.memory_space<vmem>>, vector<1x64x128xbf16>
    %42 = vector.shape_cast %41 : vector<1x64x128xbf16> to vector<64x128xbf16>
    %cst_42 = arith.constant dense<0.000000e+00> : vector<4x128xf32>
    %43 = tpu.matmul %40, %42, %cst_42 {dimension_numbers = #tpu.dot_dimension_numbers<[1], [0], [0], [1], [0, 0, 1, 1], [], []>} : vector<4x64xbf16>, vector<64x128xbf16>, vector<4x128xf32> -> vector<4x128xf32>
    %44 = arith.addf %38, %43 : vector<4x128xf32>
    %c0_43 = arith.constant 0 : index
    %c1_44 = arith.constant 1 : index
    %c1_45 = arith.constant 1 : index
    %c0_46 = arith.constant 0 : index
    %45 = vector.load %arg1[%c0_43, %c1_44, %c1_45, %c0_46] : memref<1x5x5x64xbf16, #tpu.memory_space<vmem>>, vector<1x1x4x64xbf16>
    %46 = vector.shape_cast %45 : vector<1x1x4x64xbf16> to vector<4x64xbf16>
    %c1_47 = arith.constant 1 : index
    %c0_48 = arith.constant 0 : index
    %c0_49 = arith.constant 0 : index
    %47 = vector.load %arg2[%c1_47, %c0_48, %c0_49] : memref<4x64x128xbf16, #tpu.memory_space<vmem>>, vector<1x64x128xbf16>
    %48 = vector.shape_cast %47 : vector<1x64x128xbf16> to vector<64x128xbf16>
    %cst_50 = arith.constant dense<0.000000e+00> : vector<4x128xf32>
    %49 = tpu.matmul %46, %48, %cst_50 {dimension_numbers = #tpu.dot_dimension_numbers<[1], [0], [0], [1], [0, 0, 1, 1], [], []>} : vector<4x64xbf16>, vector<64x128xbf16>, vector<4x128xf32> -> vector<4x128xf32>
    %50 = arith.addf %44, %49 : vector<4x128xf32>
    %c0_51 = arith.constant 0 : index
    %c2_52 = arith.constant 2 : index
    %c0_53 = arith.constant 0 : index
    %c0_54 = arith.constant 0 : index
    %51 = vector.load %arg1[%c0_51, %c2_52, %c0_53, %c0_54] : memref<1x5x5x64xbf16, #tpu.memory_space<vmem>>, vector<1x1x4x64xbf16>
    %52 = vector.shape_cast %51 : vector<1x1x4x64xbf16> to vector<4x64xbf16>
    %c2_55 = arith.constant 2 : index
    %c0_56 = arith.constant 0 : index
    %c0_57 = arith.constant 0 : index
    %53 = vector.load %arg2[%c2_55, %c0_56, %c0_57] : memref<4x64x128xbf16, #tpu.memory_space<vmem>>, vector<1x64x128xbf16>
    %54 = vector.shape_cast %53 : vector<1x64x128xbf16> to vector<64x128xbf16>
    %cst_58 = arith.constant dense<0.000000e+00> : vector<4x128xf32>
    %55 = tpu.matmul %52, %54, %cst_58 {dimension_numbers = #tpu.dot_dimension_numbers<[1], [0], [0], [1], [0, 0, 1, 1], [], []>} : vector<4x64xbf16>, vector<64x128xbf16>, vector<4x128xf32> -> vector<4x128xf32>
    %56 = arith.addf %50, %55 : vector<4x128xf32>
    %c0_59 = arith.constant 0 : index
    %c2_60 = arith.constant 2 : index
    %c1_61 = arith.constant 1 : index
    %c0_62 = arith.constant 0 : index
    %57 = vector.load %arg1[%c0_59, %c2_60, %c1_61, %c0_62] : memref<1x5x5x64xbf16, #tpu.memory_space<vmem>>, vector<1x1x4x64xbf16>
    %58 = vector.shape_cast %57 : vector<1x1x4x64xbf16> to vector<4x64xbf16>
    %c3_63 = arith.constant 3 : index
    %c0_64 = arith.constant 0 : index
    %c0_65 = arith.constant 0 : index
    %59 = vector.load %arg2[%c3_63, %c0_64, %c0_65] : memref<4x64x128xbf16, #tpu.memory_space<vmem>>, vector<1x64x128xbf16>
    %60 = vector.shape_cast %59 : vector<1x64x128xbf16> to vector<64x128xbf16>
    %cst_66 = arith.constant dense<0.000000e+00> : vector<4x128xf32>
    %61 = tpu.matmul %58, %60, %cst_66 {dimension_numbers = #tpu.dot_dimension_numbers<[1], [0], [0], [1], [0, 0, 1, 1], [], []>} : vector<4x64xbf16>, vector<64x128xbf16>, vector<4x128xf32> -> vector<4x128xf32>
    %62 = arith.addf %56, %61 : vector<4x128xf32>
    %c0_67 = arith.constant 0 : index
    %c0_68 = arith.constant 0 : index
    %63 = vector.load %arg3[%c0_67, %c0_68] : memref<1x128xf32, #tpu.memory_space<vmem>>, vector<1x128xf32>
    %64 = vector.broadcast %63 : vector<1x128xf32> to vector<4x128xf32>
    %65 = arith.addf %62, %64 : vector<4x128xf32>
    %66 = arith.negf %65 : vector<4x128xf32>
    %67 = math.exp %66 : vector<4x128xf32>
    %cst_69 = arith.constant 1.000000e+00 : f32
    %68 = vector.broadcast %cst_69 : f32 to vector<4x128xf32>
    %69 = arith.addf %68, %67 : vector<4x128xf32>
    %70 = arith.divf %68, %69 : vector<4x128xf32>
    %71 = arith.mulf %65, %70 : vector<4x128xf32>
    %72 = arith.truncf %71 : vector<4x128xf32> to vector<4x128xbf16>
    %c0_70 = arith.constant 0 : index
    %c4 = arith.constant 4 : index
    %c0_71 = arith.constant 0 : index
    %73 = vector.load %arg4[%c0_70, %c4, %c0_71] : memref<1x16x128xbf16, #tpu.memory_space<vmem>>, vector<1x4x128xbf16>
    %74 = vector.shape_cast %73 : vector<1x4x128xbf16> to vector<4x128xbf16>
    %75 = vector.shape_cast %72 : vector<4x128xbf16> to vector<1x4x128xbf16>
    tpu.vector_store %arg4[%c0_70, %c4, %c0_71], %75 {strides = array<i32>} : memref<1x16x128xbf16, #tpu.memory_space<vmem>>, vector<1x4x128xbf16>,
    %cst_72 = arith.constant 0.000000e+00 : f32
    %76 = vector.broadcast %cst_72 : f32 to vector<4x128xf32>
    %c0_73 = arith.constant 0 : index
    %c2_74 = arith.constant 2 : index
    %c0_75 = arith.constant 0 : index
    %c0_76 = arith.constant 0 : index
    %77 = vector.load %arg1[%c0_73, %c2_74, %c0_75, %c0_76] : memref<1x5x5x64xbf16, #tpu.memory_space<vmem>>, vector<1x1x4x64xbf16>
    %78 = vector.shape_cast %77 : vector<1x1x4x64xbf16> to vector<4x64xbf16>
    %c0_77 = arith.constant 0 : index
    %c0_78 = arith.constant 0 : index
    %c0_79 = arith.constant 0 : index
    %79 = vector.load %arg2[%c0_77, %c0_78, %c0_79] : memref<4x64x128xbf16, #tpu.memory_space<vmem>>, vector<1x64x128xbf16>
    %80 = vector.shape_cast %79 : vector<1x64x128xbf16> to vector<64x128xbf16>
    %cst_80 = arith.constant dense<0.000000e+00> : vector<4x128xf32>
    %81 = tpu.matmul %78, %80, %cst_80 {dimension_numbers = #tpu.dot_dimension_numbers<[1], [0], [0], [1], [0, 0, 1, 1], [], []>} : vector<4x64xbf16>, vector<64x128xbf16>, vector<4x128xf32> -> vector<4x128xf32>
    %82 = arith.addf %76, %81 : vector<4x128xf32>
    %c0_81 = arith.constant 0 : index
    %c2_82 = arith.constant 2 : index
    %c1_83 = arith.constant 1 : index
    %c0_84 = arith.constant 0 : index
    %83 = vector.load %arg1[%c0_81, %c2_82, %c1_83, %c0_84] : memref<1x5x5x64xbf16, #tpu.memory_space<vmem>>, vector<1x1x4x64xbf16>
    %84 = vector.shape_cast %83 : vector<1x1x4x64xbf16> to vector<4x64xbf16>
    %c1_85 = arith.constant 1 : index
    %c0_86 = arith.constant 0 : index
    %c0_87 = arith.constant 0 : index
    %85 = vector.load %arg2[%c1_85, %c0_86, %c0_87] : memref<4x64x128xbf16, #tpu.memory_space<vmem>>, vector<1x64x128xbf16>
    %86 = vector.shape_cast %85 : vector<1x64x128xbf16> to vector<64x128xbf16>
    %cst_88 = arith.constant dense<0.000000e+00> : vector<4x128xf32>
    %87 = tpu.matmul %84, %86, %cst_88 {dimension_numbers = #tpu.dot_dimension_numbers<[1], [0], [0], [1], [0, 0, 1, 1], [], []>} : vector<4x64xbf16>, vector<64x128xbf16>, vector<4x128xf32> -> vector<4x128xf32>
    %88 = arith.addf %82, %87 : vector<4x128xf32>
    %c0_89 = arith.constant 0 : index
    %c3_90 = arith.constant 3 : index
    %c0_91 = arith.constant 0 : index
    %c0_92 = arith.constant 0 : index
    %89 = vector.load %arg1[%c0_89, %c3_90, %c0_91, %c0_92] : memref<1x5x5x64xbf16, #tpu.memory_space<vmem>>, vector<1x1x4x64xbf16>
    %90 = vector.shape_cast %89 : vector<1x1x4x64xbf16> to vector<4x64xbf16>
    %c2_93 = arith.constant 2 : index
    %c0_94 = arith.constant 0 : index
    %c0_95 = arith.constant 0 : index
    %91 = vector.load %arg2[%c2_93, %c0_94, %c0_95] : memref<4x64x128xbf16, #tpu.memory_space<vmem>>, vector<1x64x128xbf16>
    %92 = vector.shape_cast %91 : vector<1x64x128xbf16> to vector<64x128xbf16>
    %cst_96 = arith.constant dense<0.000000e+00> : vector<4x128xf32>
    %93 = tpu.matmul %90, %92, %cst_96 {dimension_numbers = #tpu.dot_dimension_numbers<[1], [0], [0], [1], [0, 0, 1, 1], [], []>} : vector<4x64xbf16>, vector<64x128xbf16>, vector<4x128xf32> -> vector<4x128xf32>
    %94 = arith.addf %88, %93 : vector<4x128xf32>
    %c0_97 = arith.constant 0 : index
    %c3_98 = arith.constant 3 : index
    %c1_99 = arith.constant 1 : index
    %c0_100 = arith.constant 0 : index
    %95 = vector.load %arg1[%c0_97, %c3_98, %c1_99, %c0_100] : memref<1x5x5x64xbf16, #tpu.memory_space<vmem>>, vector<1x1x4x64xbf16>
    %96 = vector.shape_cast %95 : vector<1x1x4x64xbf16> to vector<4x64xbf16>
    %c3_101 = arith.constant 3 : index
    %c0_102 = arith.constant 0 : index
    %c0_103 = arith.constant 0 : index
    %97 = vector.load %arg2[%c3_101, %c0_102, %c0_103] : memref<4x64x128xbf16, #tpu.memory_space<vmem>>, vector<1x64x128xbf16>
    %98 = vector.shape_cast %97 : vector<1x64x128xbf16> to vector<64x128xbf16>
    %cst_104 = arith.constant dense<0.000000e+00> : vector<4x128xf32>
    %99 = tpu.matmul %96, %98, %cst_104 {dimension_numbers = #tpu.dot_dimension_numbers<[1], [0], [0], [1], [0, 0, 1, 1], [], []>} : vector<4x64xbf16>, vector<64x128xbf16>, vector<4x128xf32> -> vector<4x128xf32>
    %100 = arith.addf %94, %99 : vector<4x128xf32>
    %c0_105 = arith.constant 0 : index
    %c0_106 = arith.constant 0 : index
    %101 = vector.load %arg3[%c0_105, %c0_106] : memref<1x128xf32, #tpu.memory_space<vmem>>, vector<1x128xf32>
    %102 = vector.broadcast %101 : vector<1x128xf32> to vector<4x128xf32>
    %103 = arith.addf %100, %102 : vector<4x128xf32>
    %104 = arith.negf %103 : vector<4x128xf32>
    %105 = math.exp %104 : vector<4x128xf32>
    %cst_107 = arith.constant 1.000000e+00 : f32
    %106 = vector.broadcast %cst_107 : f32 to vector<4x128xf32>
    %107 = arith.addf %106, %105 : vector<4x128xf32>
    %108 = arith.divf %106, %107 : vector<4x128xf32>
    %109 = arith.mulf %103, %108 : vector<4x128xf32>
    %110 = arith.truncf %109 : vector<4x128xf32> to vector<4x128xbf16>
    %c0_108 = arith.constant 0 : index
    %c8 = arith.constant 8 : index
    %c0_109 = arith.constant 0 : index
    %111 = vector.load %arg4[%c0_108, %c8, %c0_109] : memref<1x16x128xbf16, #tpu.memory_space<vmem>>, vector<1x4x128xbf16>
    %112 = vector.shape_cast %111 : vector<1x4x128xbf16> to vector<4x128xbf16>
    %113 = vector.shape_cast %110 : vector<4x128xbf16> to vector<1x4x128xbf16>
    tpu.vector_store %arg4[%c0_108, %c8, %c0_109], %113 {strides = array<i32>} : memref<1x16x128xbf16, #tpu.memory_space<vmem>>, vector<1x4x128xbf16>,
    %cst_110 = arith.constant 0.000000e+00 : f32
    %114 = vector.broadcast %cst_110 : f32 to vector<4x128xf32>
    %c0_111 = arith.constant 0 : index
    %c3_112 = arith.constant 3 : index
    %c0_113 = arith.constant 0 : index
    %c0_114 = arith.constant 0 : index
    %115 = vector.load %arg1[%c0_111, %c3_112, %c0_113, %c0_114] : memref<1x5x5x64xbf16, #tpu.memory_space<vmem>>, vector<1x1x4x64xbf16>
    %116 = vector.shape_cast %115 : vector<1x1x4x64xbf16> to vector<4x64xbf16>
    %c0_115 = arith.constant 0 : index
    %c0_116 = arith.constant 0 : index
    %c0_117 = arith.constant 0 : index
    %117 = vector.load %arg2[%c0_115, %c0_116, %c0_117] : memref<4x64x128xbf16, #tpu.memory_space<vmem>>, vector<1x64x128xbf16>
    %118 = vector.shape_cast %117 : vector<1x64x128xbf16> to vector<64x128xbf16>
    %cst_118 = arith.constant dense<0.000000e+00> : vector<4x128xf32>
    %119 = tpu.matmul %116, %118, %cst_118 {dimension_numbers = #tpu.dot_dimension_numbers<[1], [0], [0], [1], [0, 0, 1, 1], [], []>} : vector<4x64xbf16>, vector<64x128xbf16>, vector<4x128xf32> -> vector<4x128xf32>
    %120 = arith.addf %114, %119 : vector<4x128xf32>
    %c0_119 = arith.constant 0 : index
    %c3_120 = arith.constant 3 : index
    %c1_121 = arith.constant 1 : index
    %c0_122 = arith.constant 0 : index
    %121 = vector.load %arg1[%c0_119, %c3_120, %c1_121, %c0_122] : memref<1x5x5x64xbf16, #tpu.memory_space<vmem>>, vector<1x1x4x64xbf16>
    %122 = vector.shape_cast %121 : vector<1x1x4x64xbf16> to vector<4x64xbf16>
    %c1_123 = arith.constant 1 : index
    %c0_124 = arith.constant 0 : index
    %c0_125 = arith.constant 0 : index
    %123 = vector.load %arg2[%c1_123, %c0_124, %c0_125] : memref<4x64x128xbf16, #tpu.memory_space<vmem>>, vector<1x64x128xbf16>
    %124 = vector.shape_cast %123 : vector<1x64x128xbf16> to vector<64x128xbf16>
    %cst_126 = arith.constant dense<0.000000e+00> : vector<4x128xf32>
    %125 = tpu.matmul %122, %124, %cst_126 {dimension_numbers = #tpu.dot_dimension_numbers<[1], [0], [0], [1], [0, 0, 1, 1], [], []>} : vector<4x64xbf16>, vector<64x128xbf16>, vector<4x128xf32> -> vector<4x128xf32>
    %126 = arith.addf %120, %125 : vector<4x128xf32>
    %c0_127 = arith.constant 0 : index
    %c4_128 = arith.constant 4 : index
    %c0_129 = arith.constant 0 : index
    %c0_130 = arith.constant 0 : index
    %127 = vector.load %arg1[%c0_127, %c4_128, %c0_129, %c0_130] : memref<1x5x5x64xbf16, #tpu.memory_space<vmem>>, vector<1x1x4x64xbf16>
    %128 = vector.shape_cast %127 : vector<1x1x4x64xbf16> to vector<4x64xbf16>
    %c2_131 = arith.constant 2 : index
    %c0_132 = arith.constant 0 : index
    %c0_133 = arith.constant 0 : index
    %129 = vector.load %arg2[%c2_131, %c0_132, %c0_133] : memref<4x64x128xbf16, #tpu.memory_space<vmem>>, vector<1x64x128xbf16>
    %130 = vector.shape_cast %129 : vector<1x64x128xbf16> to vector<64x128xbf16>
    %cst_134 = arith.constant dense<0.000000e+00> : vector<4x128xf32>
    %131 = tpu.matmul %128, %130, %cst_134 {dimension_numbers = #tpu.dot_dimension_numbers<[1], [0], [0], [1], [0, 0, 1, 1], [], []>} : vector<4x64xbf16>, vector<64x128xbf16>, vector<4x128xf32> -> vector<4x128xf32>
    %132 = arith.addf %126, %131 : vector<4x128xf32>
    %c0_135 = arith.constant 0 : index
    %c4_136 = arith.constant 4 : index
    %c1_137 = arith.constant 1 : index
    %c0_138 = arith.constant 0 : index
    %133 = vector.load %arg1[%c0_135, %c4_136, %c1_137, %c0_138] : memref<1x5x5x64xbf16, #tpu.memory_space<vmem>>, vector<1x1x4x64xbf16>
    %134 = vector.shape_cast %133 : vector<1x1x4x64xbf16> to vector<4x64xbf16>
    %c3_139 = arith.constant 3 : index
    %c0_140 = arith.constant 0 : index
    %c0_141 = arith.constant 0 : index
    %135 = vector.load %arg2[%c3_139, %c0_140, %c0_141] : memref<4x64x128xbf16, #tpu.memory_space<vmem>>, vector<1x64x128xbf16>
    %136 = vector.shape_cast %135 : vector<1x64x128xbf16> to vector<64x128xbf16>
    %cst_142 = arith.constant dense<0.000000e+00> : vector<4x128xf32>
    %137 = tpu.matmul %134, %136, %cst_142 {dimension_numbers = #tpu.dot_dimension_numbers<[1], [0], [0], [1], [0, 0, 1, 1], [], []>} : vector<4x64xbf16>, vector<64x128xbf16>, vector<4x128xf32> -> vector<4x128xf32>
    %138 = arith.addf %132, %137 : vector<4x128xf32>
    %c0_143 = arith.constant 0 : index
    %c0_144 = arith.constant 0 : index
    %139 = vector.load %arg3[%c0_143, %c0_144] : memref<1x128xf32, #tpu.memory_space<vmem>>, vector<1x128xf32>
    %140 = vector.broadcast %139 : vector<1x128xf32> to vector<4x128xf32>
    %141 = arith.addf %138, %140 : vector<4x128xf32>
    %142 = arith.negf %141 : vector<4x128xf32>
    %143 = math.exp %142 : vector<4x128xf32>
    %cst_145 = arith.constant 1.000000e+00 : f32
    %144 = vector.broadcast %cst_145 : f32 to vector<4x128xf32>
    %145 = arith.addf %144, %143 : vector<4x128xf32>
    %146 = arith.divf %144, %145 : vector<4x128xf32>
    %147 = arith.mulf %141, %146 : vector<4x128xf32>
    %148 = arith.truncf %147 : vector<4x128xf32> to vector<4x128xbf16>
    %c0_146 = arith.constant 0 : index
    %c12 = arith.constant 12 : index
    %c0_147 = arith.constant 0 : index
    %149 = vector.load %arg4[%c0_146, %c12, %c0_147] : memref<1x16x128xbf16, #tpu.memory_space<vmem>>, vector<1x4x128xbf16>
    %150 = vector.shape_cast %149 : vector<1x4x128xbf16> to vector<4x128xbf16>
    %151 = vector.shape_cast %148 : vector<4x128xbf16> to vector<1x4x128xbf16>
    tpu.vector_store %arg4[%c0_146, %c12, %c0_147], %151 {strides = array<i32>} : memref<1x16x128xbf16, #tpu.memory_space<vmem>>, vector<1x4x128xbf16>,
    return
  }
  func.func @transform_0(%arg0: i32) -> (i32, i32, i32, i32) {
    %c0_i32 = arith.constant 0 : i32
    %c0_i32_0 = arith.constant 0 : i32
    %c0_i32_1 = arith.constant 0 : i32
    %c0_i32_2 = arith.constant 0 : i32
    return %arg0, %c0_i32, %c0_i32_0, %c0_i32_1 : i32, i32, i32, i32
  }
  func.func @transform_1(%arg0: i32) -> (i32, i32, i32) {
    %c0_i32 = arith.constant 0 : i32
    %c0_i32_0 = arith.constant 0 : i32
    %c0_i32_1 = arith.constant 0 : i32
    %c0_i32_2 = arith.constant 0 : i32
    return %c0_i32, %c0_i32_0, %c0_i32_1 : i32, i32, i32
  }
  func.func @transform_2(%arg0: i32) -> (i32, i32) {
    %c0_i32 = arith.constant 0 : i32
    %c0_i32_0 = arith.constant 0 : i32
    %c0_i32_1 = arith.constant 0 : i32
    return %c0_i32, %c0_i32_0 : i32, i32
  }
  func.func @transform_3(%arg0: i32) -> (i32, i32, i32) {
    %c0_i32 = arith.constant 0 : i32
    %c0_i32_0 = arith.constant 0 : i32
    %c0_i32_1 = arith.constant 0 : i32
    return %arg0, %c0_i32, %c0_i32_0 : i32, i32, i32
  }
}

module attributes {stable_mosaic.version = 11 : i64} {
  func.func @_conv3x3s2_kernel(%arg0: i32, %arg1: memref<1x3x3x128xbf16, #tpu.memory_space<vmem>>, %arg2: memref<4x128x128xbf16, #tpu.memory_space<vmem>>, %arg3: memref<1x128xf32, #tpu.memory_space<vmem>>, %arg4: memref<1x4x128xbf16, #tpu.memory_space<vmem>>) attributes {dimension_semantics = [#tpu.dimension_semantics<parallel>], iteration_bounds = array<i64: 2>, scalar_prefetch = 0 : i64, scratch_operands = 0 : i64, tpu.core_type = #tpu.core_type<tc>, window_params = [{transform_indices = @transform_0, window_bounds = array<i64: 1, 3, 3, 128>}, {pipeline_mode = #tpu.pipeline_mode<synchronous>, transform_indices = @transform_1, window_bounds = array<i64: 4, 128, 128>}, {pipeline_mode = #tpu.pipeline_mode<synchronous>, transform_indices = @transform_2, window_bounds = array<i64: 1, 128>}, {transform_indices = @transform_3, window_bounds = array<i64: 1, 4, 128>}]} {
    %cst = arith.constant 0.000000e+00 : f32
    %0 = vector.broadcast %cst : f32 to vector<2x128xf32>
    %c0 = arith.constant 0 : index
    %c0_0 = arith.constant 0 : index
    %c0_1 = arith.constant 0 : index
    %c0_2 = arith.constant 0 : index
    %1 = vector.load %arg1[%c0, %c0_0, %c0_1, %c0_2] : memref<1x3x3x128xbf16, #tpu.memory_space<vmem>>, vector<1x1x2x128xbf16>
    %2 = vector.shape_cast %1 : vector<1x1x2x128xbf16> to vector<2x128xbf16>
    %c0_3 = arith.constant 0 : index
    %c0_4 = arith.constant 0 : index
    %c0_5 = arith.constant 0 : index
    %3 = vector.load %arg2[%c0_3, %c0_4, %c0_5] : memref<4x128x128xbf16, #tpu.memory_space<vmem>>, vector<1x128x128xbf16>
    %4 = vector.shape_cast %3 : vector<1x128x128xbf16> to vector<128x128xbf16>
    %cst_6 = arith.constant dense<0.000000e+00> : vector<2x128xf32>
    %5 = tpu.matmul %2, %4, %cst_6 {dimension_numbers = #tpu.dot_dimension_numbers<[1], [0], [0], [1], [0, 0, 1, 1], [], []>} : vector<2x128xbf16>, vector<128x128xbf16>, vector<2x128xf32> -> vector<2x128xf32>
    %6 = arith.addf %0, %5 : vector<2x128xf32>
    %c0_7 = arith.constant 0 : index
    %c0_8 = arith.constant 0 : index
    %c1 = arith.constant 1 : index
    %c0_9 = arith.constant 0 : index
    %7 = vector.load %arg1[%c0_7, %c0_8, %c1, %c0_9] : memref<1x3x3x128xbf16, #tpu.memory_space<vmem>>, vector<1x1x2x128xbf16>
    %8 = vector.shape_cast %7 : vector<1x1x2x128xbf16> to vector<2x128xbf16>
    %c1_10 = arith.constant 1 : index
    %c0_11 = arith.constant 0 : index
    %c0_12 = arith.constant 0 : index
    %9 = vector.load %arg2[%c1_10, %c0_11, %c0_12] : memref<4x128x128xbf16, #tpu.memory_space<vmem>>, vector<1x128x128xbf16>
    %10 = vector.shape_cast %9 : vector<1x128x128xbf16> to vector<128x128xbf16>
    %cst_13 = arith.constant dense<0.000000e+00> : vector<2x128xf32>
    %11 = tpu.matmul %8, %10, %cst_13 {dimension_numbers = #tpu.dot_dimension_numbers<[1], [0], [0], [1], [0, 0, 1, 1], [], []>} : vector<2x128xbf16>, vector<128x128xbf16>, vector<2x128xf32> -> vector<2x128xf32>
    %12 = arith.addf %6, %11 : vector<2x128xf32>
    %c0_14 = arith.constant 0 : index
    %c1_15 = arith.constant 1 : index
    %c0_16 = arith.constant 0 : index
    %c0_17 = arith.constant 0 : index
    %13 = vector.load %arg1[%c0_14, %c1_15, %c0_16, %c0_17] : memref<1x3x3x128xbf16, #tpu.memory_space<vmem>>, vector<1x1x2x128xbf16>
    %14 = vector.shape_cast %13 : vector<1x1x2x128xbf16> to vector<2x128xbf16>
    %c2 = arith.constant 2 : index
    %c0_18 = arith.constant 0 : index
    %c0_19 = arith.constant 0 : index
    %15 = vector.load %arg2[%c2, %c0_18, %c0_19] : memref<4x128x128xbf16, #tpu.memory_space<vmem>>, vector<1x128x128xbf16>
    %16 = vector.shape_cast %15 : vector<1x128x128xbf16> to vector<128x128xbf16>
    %cst_20 = arith.constant dense<0.000000e+00> : vector<2x128xf32>
    %17 = tpu.matmul %14, %16, %cst_20 {dimension_numbers = #tpu.dot_dimension_numbers<[1], [0], [0], [1], [0, 0, 1, 1], [], []>} : vector<2x128xbf16>, vector<128x128xbf16>, vector<2x128xf32> -> vector<2x128xf32>
    %18 = arith.addf %12, %17 : vector<2x128xf32>
    %c0_21 = arith.constant 0 : index
    %c1_22 = arith.constant 1 : index
    %c1_23 = arith.constant 1 : index
    %c0_24 = arith.constant 0 : index
    %19 = vector.load %arg1[%c0_21, %c1_22, %c1_23, %c0_24] : memref<1x3x3x128xbf16, #tpu.memory_space<vmem>>, vector<1x1x2x128xbf16>
    %20 = vector.shape_cast %19 : vector<1x1x2x128xbf16> to vector<2x128xbf16>
    %c3 = arith.constant 3 : index
    %c0_25 = arith.constant 0 : index
    %c0_26 = arith.constant 0 : index
    %21 = vector.load %arg2[%c3, %c0_25, %c0_26] : memref<4x128x128xbf16, #tpu.memory_space<vmem>>, vector<1x128x128xbf16>
    %22 = vector.shape_cast %21 : vector<1x128x128xbf16> to vector<128x128xbf16>
    %cst_27 = arith.constant dense<0.000000e+00> : vector<2x128xf32>
    %23 = tpu.matmul %20, %22, %cst_27 {dimension_numbers = #tpu.dot_dimension_numbers<[1], [0], [0], [1], [0, 0, 1, 1], [], []>} : vector<2x128xbf16>, vector<128x128xbf16>, vector<2x128xf32> -> vector<2x128xf32>
    %24 = arith.addf %18, %23 : vector<2x128xf32>
    %c0_28 = arith.constant 0 : index
    %c0_29 = arith.constant 0 : index
    %25 = vector.load %arg3[%c0_28, %c0_29] : memref<1x128xf32, #tpu.memory_space<vmem>>, vector<1x128xf32>
    %26 = vector.broadcast %25 : vector<1x128xf32> to vector<2x128xf32>
    %27 = arith.addf %24, %26 : vector<2x128xf32>
    %28 = arith.negf %27 : vector<2x128xf32>
    %29 = math.exp %28 : vector<2x128xf32>
    %cst_30 = arith.constant 1.000000e+00 : f32
    %30 = vector.broadcast %cst_30 : f32 to vector<2x128xf32>
    %31 = arith.addf %30, %29 : vector<2x128xf32>
    %32 = arith.divf %30, %31 : vector<2x128xf32>
    %33 = arith.mulf %27, %32 : vector<2x128xf32>
    %34 = arith.truncf %33 : vector<2x128xf32> to vector<2x128xbf16>
    %c0_31 = arith.constant 0 : index
    %c0_32 = arith.constant 0 : index
    %c0_33 = arith.constant 0 : index
    %35 = vector.load %arg4[%c0_31, %c0_32, %c0_33] : memref<1x4x128xbf16, #tpu.memory_space<vmem>>, vector<1x2x128xbf16>
    %36 = vector.shape_cast %35 : vector<1x2x128xbf16> to vector<2x128xbf16>
    %37 = vector.shape_cast %34 : vector<2x128xbf16> to vector<1x2x128xbf16>
    tpu.vector_store %arg4[%c0_31, %c0_32, %c0_33], %37 {strides = array<i32>} : memref<1x4x128xbf16, #tpu.memory_space<vmem>>, vector<1x2x128xbf16>,
    %cst_34 = arith.constant 0.000000e+00 : f32
    %38 = vector.broadcast %cst_34 : f32 to vector<2x128xf32>
    %c0_35 = arith.constant 0 : index
    %c1_36 = arith.constant 1 : index
    %c0_37 = arith.constant 0 : index
    %c0_38 = arith.constant 0 : index
    %39 = vector.load %arg1[%c0_35, %c1_36, %c0_37, %c0_38] : memref<1x3x3x128xbf16, #tpu.memory_space<vmem>>, vector<1x1x2x128xbf16>
    %40 = vector.shape_cast %39 : vector<1x1x2x128xbf16> to vector<2x128xbf16>
    %c0_39 = arith.constant 0 : index
    %c0_40 = arith.constant 0 : index
    %c0_41 = arith.constant 0 : index
    %41 = vector.load %arg2[%c0_39, %c0_40, %c0_41] : memref<4x128x128xbf16, #tpu.memory_space<vmem>>, vector<1x128x128xbf16>
    %42 = vector.shape_cast %41 : vector<1x128x128xbf16> to vector<128x128xbf16>
    %cst_42 = arith.constant dense<0.000000e+00> : vector<2x128xf32>
    %43 = tpu.matmul %40, %42, %cst_42 {dimension_numbers = #tpu.dot_dimension_numbers<[1], [0], [0], [1], [0, 0, 1, 1], [], []>} : vector<2x128xbf16>, vector<128x128xbf16>, vector<2x128xf32> -> vector<2x128xf32>
    %44 = arith.addf %38, %43 : vector<2x128xf32>
    %c0_43 = arith.constant 0 : index
    %c1_44 = arith.constant 1 : index
    %c1_45 = arith.constant 1 : index
    %c0_46 = arith.constant 0 : index
    %45 = vector.load %arg1[%c0_43, %c1_44, %c1_45, %c0_46] : memref<1x3x3x128xbf16, #tpu.memory_space<vmem>>, vector<1x1x2x128xbf16>
    %46 = vector.shape_cast %45 : vector<1x1x2x128xbf16> to vector<2x128xbf16>
    %c1_47 = arith.constant 1 : index
    %c0_48 = arith.constant 0 : index
    %c0_49 = arith.constant 0 : index
    %47 = vector.load %arg2[%c1_47, %c0_48, %c0_49] : memref<4x128x128xbf16, #tpu.memory_space<vmem>>, vector<1x128x128xbf16>
    %48 = vector.shape_cast %47 : vector<1x128x128xbf16> to vector<128x128xbf16>
    %cst_50 = arith.constant dense<0.000000e+00> : vector<2x128xf32>
    %49 = tpu.matmul %46, %48, %cst_50 {dimension_numbers = #tpu.dot_dimension_numbers<[1], [0], [0], [1], [0, 0, 1, 1], [], []>} : vector<2x128xbf16>, vector<128x128xbf16>, vector<2x128xf32> -> vector<2x128xf32>
    %50 = arith.addf %44, %49 : vector<2x128xf32>
    %c0_51 = arith.constant 0 : index
    %c2_52 = arith.constant 2 : index
    %c0_53 = arith.constant 0 : index
    %c0_54 = arith.constant 0 : index
    %51 = vector.load %arg1[%c0_51, %c2_52, %c0_53, %c0_54] : memref<1x3x3x128xbf16, #tpu.memory_space<vmem>>, vector<1x1x2x128xbf16>
    %52 = vector.shape_cast %51 : vector<1x1x2x128xbf16> to vector<2x128xbf16>
    %c2_55 = arith.constant 2 : index
    %c0_56 = arith.constant 0 : index
    %c0_57 = arith.constant 0 : index
    %53 = vector.load %arg2[%c2_55, %c0_56, %c0_57] : memref<4x128x128xbf16, #tpu.memory_space<vmem>>, vector<1x128x128xbf16>
    %54 = vector.shape_cast %53 : vector<1x128x128xbf16> to vector<128x128xbf16>
    %cst_58 = arith.constant dense<0.000000e+00> : vector<2x128xf32>
    %55 = tpu.matmul %52, %54, %cst_58 {dimension_numbers = #tpu.dot_dimension_numbers<[1], [0], [0], [1], [0, 0, 1, 1], [], []>} : vector<2x128xbf16>, vector<128x128xbf16>, vector<2x128xf32> -> vector<2x128xf32>
    %56 = arith.addf %50, %55 : vector<2x128xf32>
    %c0_59 = arith.constant 0 : index
    %c2_60 = arith.constant 2 : index
    %c1_61 = arith.constant 1 : index
    %c0_62 = arith.constant 0 : index
    %57 = vector.load %arg1[%c0_59, %c2_60, %c1_61, %c0_62] : memref<1x3x3x128xbf16, #tpu.memory_space<vmem>>, vector<1x1x2x128xbf16>
    %58 = vector.shape_cast %57 : vector<1x1x2x128xbf16> to vector<2x128xbf16>
    %c3_63 = arith.constant 3 : index
    %c0_64 = arith.constant 0 : index
    %c0_65 = arith.constant 0 : index
    %59 = vector.load %arg2[%c3_63, %c0_64, %c0_65] : memref<4x128x128xbf16, #tpu.memory_space<vmem>>, vector<1x128x128xbf16>
    %60 = vector.shape_cast %59 : vector<1x128x128xbf16> to vector<128x128xbf16>
    %cst_66 = arith.constant dense<0.000000e+00> : vector<2x128xf32>
    %61 = tpu.matmul %58, %60, %cst_66 {dimension_numbers = #tpu.dot_dimension_numbers<[1], [0], [0], [1], [0, 0, 1, 1], [], []>} : vector<2x128xbf16>, vector<128x128xbf16>, vector<2x128xf32> -> vector<2x128xf32>
    %62 = arith.addf %56, %61 : vector<2x128xf32>
    %c0_67 = arith.constant 0 : index
    %c0_68 = arith.constant 0 : index
    %63 = vector.load %arg3[%c0_67, %c0_68] : memref<1x128xf32, #tpu.memory_space<vmem>>, vector<1x128xf32>
    %64 = vector.broadcast %63 : vector<1x128xf32> to vector<2x128xf32>
    %65 = arith.addf %62, %64 : vector<2x128xf32>
    %66 = arith.negf %65 : vector<2x128xf32>
    %67 = math.exp %66 : vector<2x128xf32>
    %cst_69 = arith.constant 1.000000e+00 : f32
    %68 = vector.broadcast %cst_69 : f32 to vector<2x128xf32>
    %69 = arith.addf %68, %67 : vector<2x128xf32>
    %70 = arith.divf %68, %69 : vector<2x128xf32>
    %71 = arith.mulf %65, %70 : vector<2x128xf32>
    %72 = arith.truncf %71 : vector<2x128xf32> to vector<2x128xbf16>
    %c0_70 = arith.constant 0 : index
    %c2_71 = arith.constant 2 : index
    %c0_72 = arith.constant 0 : index
    %73 = vector.load %arg4[%c0_70, %c2_71, %c0_72] : memref<1x4x128xbf16, #tpu.memory_space<vmem>>, vector<1x2x128xbf16>
    %74 = vector.shape_cast %73 : vector<1x2x128xbf16> to vector<2x128xbf16>
    %75 = vector.shape_cast %72 : vector<2x128xbf16> to vector<1x2x128xbf16>
    tpu.vector_store %arg4[%c0_70, %c2_71, %c0_72], %75 {strides = array<i32>} : memref<1x4x128xbf16, #tpu.memory_space<vmem>>, vector<1x2x128xbf16>,
    return
  }
  func.func @transform_0(%arg0: i32) -> (i32, i32, i32, i32) {
    %c0_i32 = arith.constant 0 : i32
    %c0_i32_0 = arith.constant 0 : i32
    %c0_i32_1 = arith.constant 0 : i32
    %c0_i32_2 = arith.constant 0 : i32
    return %arg0, %c0_i32, %c0_i32_0, %c0_i32_1 : i32, i32, i32, i32
  }
  func.func @transform_1(%arg0: i32) -> (i32, i32, i32) {
    %c0_i32 = arith.constant 0 : i32
    %c0_i32_0 = arith.constant 0 : i32
    %c0_i32_1 = arith.constant 0 : i32
    %c0_i32_2 = arith.constant 0 : i32
    return %c0_i32, %c0_i32_0, %c0_i32_1 : i32, i32, i32
  }
  func.func @transform_2(%arg0: i32) -> (i32, i32) {
    %c0_i32 = arith.constant 0 : i32
    %c0_i32_0 = arith.constant 0 : i32
    %c0_i32_1 = arith.constant 0 : i32
    return %c0_i32, %c0_i32_0 : i32, i32
  }
  func.func @transform_3(%arg0: i32) -> (i32, i32, i32) {
    %c0_i32 = arith.constant 0 : i32
    %c0_i32_0 = arith.constant 0 : i32
    %c0_i32_1 = arith.constant 0 : i32
    return %arg0, %c0_i32, %c0_i32_0 : i32, i32, i32
  }
}

module attributes {stable_mosaic.version = 11 : i64} {
  func.func @_head_decode_kernel(%arg0: i32, %arg1: memref<1x4x64xbf16, #tpu.memory_space<vmem>>, %arg2: memref<64x128xbf16, #tpu.memory_space<vmem>>, %arg3: memref<1x128xf32, #tpu.memory_space<vmem>>, %arg4: memref<1x4x128xf32, #tpu.memory_space<vmem>>) attributes {dimension_semantics = [#tpu.dimension_semantics<parallel>], iteration_bounds = array<i64: 2>, scalar_prefetch = 0 : i64, scratch_operands = 0 : i64, tpu.core_type = #tpu.core_type<tc>, window_params = [{transform_indices = @transform_0, window_bounds = array<i64: 1, 4, 64>}, {pipeline_mode = #tpu.pipeline_mode<synchronous>, transform_indices = @transform_1, window_bounds = array<i64: 64, 128>}, {pipeline_mode = #tpu.pipeline_mode<synchronous>, transform_indices = @transform_2, window_bounds = array<i64: 1, 128>}, {transform_indices = @transform_3, window_bounds = array<i64: 1, 4, 128>}]} {
    %c0 = arith.constant 0 : index
    %c0_0 = arith.constant 0 : index
    %c0_1 = arith.constant 0 : index
    %0 = vector.load %arg1[%c0, %c0_0, %c0_1] : memref<1x4x64xbf16, #tpu.memory_space<vmem>>, vector<1x4x64xbf16>
    %1 = vector.shape_cast %0 : vector<1x4x64xbf16> to vector<4x64xbf16>
    %c0_2 = arith.constant 0 : index
    %c0_3 = arith.constant 0 : index
    %2 = vector.load %arg2[%c0_2, %c0_3] : memref<64x128xbf16, #tpu.memory_space<vmem>>, vector<64x128xbf16>
    %cst = arith.constant dense<0.000000e+00> : vector<4x128xf32>
    %3 = tpu.matmul %1, %2, %cst {dimension_numbers = #tpu.dot_dimension_numbers<[1], [0], [0], [1], [0, 0, 1, 1], [], []>} : vector<4x64xbf16>, vector<64x128xbf16>, vector<4x128xf32> -> vector<4x128xf32>
    %c0_4 = arith.constant 0 : index
    %c0_5 = arith.constant 0 : index
    %4 = vector.load %arg3[%c0_4, %c0_5] : memref<1x128xf32, #tpu.memory_space<vmem>>, vector<1x128xf32>
    %5 = vector.broadcast %4 : vector<1x128xf32> to vector<4x128xf32>
    %6 = arith.addf %3, %5 : vector<4x128xf32>
    %7 = arith.negf %6 : vector<4x128xf32>
    %8 = math.exp %7 : vector<4x128xf32>
    %cst_6 = arith.constant 1.000000e+00 : f32
    %9 = vector.broadcast %cst_6 : f32 to vector<4x128xf32>
    %10 = arith.addf %9, %8 : vector<4x128xf32>
    %11 = arith.divf %9, %10 : vector<4x128xf32>
    %12 = tpu.iota {dimensions = array<i32: 1>} : vector<4x128xi32>
    %13 = tpu.iota {dimensions = array<i32: 0>} : vector<4x128xi32>
    %c15_i32 = arith.constant 15 : i32
    %14 = vector.broadcast %c15_i32 : i32 to vector<4x128xi32>
    %15 = arith.andi %12, %14 : vector<4x128xi32>
    %c4_i32 = arith.constant 4 : i32
    %16 = vector.broadcast %c4_i32 : i32 to vector<4x128xi32>
    %17 = arith.shrsi %12, %16 : vector<4x128xi32>
    %18 = arith.sitofp %13 : vector<4x128xi32> to vector<4x128xf32>
    %cst_7 = arith.constant 2.000000e+00 : f32
    %19 = vector.broadcast %cst_7 : f32 to vector<4x128xf32>
    %20 = arith.divf %18, %19 : vector<4x128xf32>
    %21 = math.floor %20 : vector<4x128xf32>
    %cst_8 = arith.constant 2.000000e+00 : f32
    %22 = vector.broadcast %cst_8 : f32 to vector<4x128xf32>
    %23 = arith.mulf %21, %22 : vector<4x128xf32>
    %24 = arith.subf %18, %23 : vector<4x128xf32>
    %c0_i32 = arith.constant 0 : i32
    %25 = vector.broadcast %c0_i32 : i32 to vector<4x128xi32>
    %26 = arith.cmpi eq, %15, %25 : vector<4x128xi32>
    %27 = arith.select %26, %24, %21 : vector<4x128xi1>, vector<4x128xf32>
    %cst_9 = arith.constant 2.000000e+00 : f32
    %28 = vector.broadcast %cst_9 : f32 to vector<4x128xf32>
    %29 = arith.mulf %11, %28 : vector<4x128xf32>
    %cst_10 = arith.constant 5.000000e-01 : f32
    %30 = vector.broadcast %cst_10 : f32 to vector<4x128xf32>
    %31 = arith.subf %29, %30 : vector<4x128xf32>
    %32 = arith.addf %31, %27 : vector<4x128xf32>
    %cst_11 = arith.constant 1.600000e+01 : f32
    %33 = vector.broadcast %cst_11 : f32 to vector<4x128xf32>
    %34 = arith.mulf %32, %33 : vector<4x128xf32>
    %c0_i32_12 = arith.constant 0 : i32
    %35 = vector.broadcast %c0_i32_12 : i32 to vector<4x128xi32>
    %36 = arith.cmpi eq, %17, %35 : vector<4x128xi32>
    %c1_i32 = arith.constant 1 : i32
    %37 = vector.broadcast %c1_i32 : i32 to vector<4x128xi32>
    %38 = arith.cmpi eq, %17, %37 : vector<4x128xi32>
    %cst_13 = arith.constant 6.200000e+01 : f32
    %cst_14 = arith.constant 5.900000e+01 : f32
    %39 = vector.broadcast %cst_13 : f32 to vector<4x128xf32>
    %40 = vector.broadcast %cst_14 : f32 to vector<4x128xf32>
    %41 = arith.select %38, %39, %40 : vector<4x128xi1>, vector<4x128xf32>
    %cst_15 = arith.constant 3.000000e+01 : f32
    %42 = vector.broadcast %cst_15 : f32 to vector<4x128xf32>
    %43 = arith.select %36, %42, %41 : vector<4x128xi1>, vector<4x128xf32>
    %c0_i32_16 = arith.constant 0 : i32
    %44 = vector.broadcast %c0_i32_16 : i32 to vector<4x128xi32>
    %45 = arith.cmpi eq, %17, %44 : vector<4x128xi32>
    %c1_i32_17 = arith.constant 1 : i32
    %46 = vector.broadcast %c1_i32_17 : i32 to vector<4x128xi32>
    %47 = arith.cmpi eq, %17, %46 : vector<4x128xi32>
    %cst_18 = arith.constant 4.500000e+01 : f32
    %cst_19 = arith.constant 1.190000e+02 : f32
    %48 = vector.broadcast %cst_18 : f32 to vector<4x128xf32>
    %49 = vector.broadcast %cst_19 : f32 to vector<4x128xf32>
    %50 = arith.select %47, %48, %49 : vector<4x128xi1>, vector<4x128xf32>
    %cst_20 = arith.constant 6.100000e+01 : f32
    %51 = vector.broadcast %cst_20 : f32 to vector<4x128xf32>
    %52 = arith.select %45, %51, %50 : vector<4x128xi1>, vector<4x128xf32>
    %cst_21 = arith.constant 2.000000e+00 : f32
    %53 = vector.broadcast %cst_21 : f32 to vector<4x128xf32>
    %54 = arith.mulf %11, %53 : vector<4x128xf32>
    %55 = arith.mulf %54, %54 : vector<4x128xf32>
    %c2_i32 = arith.constant 2 : i32
    %56 = vector.broadcast %c2_i32 : i32 to vector<4x128xi32>
    %57 = arith.cmpi eq, %15, %56 : vector<4x128xi32>
    %58 = arith.select %57, %43, %52 : vector<4x128xi1>, vector<4x128xf32>
    %59 = arith.mulf %55, %58 : vector<4x128xf32>
    %c2_i32_22 = arith.constant 2 : i32
    %60 = vector.broadcast %c2_i32_22 : i32 to vector<4x128xi32>
    %61 = arith.cmpi slt, %15, %60 : vector<4x128xi32>
    %c4_i32_23 = arith.constant 4 : i32
    %62 = vector.broadcast %c4_i32_23 : i32 to vector<4x128xi32>
    %63 = arith.cmpi slt, %15, %62 : vector<4x128xi32>
    %64 = arith.select %63, %59, %11 : vector<4x128xi1>, vector<4x128xf32>
    %65 = arith.select %61, %34, %64 : vector<4x128xi1>, vector<4x128xf32>
    %c0_24 = arith.constant 0 : index
    %c0_25 = arith.constant 0 : index
    %c0_26 = arith.constant 0 : index
    %66 = vector.load %arg4[%c0_24, %c0_25, %c0_26] : memref<1x4x128xf32, #tpu.memory_space<vmem>>, vector<1x4x128xf32>
    %67 = vector.shape_cast %66 : vector<1x4x128xf32> to vector<4x128xf32>
    %68 = vector.shape_cast %65 : vector<4x128xf32> to vector<1x4x128xf32>
    tpu.vector_store %arg4[%c0_24, %c0_25, %c0_26], %68 {strides = array<i32>} : memref<1x4x128xf32, #tpu.memory_space<vmem>>, vector<1x4x128xf32>,
    return
  }
  func.func @transform_0(%arg0: i32) -> (i32, i32, i32) {
    %c0_i32 = arith.constant 0 : i32
    %c0_i32_0 = arith.constant 0 : i32
    %c0_i32_1 = arith.constant 0 : i32
    return %arg0, %c0_i32, %c0_i32_0 : i32, i32, i32
  }
  func.func @transform_1(%arg0: i32) -> (i32, i32) {
    %c0_i32 = arith.constant 0 : i32
    %c0_i32_0 = arith.constant 0 : i32
    %c0_i32_1 = arith.constant 0 : i32
    return %c0_i32, %c0_i32_0 : i32, i32
  }
  func.func @transform_2(%arg0: i32) -> (i32, i32) {
    %c0_i32 = arith.constant 0 : i32
    %c0_i32_0 = arith.constant 0 : i32
    %c0_i32_1 = arith.constant 0 : i32
    return %c0_i32, %c0_i32_0 : i32, i32
  }
  func.func @transform_3(%arg0: i32) -> (i32, i32, i32) {
    %c0_i32 = arith.constant 0 : i32
    %c0_i32_0 = arith.constant 0 : i32
    %c0_i32_1 = arith.constant 0 : i32
    return %arg0, %c0_i32, %c0_i32_0 : i32, i32, i32
  }
}

module attributes {stable_mosaic.version = 11 : i64} {
  func.func @_head_decode_kernel(%arg0: i32, %arg1: memref<1x16x32xbf16, #tpu.memory_space<vmem>>, %arg2: memref<32x128xbf16, #tpu.memory_space<vmem>>, %arg3: memref<1x128xf32, #tpu.memory_space<vmem>>, %arg4: memref<1x16x128xf32, #tpu.memory_space<vmem>>) attributes {dimension_semantics = [#tpu.dimension_semantics<parallel>], iteration_bounds = array<i64: 2>, scalar_prefetch = 0 : i64, scratch_operands = 0 : i64, tpu.core_type = #tpu.core_type<tc>, window_params = [{transform_indices = @transform_0, window_bounds = array<i64: 1, 16, 32>}, {pipeline_mode = #tpu.pipeline_mode<synchronous>, transform_indices = @transform_1, window_bounds = array<i64: 32, 128>}, {pipeline_mode = #tpu.pipeline_mode<synchronous>, transform_indices = @transform_2, window_bounds = array<i64: 1, 128>}, {transform_indices = @transform_3, window_bounds = array<i64: 1, 16, 128>}]} {
    %c0 = arith.constant 0 : index
    %c0_0 = arith.constant 0 : index
    %c0_1 = arith.constant 0 : index
    %0 = vector.load %arg1[%c0, %c0_0, %c0_1] : memref<1x16x32xbf16, #tpu.memory_space<vmem>>, vector<1x16x32xbf16>
    %1 = vector.shape_cast %0 : vector<1x16x32xbf16> to vector<16x32xbf16>
    %c0_2 = arith.constant 0 : index
    %c0_3 = arith.constant 0 : index
    %2 = vector.load %arg2[%c0_2, %c0_3] : memref<32x128xbf16, #tpu.memory_space<vmem>>, vector<32x128xbf16>
    %cst = arith.constant dense<0.000000e+00> : vector<16x128xf32>
    %3 = tpu.matmul %1, %2, %cst {dimension_numbers = #tpu.dot_dimension_numbers<[1], [0], [0], [1], [0, 0, 1, 1], [], []>} : vector<16x32xbf16>, vector<32x128xbf16>, vector<16x128xf32> -> vector<16x128xf32>
    %c0_4 = arith.constant 0 : index
    %c0_5 = arith.constant 0 : index
    %4 = vector.load %arg3[%c0_4, %c0_5] : memref<1x128xf32, #tpu.memory_space<vmem>>, vector<1x128xf32>
    %5 = vector.broadcast %4 : vector<1x128xf32> to vector<16x128xf32>
    %6 = arith.addf %3, %5 : vector<16x128xf32>
    %7 = arith.negf %6 : vector<16x128xf32>
    %8 = math.exp %7 : vector<16x128xf32>
    %cst_6 = arith.constant 1.000000e+00 : f32
    %9 = vector.broadcast %cst_6 : f32 to vector<16x128xf32>
    %10 = arith.addf %9, %8 : vector<16x128xf32>
    %11 = arith.divf %9, %10 : vector<16x128xf32>
    %12 = tpu.iota {dimensions = array<i32: 1>} : vector<16x128xi32>
    %13 = tpu.iota {dimensions = array<i32: 0>} : vector<16x128xi32>
    %c15_i32 = arith.constant 15 : i32
    %14 = vector.broadcast %c15_i32 : i32 to vector<16x128xi32>
    %15 = arith.andi %12, %14 : vector<16x128xi32>
    %c4_i32 = arith.constant 4 : i32
    %16 = vector.broadcast %c4_i32 : i32 to vector<16x128xi32>
    %17 = arith.shrsi %12, %16 : vector<16x128xi32>
    %18 = arith.sitofp %13 : vector<16x128xi32> to vector<16x128xf32>
    %cst_7 = arith.constant 4.000000e+00 : f32
    %19 = vector.broadcast %cst_7 : f32 to vector<16x128xf32>
    %20 = arith.divf %18, %19 : vector<16x128xf32>
    %21 = math.floor %20 : vector<16x128xf32>
    %cst_8 = arith.constant 4.000000e+00 : f32
    %22 = vector.broadcast %cst_8 : f32 to vector<16x128xf32>
    %23 = arith.mulf %21, %22 : vector<16x128xf32>
    %24 = arith.subf %18, %23 : vector<16x128xf32>
    %c0_i32 = arith.constant 0 : i32
    %25 = vector.broadcast %c0_i32 : i32 to vector<16x128xi32>
    %26 = arith.cmpi eq, %15, %25 : vector<16x128xi32>
    %27 = arith.select %26, %24, %21 : vector<16x128xi1>, vector<16x128xf32>
    %cst_9 = arith.constant 2.000000e+00 : f32
    %28 = vector.broadcast %cst_9 : f32 to vector<16x128xf32>
    %29 = arith.mulf %11, %28 : vector<16x128xf32>
    %cst_10 = arith.constant 5.000000e-01 : f32
    %30 = vector.broadcast %cst_10 : f32 to vector<16x128xf32>
    %31 = arith.subf %29, %30 : vector<16x128xf32>
    %32 = arith.addf %31, %27 : vector<16x128xf32>
    %cst_11 = arith.constant 8.000000e+00 : f32
    %33 = vector.broadcast %cst_11 : f32 to vector<16x128xf32>
    %34 = arith.mulf %32, %33 : vector<16x128xf32>
    %c0_i32_12 = arith.constant 0 : i32
    %35 = vector.broadcast %c0_i32_12 : i32 to vector<16x128xi32>
    %36 = arith.cmpi eq, %17, %35 : vector<16x128xi32>
    %c1_i32 = arith.constant 1 : i32
    %37 = vector.broadcast %c1_i32 : i32 to vector<16x128xi32>
    %38 = arith.cmpi eq, %17, %37 : vector<16x128xi32>
    %cst_13 = arith.constant 1.600000e+01 : f32
    %cst_14 = arith.constant 3.300000e+01 : f32
    %39 = vector.broadcast %cst_13 : f32 to vector<16x128xf32>
    %40 = vector.broadcast %cst_14 : f32 to vector<16x128xf32>
    %41 = arith.select %38, %39, %40 : vector<16x128xi1>, vector<16x128xf32>
    %cst_15 = arith.constant 1.000000e+01 : f32
    %42 = vector.broadcast %cst_15 : f32 to vector<16x128xf32>
    %43 = arith.select %36, %42, %41 : vector<16x128xi1>, vector<16x128xf32>
    %c0_i32_16 = arith.constant 0 : i32
    %44 = vector.broadcast %c0_i32_16 : i32 to vector<16x128xi32>
    %45 = arith.cmpi eq, %17, %44 : vector<16x128xi32>
    %c1_i32_17 = arith.constant 1 : i32
    %46 = vector.broadcast %c1_i32_17 : i32 to vector<16x128xi32>
    %47 = arith.cmpi eq, %17, %46 : vector<16x128xi32>
    %cst_18 = arith.constant 3.000000e+01 : f32
    %cst_19 = arith.constant 2.300000e+01 : f32
    %48 = vector.broadcast %cst_18 : f32 to vector<16x128xf32>
    %49 = vector.broadcast %cst_19 : f32 to vector<16x128xf32>
    %50 = arith.select %47, %48, %49 : vector<16x128xi1>, vector<16x128xf32>
    %cst_20 = arith.constant 1.300000e+01 : f32
    %51 = vector.broadcast %cst_20 : f32 to vector<16x128xf32>
    %52 = arith.select %45, %51, %50 : vector<16x128xi1>, vector<16x128xf32>
    %cst_21 = arith.constant 2.000000e+00 : f32
    %53 = vector.broadcast %cst_21 : f32 to vector<16x128xf32>
    %54 = arith.mulf %11, %53 : vector<16x128xf32>
    %55 = arith.mulf %54, %54 : vector<16x128xf32>
    %c2_i32 = arith.constant 2 : i32
    %56 = vector.broadcast %c2_i32 : i32 to vector<16x128xi32>
    %57 = arith.cmpi eq, %15, %56 : vector<16x128xi32>
    %58 = arith.select %57, %43, %52 : vector<16x128xi1>, vector<16x128xf32>
    %59 = arith.mulf %55, %58 : vector<16x128xf32>
    %c2_i32_22 = arith.constant 2 : i32
    %60 = vector.broadcast %c2_i32_22 : i32 to vector<16x128xi32>
    %61 = arith.cmpi slt, %15, %60 : vector<16x128xi32>
    %c4_i32_23 = arith.constant 4 : i32
    %62 = vector.broadcast %c4_i32_23 : i32 to vector<16x128xi32>
    %63 = arith.cmpi slt, %15, %62 : vector<16x128xi32>
    %64 = arith.select %63, %59, %11 : vector<16x128xi1>, vector<16x128xf32>
    %65 = arith.select %61, %34, %64 : vector<16x128xi1>, vector<16x128xf32>
    %c0_24 = arith.constant 0 : index
    %c0_25 = arith.constant 0 : index
    %c0_26 = arith.constant 0 : index
    %66 = vector.load %arg4[%c0_24, %c0_25, %c0_26] : memref<1x16x128xf32, #tpu.memory_space<vmem>>, vector<1x16x128xf32>
    %67 = vector.shape_cast %66 : vector<1x16x128xf32> to vector<16x128xf32>
    %68 = vector.shape_cast %65 : vector<16x128xf32> to vector<1x16x128xf32>
    tpu.vector_store %arg4[%c0_24, %c0_25, %c0_26], %68 {strides = array<i32>} : memref<1x16x128xf32, #tpu.memory_space<vmem>>, vector<1x16x128xf32>,
    return
  }
  func.func @transform_0(%arg0: i32) -> (i32, i32, i32) {
    %c0_i32 = arith.constant 0 : i32
    %c0_i32_0 = arith.constant 0 : i32
    %c0_i32_1 = arith.constant 0 : i32
    return %arg0, %c0_i32, %c0_i32_0 : i32, i32, i32
  }
  func.func @transform_1(%arg0: i32) -> (i32, i32) {
    %c0_i32 = arith.constant 0 : i32
    %c0_i32_0 = arith.constant 0 : i32
    %c0_i32_1 = arith.constant 0 : i32
    return %c0_i32, %c0_i32_0 : i32, i32
  }
  func.func @transform_2(%arg0: i32) -> (i32, i32) {
    %c0_i32 = arith.constant 0 : i32
    %c0_i32_0 = arith.constant 0 : i32
    %c0_i32_1 = arith.constant 0 : i32
    return %c0_i32, %c0_i32_0 : i32, i32
  }
  func.func @transform_3(%arg0: i32) -> (i32, i32, i32) {
    %c0_i32 = arith.constant 0 : i32
    %c0_i32_0 = arith.constant 0 : i32
    %c0_i32_1 = arith.constant 0 : i32
    return %arg0, %c0_i32, %c0_i32_0 : i32, i32, i32
  }
}

</mosaic_0001>

<bundles_post_ra>
// kernel: _lambda_.6
= control target key start
LH: loop header
LB: loop body
LE: loop exit
PB: predicated region body
PF: predicated region fallthrough
CT: control target
= control target key end

     0   :  { %s3581_s12 = smov 0   ;;  %s4240_s0 = inlined_call_operand.vmem [shape: bf16[2,17,17,12], index: 0, kind: input, shape index: {}]   ;;  %s4241_s1 = inlined_call_operand.vmem [shape: bf16[4,12,128], index: 1, kind: input, shape index: {}]   ;;  %s4242_s2 = inlined_call_operand.vmem [shape: f32[1,128], index: 2, kind: input, shape index: {}]   ;;  %s4243_s3 = inlined_call_operand.vmem [shape: bf16[2,256,128], index: 3, kind: output, shape index: {}]  }
   0x1 LB: > { %s2751_s13 = sadd.s32 4294967295, %s3559_s12   ;;  %p2755_p0 = scmp.ge.s32.totalorder %s3559_s12, 1  ;;  %s3559_s12 = sphi %s3581_s12, %s13_s12  }
   0x2   : > { %p137_p1 = scmp.lt.s32.totalorder %s3559_s12, 3 }
   0x4   : > { %p138_p2 = pnand %p2755_p0, %p137_p1 }
   0x5   : > { %p161_p3 = scmp.lt.s32.totalorder (!%p138_p2), %s2751_s13, 1 }
   0x6   : > { %141 = sbr.rel (%p138_p2) target bundleno = 403 (0x193), region = 32 }
   0xb   : > { %vm714_vm0 = vcmask 1045504   ;;  %v3389_v0 = vld [vmem:[%s4241_s1] sm:$0x3f]   ;;  %v3390_v1 = vld [vmem:[%s4241_s1 + $0x8] sm:$0x3f]   ;;  %s4247_s13 = smov (!%p161_p3, %s2751_s13), 1 }
   0xc   : > { %3377 = vmatprep.subr.msk.bf16.mxu1 %vm714_vm0, %v3389_v0  ;;  %v1013_v2 = vsel %vm714_vm0, %v3389_v0, 0  ;;  %3376 = vmatprep.subr.msk.bf16.mxu0 %vm714_vm0, %v3390_v1  ;;  %s3380_s18 = smul.u32 204, %s4247_s13  ;;  %v716_v3 = vsel %vm714_vm0, %v3390_v1, 0  ;;  %v3393_v4 = vld [vmem:[%s4241_s1 + $0x10] sm:$0x3f]   ;;  %vm665_vm1 = vcmask 97280  }
   0xd   : > { %3275 = vmatpush3.bf16.msra.mxu1 %v1013_v2  ;;  %3241 = vmatpush3.bf16.msra.mxu0 %v716_v3  ;;  %v3394_v5 = vld [vmem:[%s4241_s1 + $0x18] sm:$0x3f]   ;;  %vm222_vm2 = vsmask.f32 3328  ;;  %vm223_vm3 = vsmask.f32 7440 }
   0xe   : > { %s3611_s25 = scalar_lea.vmem %s4240_s0, %s3380_s18  ;;  %3378 = vmatprep.subr.msk.bf16.mxu0 %vm714_vm0, %v3393_v4  ;;  %v3615_v6 = vsel %vm714_vm0, %v3393_v4, 0  ;;  %3379 = vmatprep.subr.msk.bf16.mxu1 %vm714_vm0, %v3394_v5  ;;  %vm3628_vm4 = vmor %vm222_vm2, %vm223_vm3  ;;  %v2078_v38 = vsel %vm714_vm0, %v3394_v5, 0  ;;  %s3044_s28 = sshll.u32 %s4247_s13, 7 }
   0xf   : > { %v172_v7 = vld [vmem:[%s3611_s25] sm:$0xf]  ;;  %v173_v8 = vld [vmem:[%s3611_s25 + $0x4] sm:$0xf]  ;;  %v174_v9 = vld [vmem:[%s3611_s25 + $0xc] sm:$0xf]  ;;  %s4125_s4 = scalar_lea.vmem %s4243_s3, %s3044_s28 }
  0x10   : > { %v226_v10 = vshrl.u32 %v172_v7, 16  ;;  %v229_v11 = vshll.u32 %v172_v7, 16  ;;  %v235_v12 = vshll.u32 %v173_v8, 16  ;;  %v239_v13 = vshrl.u32 %v173_v8, 16  ;;  %v175_v14 = vld [vmem:[%s3611_s25 + $0x10] sm:$0xf] }
  0x11   : > { %v2794_v15 = vcombine.low %v172_v7, %v173_v8  ;;  %v250_v16 = vshrl.u32 %v174_v9, 16  ;;  %v253_v17 = vshll.u32 %v174_v9, 16  ;;  %v259_v18 = vshll.u32 %v175_v14, 16  ;;  %v206_v19 = vld [vmem:[%s3611_s25 + $0x8] sm:$0x1] }
  0x12   : > { %v228_v20 = vrot.slane %v226_v10, 4  ;;  %v231_v21 = vrot.slane %v229_v11, 5  ;;  %v237_v22 = vrot.slane %v235_v12, 5  ;;  %v241_v23 = vrot.slane %v239_v13, 4  ;;  %v207_v24 = vld [vmem:[%s3611_s25 + $0x14] sm:$0x1] }
  0x13   : > { %3276 = vmatprep.mubr.msk.bf16.mxu1 %vm665_vm1, %v2794_v15  ;;  %v252_v25 = vrot.slane %v250_v16, 4  ;;  %v255_v26 = vrot.slane %v253_v17, 5  ;;  %v261_v27 = vrot.slane %v259_v18, 5  ;;  %v263_v28 = vshrl.u32 %v175_v14, 16  ;;  %v176_v29 = vld [vmem:[%s3611_s25 + $0x18] sm:$0xf] }
  0x14   : > { %v2795_v30 = vcombine.low %v174_v9, %v175_v14  ;;  %v232_v31 = vor.u32 %v231_v21, %v228_v20  ;;  %v242_v32 = vor.u32 %v241_v23, %v237_v22  ;;  %v245_v33 = vshll.u32 %v206_v19, 16  ;;  %v177_v39 = vld [vmem:[%s3611_s25 + $0x1c] sm:$0xf]  ;;  %v178_v48 = vld [vmem:[%s3611_s25 + $0x24] sm:$0xf] }
  0x15   : > { %v265_v34 = vrot.slane %v263_v28, 4  ;;  %v256_v36 = vor.u32 %v255_v26, %v252_v25  ;;  %v269_v37 = vshll.u32 %v207_v24, 16  ;;  %v274_v43 = vshrl.u32 %v176_v29, 16  ;;  %v179_v53 = vld [vmem:[%s3611_s25 + $0x28] sm:$0xf] }
  0x16   : > { %3277 = vmatmul.mubr.msk.bf16.vlgmr.msra.gmra.mxu1 %vm665_vm1, %v2795_v30  ;;  %v233_v40 = vrot.slane %v232_v31, 4  ;;  %v243_v41 = vrot.slane %v242_v32, 4  ;;  %v247_v42 = vrot.slane %v245_v33, 5  ;;  %v277_v47 = vshll.u32 %v176_v29, 16  ;;  %v208_v58 = vld [vmem:[%s3611_s25 + $0x20] sm:$0x1] }
  0x17   : > { %v257_v44 = vrot.slane %v256_v36, 4  ;;  %v266_v45 = vor.u32 %v265_v34, %v261_v27  ;;  %v271_v46 = vrot.slane %v269_v37, 5  ;;  %3343 = vmatpush3.bf16.msra.mxu1 %v2078_v38  ;;  %v276_v51 = vrot.slane %v274_v43, 4  ;;  %v209_v63 = vld [vmem:[%s3611_s25 + $0x2c] sm:$0x1] }
  0x18   : > { %v238_v49 = vsel %vm3628_vm4, %v233_v40, %v237_v22  ;;  %v248_v50 = vsel %vm3628_vm4, %v243_v41, %v247_v42  ;;  %v283_v52 = vshll.u32 %v177_v39, 16  ;;  %v279_v57 = vrot.slane %v277_v47, 5  ;;  %v180_v4 = vld [vmem:[%s3611_s25 + $0x30] sm:$0xf]  ;;  %v181_v21 = vld [vmem:[%s3611_s25 + $0x34] sm:$0xf] }
  0x19   : > { %v2761_v54 = vcombine.low %v238_v49, %v248_v50  ;;  %v262_v55 = vsel %vm3628_vm4, %v257_v44, %v261_v27  ;;  %v267_v56 = vrot.slane %v266_v45, 4  ;;  %v287_v60 = vshrl.u32 %v177_v39, 16  ;;  %v182_v27 = vld [vmem:[%s3611_s25 + $0x3c] sm:$0xf]  ;;  %v183_v36 = vld [vmem:[%s3611_s25 + $0x40] sm:$0xf] }
  0x1a   : > { %v285_v59 = vrot.slane %v283_v52, 5  ;;  %v2796_v61 = vcombine.low %v176_v29, %v177_v39  ;;  %v298_v62 = vshrl.u32 %v178_v48, 16  ;;  %v301_v1 = vshll.u32 %v178_v48, 16  ;;  %v210_v41 = vld [vmem:[%s3611_s25 + $0x38] sm:$0x1] }
  0x1b   : > { %3242 = vmatprep.mubr.msk.bf16.mxu0 %vm665_vm1, %v2761_v54  ;;  %v272_v0 = vsel %vm3628_vm4, %v267_v56, %v271_v46  ;;  %v307_v2 = vshll.u32 %v179_v53, 16  ;;  %v311_v3 = vshrl.u32 %v179_v53, 16  ;;  %v289_v7 = vrot.slane %v287_v60, 4  ;;  %v211_v42 = vld [vmem:[%s3611_s25 + $0x44] sm:$0x1] }
  0x1c   : > { %v2762_v5 = vcombine.low %v262_v55, %v272_v0  ;;  %3280 = vmatprep.mubr.msk.bf16.mxu1 %vm665_vm1, %v2796_v61  ;;  %v300_v8 = vrot.slane %v298_v62, 4  ;;  %v2797_v9 = vcombine.low %v178_v48, %v179_v53  ;;  %v303_v10 = vrot.slane %v301_v1, 5  ;;  %v184_v47 = vld [vmem:[%s3611_s25 + $0x48] sm:$0xf] }
  0x1d   : > { %v309_v11 = vrot.slane %v307_v2, 5  ;;  %v313_v12 = vrot.slane %v311_v3, 4  ;;  %v280_v13 = vor.u32 %v279_v57, %v276_v51  ;;  %v290_v14 = vor.u32 %v289_v7, %v285_v59 }
  0x1e   : > { %3243 = vmatmul.mubr.msk.bf16.vlgmr.msra.gmra.mxu0 %vm665_vm1, %v2762_v5  ;;  %3281 = vmatmul.mubr.msk.bf16.gmra.mxu1 %vm665_vm1, %v2797_v9  ;;  %v293_v15 = vshll.u32 %v208_v58, 16  ;;  %v317_v16 = vshll.u32 %v209_v63, 16  ;;  %v322_v17 = vshrl.u32 %v180_v4, 16  ;;  %v304_v19 = vor.u32 %v303_v10, %v300_v8  ;;  %v186_v5 = vld [vmem:[%s3611_s25 + $0x54] sm:$0xf] }
  0x1f   : > { %3309 = vmatpush3.bf16.msra.mxu0 %v3615_v6  ;;  %v281_v18 = vrot.slane %v280_v13, 4  ;;  %v314_v20 = vor.u32 %v313_v12, %v309_v11  ;;  %v325_v22 = vshll.u32 %v180_v4, 16  ;;  %v291_v23 = vrot.slane %v290_v14, 4 }
  0x20   : > { %v295_v24 = vrot.slane %v293_v15, 5  ;;  %v319_v25 = vrot.slane %v317_v16, 5  ;;  %v324_v26 = vrot.slane %v322_v17, 4  ;;  %v305_v29 = vrot.slane %v304_v19, 4 }
  0x21   : > { %v286_v28 = vsel %vm3628_vm4, %v281_v18, %v285_v59  ;;  %v315_v30 = vrot.slane %v314_v20, 4  ;;  %v327_v31 = vrot.slane %v325_v22, 5  ;;  %v331_v32 = vshll.u32 %v181_v21, 16  ;;  %v185_v59 = vld [vmem:[%s3611_s25 + $0x4c] sm:$0xf] }
  0x22   : > { %v296_v6 = vsel %vm3628_vm4, %v291_v23, %v295_v24  ;;  %v335_v33 = vshrl.u32 %v181_v21, 16  ;;  %v2798_v34 = vcombine.low %v180_v4, %v181_v21  ;;  %v310_v38 = vsel %vm3628_vm4, %v305_v29, %v309_v11  ;;  %v187_v11 = vld [vmem:[%s3611_s25 + $0x58] sm:$0xf]  ;;  %v212_v20 = vld [vmem:[%s3611_s25 + $0x50] sm:$0x1] }
  0x23   : > { %v2763_v37 = vcombine.low %v286_v28, %v296_v6  ;;  %v320_v39 = vsel %vm3628_vm4, %v315_v30, %v319_v25  ;;  %v346_v40 = vshrl.u32 %v182_v27, 16  ;;  %v333_v44 = vrot.slane %v331_v32, 5  ;;  %v213_v21 = vld [vmem:[%s3611_s25 + $0x5c] sm:$0x1] }
  0x24   : > { %v2764_v43 = vcombine.low %v310_v38, %v320_v39  ;;  %v337_v45 = vrot.slane %v335_v33, 4  ;;  %3284 = vmatprep.mubr.msk.bf16.mxu1 %vm665_vm1, %v2798_v34  ;;  %v349_v46 = vshll.u32 %v182_v27, 16  ;;  %v355_v49 = vshll.u32 %v183_v36, 16  ;;  %v189_v38 = vld [vmem:[%s3611_s25 + $0x64] sm:$0xf] }
  0x25   : > { %3246 = vmatprep.mubr.msk.bf16.mxu0 %vm665_vm1, %v2763_v37  ;;  %v348_v48 = vrot.slane %v346_v40, 4  ;;  %v359_v50 = vshrl.u32 %v183_v36, 16  ;;  %v2799_v51 = vcombine.low %v182_v27, %v183_v36  ;;  %v328_v53 = vor.u32 %v327_v31, %v324_v26  ;;  %v188_v26 = vld [vmem:[%s3611_s25 + $0x60] sm:$0xf] }
  0x26   : > { %3247 = vmatmul.mubr.msk.bf16.gmra.mxu0 %vm665_vm1, %v2764_v43  ;;  %v351_v52 = vrot.slane %v349_v46, 5  ;;  %v338_v54 = vor.u32 %v337_v45, %v333_v44  ;;  %v341_v55 = vshll.u32 %v210_v41, 16  ;;  %v357_v56 = vrot.slane %v355_v49, 5 }
  0x27   : > { %v361_v57 = vrot.slane %v359_v50, 4  ;;  %3285 = vmatmul.mubr.msk.bf16.gmra.mxu1 %vm665_vm1, %v2799_v51  ;;  %v365_v58 = vshll.u32 %v211_v42, 16  ;;  %v370_v60 = vshrl.u32 %v184_v47, 16  ;;  %v329_v61 = vrot.slane %v328_v53, 4  ;;  %v191_v53 = vld [vmem:[%s3611_s25 + $0x70] sm:$0xf] }
  0x28   : > { %v339_v62 = vrot.slane %v338_v54, 4  ;;  %v343_v63 = vrot.slane %v341_v55, 5  ;;  %v352_v0 = vor.u32 %v351_v52, %v348_v48  ;;  %v373_v4 = vshll.u32 %v184_v47, 16  ;;  %v190_v48 = vld [vmem:[%s3611_s25 + $0x6c] sm:$0xf] }
  0x29   : > { %v362_v1 = vor.u32 %v361_v57, %v357_v56  ;;  %v367_v2 = vrot.slane %v365_v58, 5  ;;  %v372_v3 = vrot.slane %v370_v60, 4  ;;  %v334_v7 = vsel %vm3628_vm4, %v329_v61, %v333_v44  ;;  %v214_v58 = vld [vmem:[%s3611_s25 + $0x68] sm:$0x1] }
  0x2a   : > { %v344_v8 = vsel %vm3628_vm4, %v339_v62, %v343_v63  ;;  %v353_v9 = vrot.slane %v352_v0, 4  ;;  %v379_v10 = vshll.u32 %v185_v59, 16  ;;  %v375_v14 = vrot.slane %v373_v4, 5  ;;  %v192_v0 = vld [vmem:[%s3611_s25 + $0x78] sm:$0xf] }
  0x2b   : > { %v2765_v12 = vcombine.low %v334_v7, %v344_v8  ;;  %v363_v13 = vrot.slane %v362_v1, 4  ;;  %v383_v15 = vshrl.u32 %v185_v59, 16  ;;  %v2800_v18 = vcombine.low %v184_v47, %v185_v59  ;;  %v215_v59 = vld [vmem:[%s3611_s25 + $0x74] sm:$0x1] }
  0x2c   : > { %v358_v16 = vsel %vm3628_vm4, %v353_v9, %v357_v56  ;;  %v381_v17 = vrot.slane %v379_v10, 5  ;;  %v394_v19 = vshrl.u32 %v186_v5, 16  ;;  %v397_v24 = vshll.u32 %v186_v5, 16 }
  0x2d   : > { %3250 = vmatprep.mubr.msk.bf16.mxu0 %vm665_vm1, %v2765_v12  ;;  %v368_v22 = vsel %vm3628_vm4, %v363_v13, %v367_v2  ;;  %v385_v23 = vrot.slane %v383_v15, 4  ;;  %v403_v25 = vshll.u32 %v187_v11, 16  ;;  %3288 = vmatprep.mubr.msk.bf16.mxu1 %vm665_vm1, %v2800_v18  ;;  %v407_v29 = vshrl.u32 %v187_v11, 16 }
  0x2e   : > { %v2766_v27 = vcombine.low %v358_v16, %v368_v22  ;;  %v396_v28 = vrot.slane %v394_v19, 4  ;;  %v2801_v30 = vcombine.low %v186_v5, %v187_v11  ;;  %v399_v31 = vrot.slane %v397_v24, 5 }
  0x2f   : > { %v405_v6 = vrot.slane %v403_v25, 5  ;;  %v376_v32 = vor.u32 %v375_v14, %v372_v3  ;;  %v386_v33 = vor.u32 %v385_v23, %v381_v17  ;;  %v409_v34 = vrot.slane %v407_v29, 4 }
  0x30   : > { %3251 = vmatmul.mubr.msk.bf16.gmra.mxu0 %vm665_vm1, %v2766_v27  ;;  %3289 = vmatmul.mubr.msk.bf16.gmra.mxu1 %vm665_vm1, %v2801_v30  ;;  %v389_v36 = vshll.u32 %v212_v20, 16  ;;  %v413_v37 = vshll.u32 %v213_v21, 16  ;;  %v418_v39 = vshrl.u32 %v188_v26, 16  ;;  %v400_v42 = vor.u32 %v399_v31, %v396_v28  ;;  %v194_v27 = vld [vmem:[%s3611_s25 + $0x84] sm:$0xf] }
  0x31   : > { %v377_v40 = vrot.slane %v376_v32, 4  ;;  %v387_v41 = vrot.slane %v386_v33, 4  ;;  %v421_v43 = vshll.u32 %v188_v26, 16  ;;  %v410_v45 = vor.u32 %v409_v34, %v405_v6 }
  0x32   : > { %v391_v44 = vrot.slane %v389_v36, 5  ;;  %v415_v46 = vrot.slane %v413_v37, 5  ;;  %v420_v47 = vrot.slane %v418_v39, 4  ;;  %v401_v50 = vrot.slane %v400_v42, 4  ;;  %v216_v37 = vld [vmem:[%s3611_s25 + $0x80] sm:$0x1] }
  0x33   : > { %v382_v49 = vsel %vm3628_vm4, %v377_v40, %v381_v17  ;;  %v423_v51 = vrot.slane %v421_v43, 5  ;;  %v427_v52 = vshll.u32 %v189_v38, 16  ;;  %v411_v55 = vrot.slane %v410_v45, 4  ;;  %v193_v17 = vld [vmem:[%s3611_s25 + $0x7c] sm:$0xf] }
  0x34   : > { %v392_v54 = vsel %vm3628_vm4, %v387_v41, %v391_v44  ;;  %v431_v56 = vshrl.u32 %v189_v38, 16  ;;  %v2802_v57 = vcombine.low %v188_v26, %v189_v38  ;;  %v406_v61 = vsel %vm3628_vm4, %v401_v50, %v405_v6  ;;  %v195_v6 = vld [vmem:[%s3611_s25 + $0x88] sm:$0xf]  ;;  %v217_v38 = vld [vmem:[%s3611_s25 + $0x8c] sm:$0x1] }
  0x35   : > { %v2767_v60 = vcombine.low %v382_v49, %v392_v54  ;;  %v429_v62 = vrot.slane %v427_v52, 5  ;;  %v442_v63 = vshrl.u32 %v190_v48, 16  ;;  %v416_v1 = vsel %vm3628_vm4, %v411_v55, %v415_v46 }
  0x36   : > { %v433_v2 = vrot.slane %v431_v56, 4  ;;  %3292 = vmatprep.mubr.msk.bf16.mxu1 %vm665_vm1, %v2802_v57  ;;  %v445_v3 = vshll.u32 %v190_v48, 16  ;;  %v451_v4 = vshll.u32 %v191_v53, 16  ;;  %v2768_v5 = vcombine.low %v406_v61, %v416_v1  ;;  %v197_v56 = vld [vmem:[%s3611_s25 + $0x94] sm:$0xf] }
  0x37   : > { %3254 = vmatprep.mubr.msk.bf16.mxu0 %vm665_vm1, %v2767_v60  ;;  %v444_v7 = vrot.slane %v442_v63, 4  ;;  %v455_v8 = vshrl.u32 %v191_v53, 16  ;;  %v2803_v9 = vcombine.low %v190_v48, %v191_v53  ;;  %v424_v12 = vor.u32 %v423_v51, %v420_v47  ;;  %v196_v47 = vld [vmem:[%s3611_s25 + $0x90] sm:$0xf]  ;;  %v198_v61 = vld [vmem:[%s3611_s25 + $0x9c] sm:$0xf] }
  0x38   : > { %v447_v10 = vrot.slane %v445_v3, 5  ;;  %v453_v11 = vrot.slane %v451_v4, 5  ;;  %v434_v13 = vor.u32 %v433_v2, %v429_v62  ;;  %3255 = vmatmul.mubr.msk.bf16.gmra.mxu0 %vm665_vm1, %v2768_v5  ;;  %v437_v15 = vshll.u32 %v214_v58, 16  ;;  %v199_v2 = vld [vmem:[%s3611_s25 + $0xa0] sm:$0xf] }
  0x39   : > { %v457_v14 = vrot.slane %v455_v8, 4  ;;  %3293 = vmatmul.mubr.msk.bf16.gmra.mxu1 %vm665_vm1, %v2803_v9  ;;  %v461_v16 = vshll.u32 %v215_v59, 16  ;;  %v466_v18 = vshrl.u32 %v192_v0, 16  ;;  %v425_v19 = vrot.slane %v424_v12, 4 }
  0x3a   : > { %v435_v20 = vrot.slane %v434_v13, 4  ;;  %v448_v21 = vor.u32 %v447_v10, %v444_v7  ;;  %v469_v22 = vshll.u32 %v192_v0, 16  ;;  %v439_v23 = vrot.slane %v437_v15, 5 }
  0x3b   : > { %v458_v24 = vor.u32 %v457_v14, %v453_v11  ;;  %v463_v25 = vrot.slane %v461_v16, 5  ;;  %v468_v26 = vrot.slane %v466_v18, 4  ;;  %v430_v28 = vsel %vm3628_vm4, %v425_v19, %v429_v62 }
  0x3c   : > { %v449_v29 = vrot.slane %v448_v21, 4  ;;  %v471_v30 = vrot.slane %v469_v22, 5  ;;  %v475_v31 = vshll.u32 %v193_v17, 16  ;;  %v440_v32 = vsel %vm3628_vm4, %v435_v20, %v439_v23  ;;  %v218_v20 = vld [vmem:[%s3611_s25 + $0x98] sm:$0x1] }
  0x3d   : > { %v459_v33 = vrot.slane %v458_v24, 4  ;;  %v479_v34 = vshrl.u32 %v193_v17, 16  ;;  %v2804_v36 = vcombine.low %v192_v0, %v193_v17  ;;  %v2769_v39 = vcombine.low %v430_v28, %v440_v32  ;;  %v219_v21 = vld [vmem:[%s3611_s25 + $0xa4] sm:$0x1] }
  0x3e   : > { %v454_v40 = vsel %vm3628_vm4, %v449_v29, %v453_v11  ;;  %v477_v41 = vrot.slane %v475_v31, 5  ;;  %v490_v42 = vshrl.u32 %v194_v27, 16  ;;  %v493_v45 = vshll.u32 %v194_v27, 16  ;;  %v201_v31 = vld [vmem:[%s3611_s25 + $0xac] sm:$0xf] }
  0x3f   : > { %v464_v43 = vsel %vm3628_vm4, %v459_v33, %v463_v25  ;;  %v481_v44 = vrot.slane %v479_v34, 4  ;;  %3296 = vmatprep.mubr.msk.bf16.mxu1 %vm665_vm1, %v2804_v36  ;;  %v499_v46 = vshll.u32 %v195_v6, 16  ;;  %3258 = vmatprep.mubr.msk.bf16.mxu0 %vm665_vm1, %v2769_v39  ;;  %v503_v50 = vshrl.u32 %v195_v6, 16 }
  0x40   : > { %v2770_v48 = vcombine.low %v454_v40, %v464_v43  ;;  %v492_v49 = vrot.slane %v490_v42, 4  ;;  %v2805_v51 = vcombine.low %v194_v27, %v195_v6  ;;  %v495_v52 = vrot.slane %v493_v45, 5 }
  0x41   : > { %v501_v53 = vrot.slane %v499_v46, 5  ;;  %v472_v54 = vor.u32 %v471_v30, %v468_v26  ;;  %v482_v55 = vor.u32 %v481_v44, %v477_v41  ;;  %v505_v57 = vrot.slane %v503_v50, 4  ;;  %v200_v26 = vld [vmem:[%s3611_s25 + $0xa8] sm:$0xf] }
  0x42   : > { %3259 = vmatmul.mubr.msk.bf16.gmra.mxu0 %vm665_vm1, %v2770_v48  ;;  %3297 = vmatmul.mubr.msk.bf16.gmra.mxu1 %vm665_vm1, %v2805_v51  ;;  %v485_v58 = vshll.u32 %v216_v37, 16  ;;  %v509_v59 = vshll.u32 %v217_v38, 16  ;;  %v514_v60 = vshrl.u32 %v196_v47, 16  ;;  %v496_v0 = vor.u32 %v495_v52, %v492_v49  ;;  %v202_v48 = vld [vmem:[%s3611_s25 + $0xb4] sm:$0xf] }
  0x43   : > { %v473_v62 = vrot.slane %v472_v54, 4  ;;  %v483_v63 = vrot.slane %v482_v55, 4  ;;  %v517_v1 = vshll.u32 %v196_v47, 16  ;;  %v506_v4 = vor.u32 %v505_v57, %v501_v53 }
  0x44   : > { %v487_v3 = vrot.slane %v485_v58, 5  ;;  %v511_v5 = vrot.slane %v509_v59, 5  ;;  %v516_v7 = vrot.slane %v514_v60, 4  ;;  %v497_v9 = vrot.slane %v496_v0, 4  ;;  %v220_v58 = vld [vmem:[%s3611_s25 + $0xb0] sm:$0x1] }
  0x45   : > { %v478_v8 = vsel %vm3628_vm4, %v473_v62, %v477_v41  ;;  %v519_v10 = vrot.slane %v517_v1, 5  ;;  %v523_v11 = vshll.u32 %v197_v56, 16  ;;  %v507_v13 = vrot.slane %v506_v4, 4  ;;  %v2894_v0 = vld [vmem:[%s3611_s25 + $0xc] sm:$0xf] }
  0x46   : > { %v488_v12 = vsel %vm3628_vm4, %v483_v63, %v487_v3  ;;  %v527_v14 = vshrl.u32 %v197_v56, 16  ;;  %v2806_v15 = vcombine.low %v196_v47, %v197_v56  ;;  %v502_v17 = vsel %vm3628_vm4, %v497_v9, %v501_v53  ;;  %v203_v53 = vld [vmem:[%s3611_s25 + $0xb8] sm:$0xf]  ;;  %v221_v63 = vld [vmem:[%s3611_s25 + $0xbc] sm:$0x1] }
  0x47   : > { %v2771_v16 = vcombine.low %v478_v8, %v488_v12  ;;  %v525_v18 = vrot.slane %v523_v11, 5  ;;  %v538_v19 = vshrl.u32 %v198_v61, 16  ;;  %v512_v22 = vsel %vm3628_vm4, %v507_v13, %v511_v5 }
  0x48   : > { %v529_v23 = vrot.slane %v527_v14, 4  ;;  %3300 = vmatprep.mubr.msk.bf16.mxu1 %vm665_vm1, %v2806_v15  ;;  %v541_v24 = vshll.u32 %v198_v61, 16  ;;  %v547_v25 = vshll.u32 %v199_v2, 16  ;;  %v2772_v27 = vcombine.low %v502_v17, %v512_v22  ;;  %v2895_v14 = vld [vmem:[%s3611_s25 + $0x10] sm:$0xf] }
  0x49   : > { %3262 = vmatprep.mubr.msk.bf16.mxu0 %vm665_vm1, %v2771_v16  ;;  %v540_v28 = vrot.slane %v538_v19, 4  ;;  %v551_v29 = vshrl.u32 %v199_v2, 16  ;;  %v2807_v30 = vcombine.low %v198_v61, %v199_v2  ;;  %v520_v33 = vor.u32 %v519_v10, %v516_v7 }
  0x4a   : > { %v543_v6 = vrot.slane %v541_v24, 5  ;;  %v549_v32 = vrot.slane %v547_v25, 5  ;;  %v530_v34 = vor.u32 %v529_v23, %v525_v18  ;;  %3263 = vmatmul.mubr.msk.bf16.gmra.mxu0 %vm665_vm1, %v2772_v27  ;;  %v533_v37 = vshll.u32 %v218_v20, 16  ;;  %v2897_v24 = vld [vmem:[%s3611_s25 + $0x18] sm:$0xf] }
  0x4b   : > { %v553_v36 = vrot.slane %v551_v29, 4  ;;  %3301 = vmatmul.mubr.msk.bf16.gmra.mxu1 %vm665_vm1, %v2807_v30  ;;  %v557_v38 = vshll.u32 %v219_v21, 16  ;;  %v562_v39 = vshrl.u32 %v200_v26, 16  ;;  %v521_v40 = vrot.slane %v520_v33, 4  ;;  %v2898_v29 = vld [vmem:[%s3611_s25 + $0x1c] sm:$0xf] }
  0x4c   : > { %v531_v41 = vrot.slane %v530_v34, 4  ;;  %v544_v42 = vor.u32 %v543_v6, %v540_v28  ;;  %v565_v43 = vshll.u32 %v200_v26, 16  ;;  %v535_v44 = vrot.slane %v533_v37, 5  ;;  %v2899_v33 = vld [vmem:[%s3611_s25 + $0x20] sm:$0x1] }
  0x4d   : > { %v554_v45 = vor.u32 %v553_v36, %v549_v32  ;;  %v559_v46 = vrot.slane %v557_v38, 5  ;;  %v564_v47 = vrot.slane %v562_v39, 4  ;;  %v526_v49 = vsel %vm3628_vm4, %v521_v40, %v525_v18  ;;  %v2896_v18 = vld [vmem:[%s3611_s25 + $0x14] sm:$0x1]  ;;  %v2900_v39 = vld [vmem:[%s3611_s25 + $0x24] sm:$0xf] }
  0x4e   : > { %v545_v50 = vrot.slane %v544_v42, 4  ;;  %v567_v51 = vrot.slane %v565_v43, 5  ;;  %v571_v52 = vshll.u32 %v201_v31, 16  ;;  %v536_v54 = vsel %vm3628_vm4, %v531_v41, %v535_v44 }
  0x4f   : > { %v555_v55 = vrot.slane %v554_v45, 4  ;;  %v575_v56 = vshrl.u32 %v201_v31, 16  ;;  %v2808_v57 = vcombine.low %v200_v26, %v201_v31  ;;  %v2773_v59 = vcombine.low %v526_v49, %v536_v54 }
  0x50   : > { %v550_v60 = vsel %vm3628_vm4, %v545_v50, %v549_v32  ;;  %v573_v61 = vrot.slane %v571_v52, 5  ;;  %v586_v62 = vshrl.u32 %v202_v48, 16  ;;  %v589_v3 = vshll.u32 %v202_v48, 16 }
  0x51   : > { %v560_v1 = vsel %vm3628_vm4, %v555_v55, %v559_v46  ;;  %v577_v2 = vrot.slane %v575_v56, 4  ;;  %3304 = vmatprep.mubr.msk.bf16.mxu1 %vm665_vm1, %v2808_v57  ;;  %v595_v4 = vshll.u32 %v203_v53, 16  ;;  %3266 = vmatprep.mubr.msk.bf16.mxu0 %vm665_vm1, %v2773_v59  ;;  %v599_v8 = vshrl.u32 %v203_v53, 16  ;;  %v2901_v57 = vld [vmem:[%s3611_s25 + $0x28] sm:$0xf] }
  0x52   : > { %v2774_v5 = vcombine.low %v550_v60, %v560_v1  ;;  %v588_v7 = vrot.slane %v586_v62, 4  ;;  %v2809_v9 = vcombine.low %v202_v48, %v203_v53  ;;  %v591_v10 = vrot.slane %v589_v3, 5  ;;  %v3409_v48 = vld [vmem:[%s3611_s25 + $0xc] sm:$0xff]  }
  0x53   : > { %v597_v11 = vrot.slane %v595_v4, 5  ;;  %v568_v12 = vor.u32 %v567_v51, %v564_v47  ;;  %v578_v13 = vor.u32 %v577_v2, %v573_v61  ;;  %v601_v15 = vrot.slane %v599_v8, 4  ;;  %v2903_v8 = vld [vmem:[%s3611_s25 + $0x30] sm:$0xf] }
  0x54   : > { %3267 = vmatmul.mubr.msk.bf16.gmra.mxu0 %vm665_vm1, %v2774_v5  ;;  %3305 = vmatmul.mubr.msk.bf16.gmra.mxu1 %vm665_vm1, %v2809_v9  ;;  %v581_v16 = vshll.u32 %v220_v58, 16  ;;  %v605_v17 = vshll.u32 %v221_v63, 16  ;;  %v1590_v19 = vshrl.u32 %v2894_v0, 16  ;;  %v592_v22 = vor.u32 %v591_v10, %v588_v7 }
  0x55   : > { %v569_v20 = vrot.slane %v568_v12, 4  ;;  %v579_v21 = vrot.slane %v578_v13, 4  ;;  %v1593_v23 = vshll.u32 %v2894_v0, 16  ;;  %v602_v26 = vor.u32 %v601_v15, %v597_v11  ;;  %v2904_v13 = vld [vmem:[%s3611_s25 + $0x34] sm:$0xf] }
  0x56   : > { %v583_v25 = vrot.slane %v581_v16, 5  ;;  %v607_v27 = vrot.slane %v605_v17, 5  ;;  %v1592_v28 = vrot.slane %v1590_v19, 4  ;;  %v593_v31 = vrot.slane %v592_v22, 4  ;;  %v3410_v16 = vld [vmem:[%s3611_s25 + $0x18] sm:$0xff]  }
  0x57   : > { %v574_v30 = vsel %vm3628_vm4, %v569_v20, %v573_v61  ;;  %v1595_v6 = vrot.slane %v1593_v23, 5  ;;  %v1599_v32 = vshll.u32 %v2895_v14, 16  ;;  %v603_v36 = vrot.slane %v602_v26, 4  ;;  %v2902_v61 = vld [vmem:[%s3611_s25 + $0x2c] sm:$0x1] }
  0x58   : > { %v584_v34 = vsel %vm3628_vm4, %v579_v21, %v583_v25  ;;  %v1603_v37 = vshrl.u32 %v2895_v14, 16  ;;  %v1609_v38 = vshll.u32 %v2896_v18, 16  ;;  %v598_v41 = vsel %vm3628_vm4, %v593_v31, %v597_v11  ;;  %v2905_v19 = vld [vmem:[%s3611_s25 + $0x38] sm:$0x1]  ;;  %v2906_v20 = vld [vmem:[%s3611_s25 + $0x3c] sm:$0xf] }
  0x59   : > { %v2775_v40 = vcombine.low %v574_v30, %v584_v34  ;;  %v1596_v42 = vor.u32 %v1595_v6, %v1592_v28  ;;  %v1601_v43 = vrot.slane %v1599_v32, 5  ;;  %v608_v44 = vsel %vm3628_vm4, %v603_v36, %v607_v27  ;;  %v3411_v25 = vld [vmem:[%s3611_s25 + $0x24] sm:$0xff]  }
  0x5a   : > { %v1605_v45 = vrot.slane %v1603_v37, 4  ;;  %v1611_v46 = vrot.slane %v1609_v38, 5  ;;  %v1614_v47 = vshrl.u32 %v2897_v24, 16  ;;  %v2776_v49 = vcombine.low %v598_v41, %v608_v44 }
  0x5b   : > { %3270 = vmatprep.mubr.msk.bf16.mxu0 %vm665_vm1, %v2775_v40  ;;  %v1597_v50 = vrot.slane %v1596_v42, 4  ;;  %v1617_v51 = vshll.u32 %v2897_v24, 16  ;;  %v1623_v52 = vshll.u32 %v2898_v29, 16  ;;  %v1627_v55 = vshrl.u32 %v2898_v29, 16 }
  0x5c   : > { %v1606_v53 = vor.u32 %v1605_v45, %v1601_v43  ;;  %v1616_v54 = vrot.slane %v1614_v47, 4  ;;  %v1633_v56 = vshll.u32 %v2899_v33, 16  ;;  %3271 = vmatmul.mubr.msk.bf16.gmra.mxu0 %vm665_vm1, %v2776_v49  ;;  %v1638_v62 = vshrl.u32 %v2900_v39, 16  ;;  %v2907_v33 = vld [vmem:[%s3611_s25 + $0x40] sm:$0xf]  ;;  %v3412_v45 = vld [vmem:[%s3611_s25 + $0x30] sm:$0xff]  }
  0x5d   : > { %v1602_v58 = vsel %vm3628_vm4, %v1597_v50, %v1601_v43  ;;  %v1619_v59 = vrot.slane %v1617_v51, 5  ;;  %v1625_v60 = vrot.slane %v1623_v52, 5  ;;  %v1629_v0 = vrot.slane %v1627_v55, 4  ;;  %3310 = vmatprep.mubr.msk.bf16.mxu0 %vm665_vm1, %v3409_v48  ;;  %v2909_v49 = vld [vmem:[%s3611_s25 + $0x48] sm:$0xf]  ;;  %v3413_v55 = vld [vmem:[%s3611_s25 + $0x3c] sm:$0xff]  }
  0x5e   : > { %v1607_v63 = vrot.slane %v1606_v53, 4  ;;  %v1635_v1 = vrot.slane %v1633_v56, 5  ;;  %v1641_v2 = vshll.u32 %v2900_v39, 16  ;;  %v1640_v4 = vrot.slane %v1638_v62, 4 }
  0x5f   : > { %v1620_v3 = vor.u32 %v1619_v59, %v1616_v54  ;;  %v1647_v5 = vshll.u32 %v2901_v57, 16  ;;  %v1651_v7 = vshrl.u32 %v2901_v57, 16  ;;  %v1630_v10 = vor.u32 %v1629_v0, %v1625_v60  ;;  %v2910_v54 = vld [vmem:[%s3611_s25 + $0x4c] sm:$0xf] }
  0x60   : > { %v1612_v9 = vsel %vm3628_vm4, %v1607_v63, %v1611_v46  ;;  %v1643_v11 = vrot.slane %v1641_v2, 5  ;;  %v1657_v12 = vshll.u32 %v2902_v61, 16  ;;  %v1662_v24 = vshrl.u32 %v2903_v8, 16  ;;  %v2908_v46 = vld [vmem:[%s3611_s25 + $0x44] sm:$0x1] }
  0x61   : > { %v2944_v14 = vcombine.low %v1602_v58, %v1612_v9  ;;  %v1621_v15 = vrot.slane %v1620_v3, 4  ;;  %v1649_v17 = vrot.slane %v1647_v5, 5  ;;  %v1653_v18 = vrot.slane %v1651_v7, 4  ;;  %v2912_v5 = vld [vmem:[%s3611_s25 + $0x54] sm:$0xf] }
  0x62   : > { %v1631_v21 = vrot.slane %v1630_v10, 4  ;;  %v1644_v22 = vor.u32 %v1643_v11, %v1640_v4  ;;  %v1659_v23 = vrot.slane %v1657_v12, 5  ;;  %v1665_v28 = vshll.u32 %v2903_v8, 16  ;;  %v2913_v11 = vld [vmem:[%s3611_s25 + $0x58] sm:$0xf] }
  0x63   : > { %3344 = vmatprep.mubr.msk.bf16.mxu1 %vm665_vm1, %v2944_v14  ;;  %v1626_v26 = vsel %vm3628_vm4, %v1621_v15, %v1625_v60  ;;  %v1654_v27 = vor.u32 %v1653_v18, %v1649_v17  ;;  %v1671_v29 = vshll.u32 %v2904_v13, 16  ;;  %v1664_v6 = vrot.slane %v1662_v24, 4  ;;  %v2911_v60 = vld [vmem:[%s3611_s25 + $0x50] sm:$0x1] }
  0x64   : > { %v1636_v30 = vsel %vm3628_vm4, %v1631_v21, %v1635_v1  ;;  %v1645_v31 = vrot.slane %v1644_v22, 4  ;;  %v1675_v32 = vshrl.u32 %v2904_v13, 16  ;;  %3311 = vmatmul.mubr.msk.bf16.vlgmr.msra.gmra.mxu0 %vm665_vm1, %v3410_v16  ;;  %v1667_v37 = vrot.slane %v1665_v28, 5  ;;  %v2914_v22 = vld [vmem:[%s3611_s25 + $0x5c] sm:$0x1] }
  0x65   : > { %v2945_v34 = vcombine.low %v1626_v26, %v1636_v30  ;;  %v1655_v36 = vrot.slane %v1654_v27, 4  ;;  %v1673_v38 = vrot.slane %v1671_v29, 5  ;;  %v1681_v41 = vshll.u32 %v2905_v19, 16  ;;  %3314 = vmatprep.mubr.msk.bf16.mxu0 %vm665_vm1, %v3411_v25  ;;  %v2915_v29 = vld [vmem:[%s3611_s25 + $0x60] sm:$0xf] }
  0x66   : > { %v1650_v39 = vsel %vm3628_vm4, %v1645_v31, %v1649_v17  ;;  %v1677_v40 = vrot.slane %v1675_v32, 4  ;;  %v1686_v42 = vshrl.u32 %v2906_v20, 16  ;;  %v1668_v44 = vor.u32 %v1667_v37, %v1664_v6  ;;  %v3414_v31 = vld [vmem:[%s3611_s25 + $0x48] sm:$0xff]  }
  0x67   : > { %3345 = vmatmul.mubr.msk.bf16.vlgmr.msra.gmra.mxu1 %vm665_vm1, %v2945_v34  ;;  %v1660_v43 = vsel %vm3628_vm4, %v1655_v36, %v1659_v23  ;;  %v1689_v47 = vshll.u32 %v2906_v20, 16  ;;  %v1695_v48 = vshll.u32 %v2907_v33, 16  ;;  %v1683_v52 = vrot.slane %v1681_v41, 5  ;;  %v2916_v34 = vld [vmem:[%s3611_s25 + $0x64] sm:$0xf] }
  0x68   : > { %v2946_v50 = vcombine.low %v1650_v39, %v1660_v43  ;;  %v1678_v51 = vor.u32 %v1677_v40, %v1673_v38  ;;  %v1688_v53 = vrot.slane %v1686_v42, 4  ;;  %v1669_v56 = vrot.slane %v1668_v44, 4  ;;  %v3415_v40 = vld [vmem:[%s3611_s25 + $0x54] sm:$0xff]   ;;  %v2917_v43 = vld [vmem:[%s3611_s25 + $0x68] sm:$0x1] }
  0x69   : > { %v1691_v57 = vrot.slane %v1689_v47, 5  ;;  %v1697_v58 = vrot.slane %v1695_v48, 5  ;;  %v1699_v59 = vshrl.u32 %v2907_v33, 16  ;;  %v1705_v62 = vshll.u32 %v2908_v46, 16 }
  0x6a   : > { %3348 = vmatprep.mubr.msk.bf16.mxu1 %vm665_vm1, %v2946_v50  ;;  %v1679_v61 = vrot.slane %v1678_v51, 4  ;;  %v1710_v63 = vshrl.u32 %v2909_v49, 16  ;;  %v1713_v0 = vshll.u32 %v2909_v49, 16  ;;  %v1674_v1 = vsel %vm3628_vm4, %v1669_v56, %v1673_v38 }
  0x6b   : > { %v1692_v2 = vor.u32 %v1691_v57, %v1688_v53  ;;  %v1701_v3 = vrot.slane %v1699_v59, 4  ;;  %v1719_v4 = vshll.u32 %v2910_v54, 16  ;;  %v1707_v8 = vrot.slane %v1705_v62, 5  ;;  %v2919_v59 = vld [vmem:[%s3611_s25 + $0x70] sm:$0xf] }
  0x6c   : > { %v1684_v7 = vsel %vm3628_vm4, %v1679_v61, %v1683_v52  ;;  %v1712_v9 = vrot.slane %v1710_v63, 4  ;;  %v1715_v10 = vrot.slane %v1713_v0, 5  ;;  %3315 = vmatmul.mubr.msk.bf16.gmra.mxu0 %vm665_vm1, %v3412_v45  ;;  %v1723_v17 = vshrl.u32 %v2910_v54, 16  ;;  %v2918_v54 = vld [vmem:[%s3611_s25 + $0x6c] sm:$0xf] }
  0x6d   : > { %v2947_v12 = vcombine.low %v1674_v1, %v1684_v7  ;;  %v1693_v13 = vrot.slane %v1692_v2, 4  ;;  %v1702_v14 = vor.u32 %v1701_v3, %v1697_v58  ;;  %v1721_v15 = vrot.slane %v1719_v4, 5  ;;  %3318 = vmatprep.mubr.msk.bf16.mxu0 %vm665_vm1, %v3413_v55  ;;  %v2920_v2 = vld [vmem:[%s3611_s25 + $0x74] sm:$0x1] }
  0x6e   : > { %v1716_v16 = vor.u32 %v1715_v10, %v1712_v9  ;;  %v1729_v18 = vshll.u32 %v2911_v60, 16  ;;  %v1734_v19 = vshrl.u32 %v2912_v5, 16  ;;  %v1737_v23 = vshll.u32 %v2912_v5, 16 }
  0x6f   : > { %3349 = vmatmul.mubr.msk.bf16.gmra.mxu1 %vm665_vm1, %v2947_v12  ;;  %v1698_v20 = vsel %vm3628_vm4, %v1693_v13, %v1697_v58  ;;  %v1703_v21 = vrot.slane %v1702_v14, 4  ;;  %v1743_v24 = vshll.u32 %v2913_v11, 16  ;;  %v1725_v26 = vrot.slane %v1723_v17, 4  ;;  %v3417_v17 = vld [vmem:[%s3611_s25 + $0x6c] sm:$0xff]  }
  0x70   : > { %v1717_v25 = vrot.slane %v1716_v16, 4  ;;  %v1731_v27 = vrot.slane %v1729_v18, 5  ;;  %v1736_v28 = vrot.slane %v1734_v19, 4  ;;  %v1739_v6 = vrot.slane %v1737_v23, 5  ;;  %v2922_v16 = vld [vmem:[%s3611_s25 + $0x7c] sm:$0xf] }
  0x71   : > { %v1708_v30 = vsel %vm3628_vm4, %v1703_v21, %v1707_v8  ;;  %v1745_v32 = vrot.slane %v1743_v24, 5  ;;  %v1747_v33 = vshrl.u32 %v2913_v11, 16  ;;  %v1726_v38 = vor.u32 %v1725_v26, %v1721_v15  ;;  %v3416_v8 = vld [vmem:[%s3611_s25 + $0x60] sm:$0xff]   ;;  %v2921_v11 = vld [vmem:[%s3611_s25 + $0x78] sm:$0xf] }
  0x72   : > { %v2948_v36 = vcombine.low %v1698_v20, %v1708_v30  ;;  %v1722_v37 = vsel %vm3628_vm4, %v1717_v25, %v1721_v15  ;;  %v1753_v39 = vshll.u32 %v2914_v22, 16  ;;  %v1740_v41 = vor.u32 %v1739_v6, %v1736_v28  ;;  %v2923_v24 = vld [vmem:[%s3611_s25 + $0x80] sm:$0x1] }
  0x73   : > { %v1749_v42 = vrot.slane %v1747_v33, 4  ;;  %v1758_v44 = vshrl.u32 %v2915_v29, 16  ;;  %v1761_v45 = vshll.u32 %v2915_v29, 16  ;;  %v1727_v46 = vrot.slane %v1726_v38, 4 }
  0x74   : > { %3352 = vmatprep.mubr.msk.bf16.mxu1 %vm665_vm1, %v2948_v36  ;;  %v1755_v47 = vrot.slane %v1753_v39, 5  ;;  %v1767_v48 = vshll.u32 %v2916_v34, 16  ;;  %v1771_v49 = vshrl.u32 %v2916_v34, 16  ;;  %3319 = vmatmul.mubr.msk.bf16.gmra.mxu0 %vm665_vm1, %v3414_v31  ;;  %v1741_v50 = vrot.slane %v1740_v41, 4  ;;  %v2925_v36 = vld [vmem:[%s3611_s25 + $0x88] sm:$0xf] }
  0x75   : > { %v1750_v51 = vor.u32 %v1749_v42, %v1745_v32  ;;  %v1760_v52 = vrot.slane %v1758_v44, 4  ;;  %v1763_v53 = vrot.slane %v1761_v45, 5  ;;  %v1732_v55 = vsel %vm3628_vm4, %v1727_v46, %v1731_v27  ;;  %3322 = vmatprep.mubr.msk.bf16.mxu0 %vm665_vm1, %v3415_v40  ;;  %v2924_v27 = vld [vmem:[%s3611_s25 + $0x84] sm:$0xf]  ;;  %v2926_v44 = vld [vmem:[%s3611_s25 + $0x8c] sm:$0x1] }
  0x76   : > { %v1769_v56 = vrot.slane %v1767_v48, 5  ;;  %v1773_v57 = vrot.slane %v1771_v49, 4  ;;  %v1777_v58 = vshll.u32 %v2917_v43, 16  ;;  %v2949_v60 = vcombine.low %v1722_v37, %v1732_v55  ;;  %v2927_v46 = vld [vmem:[%s3611_s25 + $0x90] sm:$0xf]  ;;  %v3418_v49 = vld [vmem:[%s3611_s25 + $0x78] sm:$0xff]  }
  0x77   : > { %v1746_v61 = vsel %vm3628_vm4, %v1741_v50, %v1745_v32  ;;  %v1751_v62 = vrot.slane %v1750_v51, 4  ;;  %v1764_v63 = vor.u32 %v1763_v53, %v1760_v52  ;;  %v1782_v3 = vshrl.u32 %v2918_v54, 16 }
  0x78   : > { %v1774_v0 = vor.u32 %v1773_v57, %v1769_v56  ;;  %v1779_v1 = vrot.slane %v1777_v58, 5  ;;  %v1785_v4 = vshll.u32 %v2918_v54, 16  ;;  %3353 = vmatmul.mubr.msk.bf16.gmra.mxu1 %vm665_vm1, %v2949_v60  ;;  %v1791_v9 = vshll.u32 %v2919_v59, 16  ;;  %v3419_v57 = vld [vmem:[%s3611_s25 + $0x84] sm:$0xff]  }
  0x79   : > { %v1756_v5 = vsel %vm3628_vm4, %v1751_v62, %v1755_v47  ;;  %v1765_v7 = vrot.slane %v1764_v63, 4  ;;  %v1795_v10 = vshrl.u32 %v2919_v59, 16  ;;  %v1784_v14 = vrot.slane %v1782_v3, 4 }
  0x7a   : > { %v2950_v12 = vcombine.low %v1746_v61, %v1756_v5  ;;  %v1775_v13 = vrot.slane %v1774_v0, 4  ;;  %v1787_v15 = vrot.slane %v1785_v4, 5  ;;  %v1793_v19 = vrot.slane %v1791_v9, 5 }
  0x7b   : > { %v1770_v18 = vsel %vm3628_vm4, %v1765_v7, %v1769_v56  ;;  %v1797_v20 = vrot.slane %v1795_v10, 4  ;;  %v1801_v21 = vshll.u32 %v2920_v2, 16  ;;  %v1806_v25 = vshrl.u32 %v2921_v11, 16  ;;  %v2928_v56 = vld [vmem:[%s3611_s25 + $0x94] sm:$0xf] }
  0x7c   : > { %3356 = vmatprep.mubr.msk.bf16.mxu1 %vm665_vm1, %v2950_v12  ;;  %v1780_v22 = vsel %vm3628_vm4, %v1775_v13, %v1779_v1  ;;  %v1788_v23 = vor.u32 %v1787_v15, %v1784_v14  ;;  %v1809_v26 = vshll.u32 %v2921_v11, 16  ;;  %3323 = vmatmul.mubr.msk.bf16.gmra.mxu0 %vm665_vm1, %v3416_v8  ;;  %v1815_v31 = vshll.u32 %v2922_v16, 16  ;;  %v2929_v1 = vld [vmem:[%s3611_s25 + $0x98] sm:$0x1]  ;;  %v2930_v8 = vld [vmem:[%s3611_s25 + $0x9c] sm:$0xf] }
  0x7d   : > { %v2951_v28 = vcombine.low %v1770_v18, %v1780_v22  ;;  %v1798_v29 = vor.u32 %v1797_v20, %v1793_v19  ;;  %v1803_v30 = vrot.slane %v1801_v21, 5  ;;  %v1808_v32 = vrot.slane %v1806_v25, 4  ;;  %3326 = vmatprep.mubr.msk.bf16.mxu0 %vm665_vm1, %v3417_v17  ;;  %v2931_v13 = vld [vmem:[%s3611_s25 + $0xa0] sm:$0xf]  ;;  %v2932_v21 = vld [vmem:[%s3611_s25 + $0xa4] sm:$0x1] }
  0x7e   : > { %v1789_v6 = vrot.slane %v1788_v23, 4  ;;  %v1811_v33 = vrot.slane %v1809_v26, 5  ;;  %v1819_v34 = vshrl.u32 %v2922_v16, 16  ;;  %v1817_v38 = vrot.slane %v1815_v31, 5  ;;  %v3420_v25 = vld [vmem:[%s3611_s25 + $0x90] sm:$0xff]  }
  0x7f   : > { %v1799_v37 = vrot.slane %v1798_v29, 4  ;;  %v1825_v39 = vshll.u32 %v2923_v24, 16  ;;  %v1830_v40 = vshrl.u32 %v2924_v27, 16  ;;  %v1833_v45 = vshll.u32 %v2924_v27, 16 }
  0x80   : > { %v1794_v41 = vsel %vm3628_vm4, %v1789_v6, %v1793_v19  ;;  %v1812_v42 = vor.u32 %v1811_v33, %v1808_v32  ;;  %v1821_v43 = vrot.slane %v1819_v34, 4  ;;  %3357 = vmatmul.mubr.msk.bf16.gmra.mxu1 %vm665_vm1, %v2951_v28  ;;  %v1839_v51 = vshll.u32 %v2925_v36, 16  ;;  %v2933_v6 = vld [vmem:[%s3611_s25 + $0xa8] sm:$0xf]  ;;  %v3421_v32 = vld [vmem:[%s3611_s25 + $0x9c] sm:$0xff]  }
  0x81   : > { %v1804_v47 = vsel %vm3628_vm4, %v1799_v37, %v1803_v30  ;;  %v1827_v48 = vrot.slane %v1825_v39, 5  ;;  %v1832_v50 = vrot.slane %v1830_v40, 4  ;;  %v1835_v55 = vrot.slane %v1833_v45, 5  ;;  %v2935_v45 = vld [vmem:[%s3611_s25 + $0xb0] sm:$0x1] }
  0x82   : > { %v2952_v52 = vcombine.low %v1794_v41, %v1804_v47  ;;  %v1813_v53 = vrot.slane %v1812_v42, 4  ;;  %v1822_v54 = vor.u32 %v1821_v43, %v1817_v38  ;;  %v1841_v58 = vrot.slane %v1839_v51, 5 }
  0x83   : > { %v1843_v59 = vshrl.u32 %v2925_v36, 16  ;;  %v1849_v60 = vshll.u32 %v2926_v44, 16  ;;  %v1854_v61 = vshrl.u32 %v2927_v46, 16  ;;  %v1836_v0 = vor.u32 %v1835_v55, %v1832_v50 }
  0x84   : > { %3360 = vmatprep.mubr.msk.bf16.mxu1 %vm665_vm1, %v2952_v52  ;;  %v1818_v62 = vsel %vm3628_vm4, %v1813_v53, %v1817_v38  ;;  %v1823_v63 = vrot.slane %v1822_v54, 4  ;;  %v1857_v2 = vshll.u32 %v2927_v46, 16  ;;  %3327 = vmatmul.mubr.msk.bf16.gmra.mxu0 %vm665_vm1, %v3418_v49  ;;  %v1863_v7 = vshll.u32 %v2928_v56, 16  ;;  %v2934_v38 = vld [vmem:[%s3611_s25 + $0xac] sm:$0xf] }
  0x85   : > { %v1845_v3 = vrot.slane %v1843_v59, 4  ;;  %v1851_v4 = vrot.slane %v1849_v60, 5  ;;  %v1856_v5 = vrot.slane %v1854_v61, 4  ;;  %v1837_v10 = vrot.slane %v1836_v0, 4  ;;  %3330 = vmatprep.mubr.msk.bf16.mxu0 %vm665_vm1, %v3419_v57  ;;  %v2936_v52 = vld [vmem:[%s3611_s25 + $0xb4] sm:$0xf] }
  0x86   : > { %v1828_v9 = vsel %vm3628_vm4, %v1823_v63, %v1827_v48  ;;  %v1859_v11 = vrot.slane %v1857_v2, 5  ;;  %v1867_v12 = vshrl.u32 %v2928_v56, 16  ;;  %v1865_v16 = vrot.slane %v1863_v7, 5  ;;  %v2937_v57 = vld [vmem:[%s3611_s25 + $0xb8] sm:$0xf]  ;;  %v3422_v0 = vld [vmem:[%s3611_s25 + $0xa8] sm:$0xff]  }
  0x87   : > { %v2953_v14 = vcombine.low %v1818_v62, %v1828_v9  ;;  %v1846_v15 = vor.u32 %v1845_v3, %v1841_v58  ;;  %v1873_v17 = vshll.u32 %v2929_v1, 16  ;;  %v1842_v18 = vsel %vm3628_vm4, %v1837_v10, %v1841_v58  ;;  %v2938_v1 = vld [vmem:[%s3611_s25 + $0xbc] sm:$0x1]  ;;  %v2939_v9 = vld [vmem:[%s3611_s25 + $0xc0] sm:$0xf]  ;;  %v3423_v10 = vld [vmem:[%s3611_s25 + $0xb4] sm:$0xff]  }
  0x88   : > { %v1860_v19 = vor.u32 %v1859_v11, %v1856_v5  ;;  %v1869_v20 = vrot.slane %v1867_v12, 4  ;;  %v1878_v22 = vshrl.u32 %v2930_v8, 16  ;;  %v1881_v26 = vshll.u32 %v2930_v8, 16 }
  0x89   : > { %3361 = vmatmul.mubr.msk.bf16.gmra.mxu1 %vm665_vm1, %v2953_v14  ;;  %v1847_v23 = vrot.slane %v1846_v15, 4  ;;  %v1875_v24 = vrot.slane %v1873_v17, 5  ;;  %v1887_v27 = vshll.u32 %v2931_v13, 16  ;;  %v1891_v31 = vshrl.u32 %v2931_v13, 16  ;;  %v2940_v15 = vld [vmem:[%s3611_s25 + $0xc4] sm:$0xf] }
  0x8a   : > { %v1861_v28 = vrot.slane %v1860_v19, 4  ;;  %v1870_v29 = vor.u32 %v1869_v20, %v1865_v16  ;;  %v1880_v30 = vrot.slane %v1878_v22, 4  ;;  %v1883_v34 = vrot.slane %v1881_v26, 5  ;;  %v2941_v22 = vld [vmem:[%s3611_s25 + $0xc8] sm:$0x1] }
  0x8b   : > { %v1852_v33 = vsel %vm3628_vm4, %v1847_v23, %v1851_v4  ;;  %v1889_v36 = vrot.slane %v1887_v27, 5  ;;  %v1897_v37 = vshll.u32 %v2932_v21, 16  ;;  %v1893_v42 = vrot.slane %v1891_v31, 4 }
  0x8c   : > { %v2954_v39 = vcombine.low %v1842_v18, %v1852_v33  ;;  %v1866_v40 = vsel %vm3628_vm4, %v1861_v28, %v1865_v16  ;;  %v1871_v41 = vrot.slane %v1870_v29, 4  ;;  %3331 = vmatmul.mubr.msk.bf16.gmra.mxu0 %vm665_vm1, %v3420_v25  ;;  %v1884_v43 = vor.u32 %v1883_v34, %v1880_v30 }
  0x8d   : > { %v1899_v44 = vrot.slane %v1897_v37, 5  ;;  %v1902_v46 = vshrl.u32 %v2933_v6, 16  ;;  %v1905_v47 = vshll.u32 %v2933_v6, 16  ;;  %v1894_v49 = vor.u32 %v1893_v42, %v1889_v36  ;;  %3334 = vmatprep.mubr.msk.bf16.mxu0 %vm665_vm1, %v3421_v32 }
  0x8e   : > { %3364 = vmatprep.mubr.msk.bf16.mxu1 %vm665_vm1, %v2954_v39  ;;  %v1876_v48 = vsel %vm3628_vm4, %v1871_v41, %v1875_v24  ;;  %v1911_v50 = vshll.u32 %v2934_v38, 16  ;;  %v1915_v51 = vshrl.u32 %v2934_v38, 16  ;;  %v1885_v54 = vrot.slane %v1884_v43, 4  ;;  %v3424_v38 = vld [vmem:[%s3611_s25 + $0xc0] sm:$0xff]  }
  0x8f   : > { %v2955_v53 = vcombine.low %v1866_v40, %v1876_v48  ;;  %v1904_v55 = vrot.slane %v1902_v46, 4  ;;  %v1907_v56 = vrot.slane %v1905_v47, 5  ;;  %v1895_v58 = vrot.slane %v1894_v49, 4 }
  0x90   : > { %v1913_v59 = vrot.slane %v1911_v50, 5  ;;  %v1917_v60 = vrot.slane %v1915_v51, 4  ;;  %v1921_v61 = vshll.u32 %v2935_v45, 16  ;;  %v1890_v62 = vsel %vm3628_vm4, %v1885_v54, %v1889_v36 }
  0x91   : > { %3365 = vmatmul.mubr.msk.bf16.gmra.mxu1 %vm665_vm1, %v2955_v53  ;;  %v1908_v63 = vor.u32 %v1907_v56, %v1904_v55  ;;  %v1926_v2 = vshrl.u32 %v2936_v52, 16  ;;  %v1929_v3 = vshll.u32 %v2936_v52, 16  ;;  %v1900_v4 = vsel %vm3628_vm4, %v1895_v58, %v1899_v44 }
  0x92   : > { %v1918_v5 = vor.u32 %v1917_v60, %v1913_v59  ;;  %v1923_v7 = vrot.slane %v1921_v61, 5  ;;  %v1935_v8 = vshll.u32 %v2937_v57, 16  ;;  %v2956_v11 = vcombine.low %v1890_v62, %v1900_v4 }
  0x93   : > { %v1909_v12 = vrot.slane %v1908_v63, 4  ;;  %v1928_v13 = vrot.slane %v1926_v2, 4  ;;  %v1931_v14 = vrot.slane %v1929_v3, 5  ;;  %v1939_v18 = vshrl.u32 %v2937_v57, 16 }
  0x94   : > { %v1919_v16 = vrot.slane %v1918_v5, 4  ;;  %v1937_v17 = vrot.slane %v1935_v8, 5  ;;  %v1945_v19 = vshll.u32 %v2938_v1, 16  ;;  %3368 = vmatprep.mubr.msk.bf16.mxu1 %vm665_vm1, %v2956_v11  ;;  %3335 = vmatmul.mubr.msk.bf16.gmra.mxu0 %vm665_vm1, %v3422_v0  ;;  %v1950_v23 = vshrl.u32 %v2939_v9, 16 }
  0x95   : > { %v1914_v20 = vsel %vm3628_vm4, %v1909_v12, %v1913_v59  ;;  %v1932_v21 = vor.u32 %v1931_v14, %v1928_v13  ;;  %v1953_v24 = vshll.u32 %v2939_v9, 16  ;;  %v1941_v26 = vrot.slane %v1939_v18, 4  ;;  %3338 = vmatprep.mubr.msk.bf16.mxu0 %vm665_vm1, %v3423_v10 }
  0x96   : > { %v1924_v25 = vsel %vm3628_vm4, %v1919_v16, %v1923_v7  ;;  %v1947_v27 = vrot.slane %v1945_v19, 5  ;;  %v1959_v28 = vshll.u32 %v2940_v15, 16  ;;  %v1952_v31 = vrot.slane %v1950_v23, 4 }
  0x97   : > { %v2957_v29 = vcombine.low %v1914_v20, %v1924_v25  ;;  %v1933_v30 = vrot.slane %v1932_v21, 4  ;;  %v1955_v6 = vrot.slane %v1953_v24, 5  ;;  %v1942_v32 = vor.u32 %v1941_v26, %v1937_v17 }
  0x98   : > { %v1961_v33 = vrot.slane %v1959_v28, 5  ;;  %v1963_v34 = vshrl.u32 %v2940_v15, 16  ;;  %v1969_v36 = vshll.u32 %v2941_v22, 16 }
  0x99   : > { %3369 = vmatmul.mubr.msk.bf16.gmra.mxu1 %vm665_vm1, %v2957_v29  ;;  %v1956_v37 = vor.u32 %v1955_v6, %v1952_v31  ;;  %v1938_v39 = vsel %vm3628_vm4, %v1933_v30, %v1937_v17  ;;  %v1943_v40 = vrot.slane %v1942_v32, 4 }
  0x9a   : > { %v1965_v41 = vrot.slane %v1963_v34, 4  ;;  %v1971_v45 = vrot.slane %v1969_v36, 5 }
  0x9b   : > { %v1957_v42 = vrot.slane %v1956_v37, 4  ;;  %v1948_v43 = vsel %vm3628_vm4, %v1943_v40, %v1947_v27 }
  0x9c   : > { %v1966_v44 = vor.u32 %v1965_v41, %v1961_v33  ;;  %v2958_v46 = vcombine.low %v1938_v39, %v1948_v43  ;;  %3339 = vmatmul.mubr.msk.bf16.gmra.mxu0 %vm665_vm1, %v3424_v38 }
  0x9d   : > { %v1962_v47 = vsel %vm3628_vm4, %v1957_v42, %v1961_v33 }
  0x9e   : > { %v1967_v48 = vrot.slane %v1966_v44, 4  ;;  %3372 = vmatprep.mubr.msk.bf16.mxu1 %vm665_vm1, %v2958_v46 }
  0xa0   : > { %v1972_v49 = vsel %vm3628_vm4, %v1967_v48, %v1971_v45 }
  0xa1   : > { %v2959_v50 = vcombine.low %v1962_v47, %v1972_v49 }
  0xa3   : > { %3373 = vmatmul.mubr.msk.bf16.gmra.mxu1 %vm665_vm1, %v2959_v50 }
  0xd6   : > { %v3278_v51 = vpop.f32.mrf.mxu1 }
  0xd8   : > { %v1049_v52 = vpop.f32.mrf.mxu1 }
  0xda   : > { %v3930_v53 = vpop.f32.mrf.mxu1 }
  0xdc   : > { %v3932_v54 = vpop.f32.mrf.mxu1 }
  0xde   : > { %v3244_v55 = vpop.f32.mrf.mxu0  ;;  %v3282_v56 = vpop.f32.mrf.mxu1 }
  0xdf   : > { %v3934_v57 = vadd.f32 %v3278_v51, %v3244_v55 }
  0xe0   : > { %v752_v58 = vpop.f32.mrf.mxu0  ;;  %v1065_v59 = vpop.f32.mrf.mxu1 }
  0xe1   : > { %v3936_v60 = vadd.f32 %v1049_v52, %v752_v58 }
  0xe2   : > { %v3938_v61 = vpop.f32.mrf.mxu0  ;;  %v3940_v35 = vpop.f32.mrf.mxu1 }
  0xe4   : > { %v3942_v62 = vpop.f32.mrf.mxu0  ;;  %v3944_v63 = vpop.f32.mrf.mxu1 }
  0xe6   : > { %v3248_v0 = vpop.f32.mrf.mxu0 }
  0xe7   : > { %v3946_v1 = vadd.f32 %v3282_v56, %v3248_v0  ;;  %v3286_v2 = vpop.f32.mrf.mxu1 }
  0xe8   : > { %v768_v3 = vpop.f32.mrf.mxu0 }
  0xe9   : > { %v3948_v4 = vadd.f32 %v1065_v59, %v768_v3  ;;  %v1081_v5 = vpop.f32.mrf.mxu1 }
  0xea   : > { %v3950_v7 = vpop.f32.mrf.mxu0 }
  0xeb   : > { %v3952_v8 = vpop.f32.mrf.mxu1 }
  0xec   : > { %v3954_v9 = vpop.f32.mrf.mxu0 }
  0xed   : > { %v3956_v10 = vpop.f32.mrf.mxu1 }
  0xf0   : > { %v3252_v11 = vpop.f32.mrf.mxu0  ;;  %v3290_v12 = vpop.f32.mrf.mxu1 }
  0xf1   : > { %v3958_v13 = vadd.f32 %v3286_v2, %v3252_v11 }
  0xf2   : > { %v784_v14 = vpop.f32.mrf.mxu0  ;;  %v1097_v15 = vpop.f32.mrf.mxu1 }
  0xf3   : > { %v3960_v16 = vadd.f32 %v1081_v5, %v784_v14 }
  0xf4   : > { %v3962_v17 = vpop.f32.mrf.mxu0  ;;  %v3964_v18 = vpop.f32.mrf.mxu1 }
  0xf6   : > { %v3966_v19 = vpop.f32.mrf.mxu0  ;;  %v3968_v20 = vpop.f32.mrf.mxu1 }
  0xf8   : > { %v3256_v21 = vpop.f32.mrf.mxu0 }
  0xf9   : > { %v3294_v22 = vpop.f32.mrf.mxu1  ;;  %v3970_v23 = vadd.f32 %v3290_v12, %v3256_v21 }
  0xfa   : > { %v800_v24 = vpop.f32.mrf.mxu0 }
  0xfb   : > { %v1113_v25 = vpop.f32.mrf.mxu1  ;;  %v3972_v26 = vadd.f32 %v1097_v15, %v800_v24 }
  0xfc   : > { %v3974_v27 = vpop.f32.mrf.mxu0 }
  0xfd   : > { %v3295_v28 = vpop.f32.mrf.mxu1 }
  0xfe   : > { %v3976_v29 = vpop.f32.mrf.mxu0 }
  0xff   : > { %v1116_v30 = vpop.f32.mrf.mxu1 }
 0x102   : > { %v3260_v31 = vpop.f32.mrf.mxu0  ;;  %v3298_v6 = vpop.f32.mrf.mxu1 }
 0x103   : > { %v3978_v32 = vadd.f32 %v3294_v22, %v3260_v31 }
 0x104   : > { %v816_v33 = vpop.f32.mrf.mxu0  ;;  %v1129_v34 = vpop.f32.mrf.mxu1 }
 0x105   : > { %v3980_v36 = vadd.f32 %v1113_v25, %v816_v33 }
 0x106   : > { %v3261_v37 = vpop.f32.mrf.mxu0  ;;  %v3299_v38 = vpop.f32.mrf.mxu1 }
 0x107   : > { %v3982_v39 = vadd.f32 %v3295_v28, %v3261_v37 }
 0x108   : > { %v819_v40 = vpop.f32.mrf.mxu0  ;;  %v1132_v41 = vpop.f32.mrf.mxu1 }
 0x109   : > { %v3984_v42 = vadd.f32 %v1116_v30, %v819_v40 }
 0x10a   : > { %v3264_v43 = vpop.f32.mrf.mxu0 }
 0x10b   : > { %v3302_v44 = vpop.f32.mrf.mxu1  ;;  %v3986_v45 = vadd.f32 %v3298_v6, %v3264_v43 }
 0x10c   : > { %v832_v46 = vpop.f32.mrf.mxu0 }
 0x10d   : > { %v1145_v47 = vpop.f32.mrf.mxu1  ;;  %v3988_v48 = vadd.f32 %v1129_v34, %v832_v46 }
 0x10e   : > { %v3265_v49 = vpop.f32.mrf.mxu0 }
 0x10f   : > { %v3303_v50 = vpop.f32.mrf.mxu1  ;;  %v3990_v51 = vadd.f32 %v3299_v38, %v3265_v49 }
 0x110   : > { %v835_v52 = vpop.f32.mrf.mxu0 }
 0x111   : > { %v3992_v55 = vadd.f32 %v1132_v41, %v835_v52  ;;  %v1148_v56 = vpop.f32.mrf.mxu1  ;;  %v4014_v41 = vld [vmem:[%s4242_s2] ss:$0 sm:$0xff]  ;;  %v1053_v52 = vadd.f32 %v3932_v54, %v3942_v62 }
 0x114   : > { %v3268_v58 = vpop.f32.mrf.mxu0  ;;  %v3306_v3 = vpop.f32.mrf.mxu1 }
 0x115   : > { %v3994_v59 = vadd.f32 %v3302_v44, %v3268_v58  ;;  %v1061_v44 = vadd.f32 %v3930_v53, %v3938_v61 }
 0x116   : > { %v848_v0 = vpop.f32.mrf.mxu0  ;;  %v1161_v15 = vpop.f32.mrf.mxu1 }
 0x117   : > { %v3996_v2 = vadd.f32 %v1145_v47, %v848_v0 }
 0x118   : > { %v3269_v5 = vpop.f32.mrf.mxu0  ;;  %v3307_v24 = vpop.f32.mrf.mxu1 }
 0x119   : > { %v3998_v11 = vadd.f32 %v3303_v50, %v3269_v5 }
 0x11a   : > { %v851_v12 = vpop.f32.mrf.mxu0  ;;  %v1164_v6 = vpop.f32.mrf.mxu1 }
 0x11b   : > { %v4000_v14 = vadd.f32 %v1148_v56, %v851_v12 }
 0x11c   : > { %v3272_v21 = vpop.f32.mrf.mxu0 }
 0x11d   : > { %v4002_v22 = vadd.f32 %v3306_v3, %v3272_v21 }
 0x11e   : > { %v864_v25 = vpop.f32.mrf.mxu0 }
 0x11f   : > { %v4004_v28 = vadd.f32 %v1161_v15, %v864_v25 }
 0x120   : > { %v3273_v30 = vpop.f32.mrf.mxu0 }
 0x121   : > { %v4006_v31 = vadd.f32 %v3307_v24, %v3273_v30  ;;  %v1077_v24 = vadd.f32 %v3940_v35, %v3950_v7 }
 0x122   : > { %v867_v33 = vpop.f32.mrf.mxu0 }
 0x123   : > { %v4008_v34 = vadd.f32 %v1164_v6, %v867_v33 }
 0x124   : > { %v3312_v37 = vpop.f32.mrf.mxu0 }
 0x125   : > { %v1511_v38 = vadd.f32 %v3312_v37, %v3934_v57 }
 0x126   : > { %v1382_v43 = vpop.f32.mrf.mxu0 }
 0x127   : > { %v3346_v40 = vpop.f32.mrf.mxu1  ;;  %v1509_v47 = vadd.f32 %v1382_v43, %v3936_v60 }
 0x128   : > { %v2243_v46 = vadd.f32 %v3346_v40, %v1511_v38  ;;  %v3313_v50 = vpop.f32.mrf.mxu0  ;;  %v1069_v40 = vadd.f32 %v3944_v63, %v3954_v9 }
 0x129   : > { %v2114_v49 = vpop.f32.mrf.mxu1  ;;  %v1512_v58 = vadd.f32 %v3313_v50, %v1061_v44 }
 0x12a   : > { %v4022_v57 = vadd.f32 %v4014_v41, %v2243_v46  ;;  %v2241_v56 = vadd.f32 %v2114_v49, %v1509_v47  ;;  %v1385_v3 = vpop.f32.mrf.mxu0 }
 0x12b   : > { %v3347_v0 = vpop.f32.mrf.mxu1  ;;  %v1510_v61 = vadd.f32 %v1385_v3, %v1053_v52 }
 0x12c   : > { %v2980_v5 = vmul.f32 -1.442695, %v4022_v57  ;;  %v4026_v12 = vadd.f32 %v4014_v41, %v2241_v56  ;;  %v2244_v53 = vadd.f32 %v3347_v0, %v1512_v58  ;;  %v3316_v15 = vpop.f32.mrf.mxu0 }
 0x12d   : > { %v2117_v60 = vpop.f32.mrf.mxu1  ;;  %v1515_v30 = vadd.f32 %v3316_v15, %v3946_v1 }
 0x12e   : > { %3425 = vpow2.f32 %v2980_v5  ;;  %v2978_v21 = vmul.f32 -1.442695, %v4026_v12  ;;  %v4030_v54 = vadd.f32 %v4014_v41, %v2244_v53  ;;  %v2242_v62 = vadd.f32 %v2117_v60, %v1510_v61  ;;  %v1398_v6 = vpop.f32.mrf.mxu0 }
 0x12f   : > { %v3350_v25 = vpop.f32.mrf.mxu1  ;;  %v1513_v38 = vadd.f32 %v1398_v6, %v3948_v4 }
 0x130   : > { %3427 = vpow2.f32 %v2978_v21  ;;  %v2981_v33 = vmul.f32 -1.442695, %v4030_v54  ;;  %v4037_v37 = vadd.f32 %v4014_v41, %v2242_v62  ;;  %v2247_v44 = vadd.f32 %v3350_v25, %v1515_v30  ;;  %v3317_v46 = vpop.f32.mrf.mxu0 }
 0x131   : > { %v2130_v43 = vpop.f32.mrf.mxu1  ;;  %v1516_v1 = vadd.f32 %v3317_v46, %v1077_v24  ;;  %v1093_v62 = vadd.f32 %v3952_v8, %v3962_v17 }
 0x132   : > { %3429 = vpow2.f32 %v2981_v33  ;;  %v2979_v35 = vmul.f32 -1.442695, %v4037_v37  ;;  %v2245_v7 = vadd.f32 %v2130_v43, %v1513_v38  ;;  %v4044_v47 = vadd.f32 %v4014_v41, %v2247_v44  ;;  %v1401_v50 = vpop.f32.mrf.mxu0 }
 0x133   : > { %v3351_v49 = vpop.f32.mrf.mxu1  ;;  %v1514_v56 = vadd.f32 %v1401_v50, %v1069_v40  ;;  %v1085_v33 = vadd.f32 %v3956_v10, %v3966_v19 }
 0x134   : > { %3431 = vpow2.f32 %v2979_v35  ;;  %v4047_v52 = vadd.f32 %v4014_v41, %v2245_v7  ;;  %v2248_v4 = vadd.f32 %v3351_v49, %v1516_v1  ;;  %v2984_v63 = vmul.f32 -1.442695, %v4044_v47  ;;  %v3320_v58 = vpop.f32.mrf.mxu0 }
 0x135   : > { %v2133_v9 = vpop.f32.mrf.mxu1  ;;  %v1519_v53 = vadd.f32 %v3320_v58, %v3958_v13 }
 0x136   : > { %v2982_v0 = vmul.f32 -1.442695, %v4047_v52  ;;  %v4052_v3 = vadd.f32 %v4014_v41, %v2248_v4  ;;  %v2246_v5 = vadd.f32 %v2133_v9, %v1514_v56  ;;  %3433 = vpow2.f32 %v2984_v63  ;;  %v1414_v61 = vpop.f32.mrf.mxu0 }
 0x137   : > { %v1517_v21 = vadd.f32 %v1414_v61, %v3960_v16 }
 0x138   : > { %3435 = vpow2.f32 %v2982_v0  ;;  %v2985_v60 = vmul.f32 -1.442695, %v4052_v3  ;;  %v4057_v15 = vadd.f32 %v4014_v41, %v2246_v5  ;;  %v3354_v24 = vpop.f32.mrf.mxu1  ;;  %v3321_v25 = vpop.f32.mrf.mxu0 }
 0x139   : > { %v2251_v6 = vadd.f32 %v3354_v24, %v1519_v53  ;;  %v1520_v40 = vadd.f32 %v3321_v25, %v1093_v62  ;;  %v1109_v53 = vadd.f32 %v3964_v18, %v3974_v27 }
 0x13a   : > { %3437 = vpow2.f32 %v2985_v60  ;;  %v2983_v30 = vmul.f32 -1.442695, %v4057_v15  ;;  %v2146_v38 = vpop.f32.mrf.mxu1  ;;  %v1417_v43 = vpop.f32.mrf.mxu0 }
 0x13b   : > { %v3426_v13 = vpop.eup %3425  ;;  %v4066_v16 = vadd.f32 %v4014_v41, %v2251_v6  ;;  %v2249_v46 = vadd.f32 %v2146_v38, %v1517_v21  ;;  %v1518_v35 = vadd.f32 %v1417_v43, %v1085_v33 }
 0x13c   : > { %v2410_v44 = vadd.f32 1.0, %v3426_v13  ;;  %3439 = vpow2.f32 %v2983_v30  ;;  %v3355_v17 = vpop.f32.mrf.mxu1  ;;  %v3324_v7 = vpop.f32.mrf.mxu0  ;;  %v1101_v30 = vadd.f32 %v3968_v20, %v3976_v29 }
 0x13d   : > { %v3428_v8 = vpop.eup %3427  ;;  %v2988_v49 = vmul.f32 -1.442695, %v4066_v16  ;;  %v4070_v50 = vadd.f32 %v4014_v41, %v2249_v46  ;;  %v2252_v4 = vadd.f32 %v3355_v17, %v1520_v40  ;;  %v1523_v56 = vadd.f32 %v3324_v7, %v3970_v23 }
 0x13e   : > { %3441 = vrcp.f32 %v2410_v44  ;;  %v2408_v1 = vadd.f32 1.0, %v3428_v8  ;;  %v2149_v19 = vpop.f32.mrf.mxu1  ;;  %v1430_v63 = vpop.f32.mrf.mxu0 }
 0x13f   : > { %v3430_v10 = vpop.eup %3429  ;;  %v2986_v58 = vmul.f32 -1.442695, %v4070_v50  ;;  %v2250_v0 = vadd.f32 %v2149_v19, %v1518_v35  ;;  %v4077_v61 = vadd.f32 %v4014_v41, %v2252_v4  ;;  %v1521_v21 = vadd.f32 %v1430_v63, %v3972_v26 }
 0x140   : > { %3443 = vrcp.f32 %v2408_v1  ;;  %v2411_v9 = vadd.f32 1.0, %v3430_v10  ;;  %v3358_v60 = vpop.f32.mrf.mxu1  ;;  %v3325_v62 = vpop.f32.mrf.mxu0 }
 0x141   : > { %v3432_v5 = vpop.eup %3431  ;;  %3445 = vpow2.f32 %v2988_v49  ;;  %v4081_v24 = vadd.f32 %v4014_v41, %v2250_v0  ;;  %v2255_v25 = vadd.f32 %v3358_v60, %v1523_v56  ;;  %v2989_v18 = vmul.f32 -1.442695, %v4077_v61 }
 0x142   : > { %3447 = vrcp.f32 %v2411_v9  ;;  %v2409_v23 = vadd.f32 1.0, %v3432_v5  ;;  %v2162_v27 = vpop.f32.mrf.mxu1  ;;  %v1524_v6 = vadd.f32 %v3325_v62, %v1109_v53  ;;  %v1433_v13 = vpop.f32.mrf.mxu0 }
 0x143   : > { %3449 = vpow2.f32 %v2986_v58  ;;  %v3434_v33 = vpop.eup %3433  ;;  %v2987_v26 = vmul.f32 -1.442695, %v4081_v24  ;;  %v4088_v38 = vadd.f32 %v4014_v41, %v2255_v25  ;;  %v2253_v40 = vadd.f32 %v2162_v27, %v1521_v21 }
 0x144   : > { %3451 = vrcp.f32 %v2409_v23  ;;  %v2414_v44 = vadd.f32 1.0, %v3434_v33  ;;  %v3359_v46 = vpop.f32.mrf.mxu1  ;;  %v1522_v8 = vadd.f32 %v1433_v13, %v1101_v30  ;;  %v3328_v20 = vpop.f32.mrf.mxu0 }
 0x145   : > { %v3436_v43 = vpop.eup %3435  ;;  %3453 = vpow2.f32 %v2989_v18  ;;  %v2992_v17 = vmul.f32 -1.442695, %v4088_v38  ;;  %v4092_v35 = vadd.f32 %v4014_v41, %v2253_v40  ;;  %v2256_v49 = vadd.f32 %v3359_v46, %v1524_v6 }
 0x146   : > { %v2412_v29 = vadd.f32 1.0, %v3436_v43  ;;  %3455 = vpow2.f32 %v2987_v26  ;;  %v2165_v1 = vpop.f32.mrf.mxu1  ;;  %v1527_v10 = vadd.f32 %v3328_v20, %v3978_v32  ;;  %v1446_v19 = vpop.f32.mrf.mxu0 }
 0x147   : > { %v3438_v7 = vpop.eup %3437  ;;  %3457 = vrcp.f32 %v2414_v44  ;;  %v2990_v56 = vmul.f32 -1.442695, %v4092_v35  ;;  %v2254_v63 = vadd.f32 %v2165_v1, %v1522_v8  ;;  %v4097_v58 = vadd.f32 %v4014_v41, %v2256_v49 }
 0x148   : > { %3459 = vrcp.f32 %v2412_v29  ;;  %v2415_v4 = vadd.f32 1.0, %v3438_v7  ;;  %v1525_v5 = vadd.f32 %v1446_v19, %v3980_v36  ;;  %v3329_v53 = vpop.f32.mrf.mxu0 }
 0x149   : > { %v3440_v9 = vpop.eup %3439  ;;  %3461 = vpow2.f32 %v2992_v17  ;;  %v3362_v0 = vpop.f32.mrf.mxu1  ;;  %v4101_v21 = vadd.f32 %v4014_v41, %v2254_v63  ;;  %v2993_v23 = vmul.f32 -1.442695, %v4097_v58  ;;  %v1528_v30 = vadd.f32 %v3329_v53, %v3982_v39 }
 0x14a   : > { %3463 = vrcp.f32 %v2415_v4  ;;  %v2413_v60 = vadd.f32 1.0, %v3440_v9  ;;  %v2259_v32 = vadd.f32 %v3362_v0, %v1527_v10  ;;  %v1449_v18 = vpop.f32.mrf.mxu0 }
 0x14b   : > { %v3442_v62 = vpop.eup %3441  ;;  %3465 = vpow2.f32 %v2990_v56  ;;  %v2178_v25 = vpop.f32.mrf.mxu1  ;;  %v2991_v27 = vmul.f32 -1.442695, %v4101_v21  ;;  %v1526_v26 = vadd.f32 %v1449_v18, %v3984_v42 }
 0x14c   : > { %3467 = vrcp.f32 %v2413_v60  ;;  %v4107_v36 = vadd.f32 %v4014_v41, %v2259_v32  ;;  %v2257_v33 = vadd.f32 %v2178_v25, %v1525_v5  ;;  %v3332_v40 = vpop.f32.mrf.mxu0  ;;  %v2506_v44 = vmul.f32 %v3442_v62, %v4022_v57 }
 0x14d   : > { %v3444_v6 = vpop.eup %3443  ;;  %3469 = vpow2.f32 %v2993_v23  ;;  %v3363_v13 = vpop.f32.mrf.mxu1  ;;  %v1531_v1 = vadd.f32 %v3332_v40, %v3986_v45 }
 0x14e   : > { %v3446_v43 = vpop.eup %3445  ;;  %3471 = vpow2.f32 %v2991_v27  ;;  %v2996_v39 = vmul.f32 -1.442695, %v4107_v36  ;;  %v2260_v46 = vadd.f32 %v3363_v13, %v1528_v30  ;;  %v2504_v20 = vmul.f32 %v3444_v6, %v4026_v12  ;;  %v1462_v42 = vpop.f32.mrf.mxu0 }
 0x14f   : > { %v3448_v8 = vpop.eup %3447  ;;  %v2418_v29 = vadd.f32 1.0, %v3446_v43  ;;  %v4115_v17 = vadd.f32 %v4014_v41, %v2257_v33  ;;  %v2181_v7 = vpop.f32.mrf.mxu1  ;;  %v1529_v63 = vadd.f32 %v1462_v42, %v3988_v48 }
 0x150   : > { %v3450_v49 = vpop.eup %3449  ;;  %v2507_v10 = vmul.f32 %v3448_v8, %v4030_v54  ;;  %3473 = vpow2.f32 %v2996_v39  ;;  %v4120_v57 = vadd.f32 %v4014_v41, %v2260_v46  ;;  %v2258_v19 = vadd.f32 %v2181_v7, %v1526_v26  ;;  %v3333_v54 = vpop.f32.mrf.mxu0 }
 0x151   : > { %v3452_v4 = vpop.eup %3451  ;;  %3475 = vrcp.f32 %v2418_v29  ;;  %v2416_v12 = vadd.f32 1.0, %v3450_v49  ;;  %v2994_v56 = vmul.f32 -1.442695, %v4115_v17  ;;  %v3366_v45 = vpop.f32.mrf.mxu1  ;;  %v1532_v30 = vadd.f32 %v3333_v54, %v3990_v51 }
 0x152   : > { %v3454_v9 = vpop.eup %3453  ;;  %v3085_v0 = vpack.c.bf16 %v2507_v10, %v2506_v44  ;;  %v2505_v5 = vmul.f32 %v3452_v4, %v4037_v37  ;;  %v2997_v53 = vmul.f32 -1.442695, %v4120_v57  ;;  %v4132_v60 = vadd.f32 %v4014_v41, %v2258_v19  ;;  %v1465_v18 = vpop.f32.mrf.mxu0 }
 0x153   : > { %v3456_v32 = vpop.eup %3455  ;;  %3477 = vrcp.f32 %v2416_v12  ;;  %v2419_v62 = vadd.f32 1.0, %v3454_v9  ;;  %v2194_v23 = vpop.f32.mrf.mxu1  ;;  %v2263_v25 = vadd.f32 %v3366_v45, %v1531_v1  ;;  %v1530_v8 = vadd.f32 %v1465_v18, %v3992_v55 }
 0x154   : > { %v3458_v48 = vpop.eup %3457  ;;  %3157 = vst [vmem:[%s4125_s4 + $0x8] sm:$0xff] %v3085_v0   ;;  %v3080_v27 = vpack.c.bf16 %v2505_v5, %v2504_v20  ;;  %v2417_v6 = vadd.f32 1.0, %v3456_v32  ;;  %3479 = vpow2.f32 %v2994_v56  ;;  %v2995_v37 = vmul.f32 -1.442695, %v4132_v60  ;;  %v3336_v44 = vpop.f32.mrf.mxu0 }
 0x155   : > { %v3460_v13 = vpop.eup %3459  ;;  %v2510_v33 = vmul.f32 %v3458_v48, %v4044_v47  ;;  %3481 = vrcp.f32 %v2419_v62  ;;  %v4139_v26 = vadd.f32 %v4014_v41, %v2263_v25  ;;  %v3367_v40 = vpop.f32.mrf.mxu1  ;;  %v2261_v43 = vadd.f32 %v2194_v23, %v1529_v63 }
 0x156   : > { %v3462_v51 = vpop.eup %3461  ;;  %3081 = vst [vmem:[%s4125_s4] sm:$0xff] %v3080_v27   ;;  %v2508_v39 = vmul.f32 %v3460_v13, %v4047_v52  ;;  %3483 = vrcp.f32 %v2417_v6  ;;  %v2264_v46 = vadd.f32 %v3367_v40, %v1532_v30  ;;  %v1478_v42 = vpop.f32.mrf.mxu0  ;;  %v1535_v45 = vadd.f32 %v3336_v44, %v3994_v59 }
 0x157   : > { %v3464_v20 = vpop.eup %3463  ;;  %v2422_v29 = vadd.f32 1.0, %v3462_v51  ;;  %3485 = vpow2.f32 %v2997_v53  ;;  %v3000_v47 = vmul.f32 -1.442695, %v4139_v26  ;;  %v4146_v7 = vadd.f32 %v4014_v41, %v2261_v43  ;;  %v2197_v1 = vpop.f32.mrf.mxu1 }
 0x158   : > { %v3466_v49 = vpop.eup %3465  ;;  %v2511_v10 = vmul.f32 %v3464_v20, %v4052_v3  ;;  %3487 = vpow2.f32 %v2995_v37  ;;  %v4150_v52 = vadd.f32 %v4014_v41, %v2264_v46  ;;  %v2262_v19 = vadd.f32 %v2197_v1, %v1530_v8  ;;  %v3337_v63 = vpop.f32.mrf.mxu0 }
 0x159   : > { %v3468_v4 = vpop.eup %3467  ;;  %3489 = vrcp.f32 %v2422_v29  ;;  %v2420_v55 = vadd.f32 1.0, %v3466_v49  ;;  %v2998_v12 = vmul.f32 -1.442695, %v4146_v7  ;;  %v3370_v56 = vpop.f32.mrf.mxu1  ;;  %v1533_v18 = vadd.f32 %v1478_v42, %v3996_v2 }
 0x15a   : > { %v3470_v54 = vpop.eup %3469  ;;  %v3095_v9 = vpack.c.bf16 %v2511_v10, %v2510_v33  ;;  %v2509_v0 = vmul.f32 %v3468_v4, %v4057_v15  ;;  %3491 = vpow2.f32 %v3000_v47  ;;  %v3001_v3 = vmul.f32 -1.442695, %v4150_v52  ;;  %v1481_v25 = vpop.f32.mrf.mxu0 }
 0x15b   : > { %v3472_v5 = vpop.eup %3471  ;;  %3493 = vrcp.f32 %v2420_v55  ;;  %v2423_v53 = vadd.f32 1.0, %v3470_v54  ;;  %v4157_v32 = vadd.f32 %v4014_v41, %v2262_v19  ;;  %v2210_v62 = vpop.f32.mrf.mxu1  ;;  %v2267_v23 = vadd.f32 %v3370_v56, %v1535_v45 }
 0x15c   : > { %3159 = vst [vmem:[%s4125_s4 + $0x18] sm:$0xff] %v3095_v9   ;;  %v3090_v59 = vpack.c.bf16 %v2509_v0, %v2508_v39  ;;  %v2421_v30 = vadd.f32 1.0, %v3472_v5  ;;  %3495 = vpow2.f32 %v2998_v12  ;;  %v1536_v37 = vadd.f32 %v3337_v63, %v3998_v11  ;;  %v3340_v13 = vpop.f32.mrf.mxu0 }
 0x15d   : > { %v3474_v15 = vpop.eup %3473  ;;  %3497 = vrcp.f32 %v2423_v53  ;;  %v2999_v48 = vmul.f32 -1.442695, %v4157_v32  ;;  %v4163_v27 = vadd.f32 %v4014_v41, %v2267_v23  ;;  %v3371_v6 = vpop.f32.mrf.mxu1  ;;  %v2265_v43 = vadd.f32 %v2210_v62, %v1533_v18 }
 0x15e   : > { %v3476_v33 = vpop.eup %3475  ;;  %3158 = vst [vmem:[%s4125_s4 + $0x10] sm:$0xff] %v3090_v59   ;;  %3499 = vrcp.f32 %v2421_v30  ;;  %v2426_v40 = vadd.f32 1.0, %v3474_v15  ;;  %v1534_v44 = vadd.f32 %v1481_v25, %v4000_v14  ;;  %v2268_v39 = vadd.f32 %v3371_v6, %v1536_v37  ;;  %v1494_v46 = vpop.f32.mrf.mxu0 }
 0x15f   : > { %3501 = vpow2.f32 %v3001_v3  ;;  %v3004_v2 = vmul.f32 -1.442695, %v4163_v27  ;;  %v2213_v51 = vpop.f32.mrf.mxu1  ;;  %v4170_v20 = vadd.f32 %v4014_v41, %v2265_v43  ;;  %v1539_v29 = vadd.f32 %v3340_v13, %v4002_v22 }
 0x160   : > { %v3478_v8 = vpop.eup %3477  ;;  %3503 = vrcp.f32 %v2426_v40  ;;  %v2266_v11 = vadd.f32 %v2213_v51, %v1534_v44  ;;  %v2514_v1 = vmul.f32 %v3476_v33, %v4066_v16  ;;  %v4176_v14 = vadd.f32 %v4014_v41, %v2268_v39  ;;  %v3341_v49 = vpop.f32.mrf.mxu0 }
 0x161   : > { %v3480_v47 = vpop.eup %3479  ;;  %v2512_v42 = vmul.f32 %v3478_v8, %v4070_v50  ;;  %3505 = vpow2.f32 %v2999_v48  ;;  %v3002_v4 = vmul.f32 -1.442695, %v4170_v20  ;;  %v1537_v50 = vadd.f32 %v1494_v46, %v4004_v28 }
 0x162   : > { %v3482_v10 = vpop.eup %3481  ;;  %v2424_v19 = vadd.f32 1.0, %v3480_v47  ;;  %3507 = vpow2.f32 %v3004_v2  ;;  %v4180_v55 = vadd.f32 %v4014_v41, %v2266_v11  ;;  %v3005_v16 = vmul.f32 -1.442695, %v4176_v14  ;;  %v1497_v63 = vpop.f32.mrf.mxu0 }
 0x163   : > { %v3484_v12 = vpop.eup %3483  ;;  %v2515_v22 = vmul.f32 %v3482_v10, %v4077_v61  ;;  %v3374_v56 = vpop.f32.mrf.mxu1  ;;  %v1540_v45 = vadd.f32 %v3341_v49, %v4006_v31  ;;  %v1538_v23 = vadd.f32 %v1497_v63, %v4008_v34 }
 0x164   : > { %v3486_v54 = vpop.eup %3485  ;;  %v2513_v9 = vmul.f32 %v3484_v12, %v4081_v24  ;;  %3509 = vrcp.f32 %v2424_v19  ;;  %v3003_v0 = vmul.f32 -1.442695, %v4180_v55  ;;  %v2271_v3 = vadd.f32 %v3374_v56, %v1539_v29 }
 0x165   : > { %v3488_v5 = vpop.eup %3487  ;;  %v3105_v53 = vpack.c.bf16 %v2515_v22, %v2514_v1  ;;  %v2427_v61 = vadd.f32 1.0, %v3486_v54  ;;  %3511 = vpow2.f32 %v3002_v4  ;;  %v2226_v62 = vpop.f32.mrf.mxu1 }
 0x166   : > { %v3490_v28 = vpop.eup %3489  ;;  %v3100_v25 = vpack.c.bf16 %v2513_v9, %v2512_v42  ;;  %v2425_v31 = vadd.f32 1.0, %v3488_v5  ;;  %3513 = vpow2.f32 %v3005_v16  ;;  %v4190_v59 = vadd.f32 %v4014_v41, %v2271_v3 }
 0x167   : > { %v3492_v24 = vpop.eup %3491  ;;  %3161 = vst [vmem:[%s4125_s4 + $0x28] sm:$0xff] %v3105_v53   ;;  %3515 = vrcp.f32 %v2427_v61  ;;  %v3375_v30 = vpop.f32.mrf.mxu1  ;;  %v2269_v18 = vadd.f32 %v2226_v62, %v1537_v50  ;;  %v2518_v13 = vmul.f32 %v3490_v28, %v4088_v38 }
 0x168   : > { %v3494_v15 = vpop.eup %3493  ;;  %3160 = vst [vmem:[%s4125_s4 + $0x20] sm:$0xff] %v3100_v25   ;;  %3517 = vrcp.f32 %v2425_v31  ;;  %v2430_v48 = vadd.f32 1.0, %v3492_v24  ;;  %v3008_v6 = vmul.f32 -1.442695, %v4190_v59  ;;  %v2272_v37 = vadd.f32 %v3375_v30, %v1540_v45 }
 0x169   : > { %v3496_v34 = vpop.eup %3495  ;;  %3519 = vpow2.f32 %v3003_v0  ;;  %v4197_v33 = vadd.f32 %v4014_v41, %v2269_v18  ;;  %v2229_v40 = vpop.f32.mrf.mxu1  ;;  %v2516_v46 = vmul.f32 %v3494_v15, %v4092_v35 }
 0x16a   : > { %v3498_v43 = vpop.eup %3497  ;;  %3521 = vrcp.f32 %v2430_v48  ;;  %v2428_v44 = vadd.f32 1.0, %v3496_v34  ;;  %v4200_v2 = vadd.f32 %v4014_v41, %v2272_v37  ;;  %v2270_v51 = vadd.f32 %v2229_v40, %v1538_v23 }
 0x16b   : > { %v3500_v39 = vpop.eup %3499  ;;  %v2519_v8 = vmul.f32 %v3498_v43, %v4097_v58  ;;  %3523 = vpow2.f32 %v3008_v6  ;;  %v3006_v38 = vmul.f32 -1.442695, %v4197_v33 }
 0x16c   : > { %v3502_v11 = vpop.eup %3501  ;;  %v2517_v29 = vmul.f32 %v3500_v39, %v4101_v21  ;;  %3525 = vrcp.f32 %v2428_v44  ;;  %v3009_v47 = vmul.f32 -1.442695, %v4200_v2  ;;  %v4208_v1 = vadd.f32 %v4014_v41, %v2270_v51 }
 0x16d   : > { %v3504_v42 = vpop.eup %3503  ;;  %v3115_v49 = vpack.c.bf16 %v2519_v8, %v2518_v13  ;;  %v2431_v10 = vadd.f32 1.0, %v3502_v11  ;;  %3527 = vpow2.f32 %v3006_v38 }
 0x16e   : > { %v3506_v35 = vpop.eup %3505  ;;  %v3110_v58 = vpack.c.bf16 %v2517_v29, %v2516_v46  ;;  %3529 = vpow2.f32 %v3009_v47  ;;  %v3007_v19 = vmul.f32 -1.442695, %v4208_v1  ;;  %v2522_v54 = vmul.f32 %v3504_v42, %v4107_v36 }
 0x16f   : > { %v3508_v4 = vpop.eup %3507  ;;  %3163 = vst [vmem:[%s4125_s4 + $0x38] sm:$0xff] %v3115_v49   ;;  %3531 = vrcp.f32 %v2431_v10  ;;  %v2429_v21 = vadd.f32 1.0, %v3506_v35 }
 0x170   : > { %3162 = vst [vmem:[%s4125_s4 + $0x30] sm:$0xff] %v3110_v58   ;;  %v2434_v12 = vadd.f32 1.0, %v3508_v4  ;;  %3533 = vpow2.f32 %v3007_v19 }
 0x171   : > { %v3510_v22 = vpop.eup %3509  ;;  %3535 = vrcp.f32 %v2429_v21 }
 0x172   : > { %v3512_v41 = vpop.eup %3511  ;;  %3537 = vrcp.f32 %v2434_v12  ;;  %v2520_v3 = vmul.f32 %v3510_v22, %v4115_v17 }
 0x173   : > { %v3514_v16 = vpop.eup %3513  ;;  %v2432_v56 = vadd.f32 1.0, %v3512_v41 }
 0x174   : > { %v3516_v50 = vpop.eup %3515  ;;  %v2435_v45 = vadd.f32 1.0, %v3514_v16 }
 0x175   : > { %v3518_v63 = vpop.eup %3517  ;;  %v2523_v9 = vmul.f32 %v3516_v50, %v4120_v57 }
 0x176   : > { %v3520_v0 = vpop.eup %3519  ;;  %v2521_v5 = vmul.f32 %v3518_v63, %v4132_v60  ;;  %3539 = vrcp.f32 %v2435_v45 }
 0x177   : > { %v3522_v53 = vpop.eup %3521  ;;  %v3125_v61 = vpack.c.bf16 %v2523_v9, %v2522_v54  ;;  %3541 = vrcp.f32 %v2432_v56  ;;  %v2433_v62 = vadd.f32 1.0, %v3520_v0 }
 0x178   : > { %v3524_v23 = vpop.eup %3523  ;;  %v3120_v28 = vpack.c.bf16 %v2521_v5, %v2520_v3  ;;  %v2526_v18 = vmul.f32 %v3522_v53, %v4139_v26 }
 0x179   : > { %v3526_v25 = vpop.eup %3525  ;;  %3165 = vst [vmem:[%s4125_s4 + $0x48] sm:$0xff] %v3125_v61   ;;  %3543 = vrcp.f32 %v2433_v62  ;;  %v2438_v31 = vadd.f32 1.0, %v3524_v23 }
 0x17a   : > { %v3528_v36 = vpop.eup %3527  ;;  %3164 = vst [vmem:[%s4125_s4 + $0x40] sm:$0xff] %v3120_v28   ;;  %v2524_v37 = vmul.f32 %v3526_v25, %v4146_v7 }
 0x17b   : > { %v3530_v57 = vpop.eup %3529  ;;  %v2436_v24 = vadd.f32 1.0, %v3528_v36  ;;  %3545 = vrcp.f32 %v2438_v31 }
 0x17c   : > { %v3532_v30 = vpop.eup %3531  ;;  %v2439_v17 = vadd.f32 1.0, %v3530_v57 }
 0x17d   : > { %v3534_v60 = vpop.eup %3533  ;;  %v2527_v15 = vmul.f32 %v3532_v30, %v4150_v52  ;;  %3547 = vrcp.f32 %v2436_v24 }
 0x17e   : > { %v3536_v48 = vpop.eup %3535  ;;  %3549 = vrcp.f32 %v2439_v17  ;;  %v2437_v6 = vadd.f32 1.0, %v3534_v60 }
 0x17f   : > { %v3135_v34 = vpack.c.bf16 %v2527_v15, %v2526_v18  ;;  %v2525_v13 = vmul.f32 %v3536_v48, %v4157_v32  ;;  %v3538_v40 = vpop.eup %3537 }
 0x180   : > { %3551 = vrcp.f32 %v2437_v6  ;;  %v2530_v52 = vmul.f32 %v3538_v40, %v4163_v27 }
 0x181   : > { %3167 = vst [vmem:[%s4125_s4 + $0x58] sm:$0xff] %v3135_v34   ;;  %v3130_v43 = vpack.c.bf16 %v2525_v13, %v2524_v37 }
 0x183   : > { %v3540_v44 = vpop.eup %3539  ;;  %3166 = vst [vmem:[%s4125_s4 + $0x50] sm:$0xff] %v3130_v43  }
 0x184   : > { %v3542_v26 = vpop.eup %3541  ;;  %v2531_v51 = vmul.f32 %v3540_v44, %v4176_v14 }
 0x185   : > { %v2528_v7 = vmul.f32 %v3542_v26, %v4170_v20 }
 0x186   : > { %v3544_v39 = vpop.eup %3543  ;;  %v3145_v46 = vpack.c.bf16 %v2531_v51, %v2530_v52 }
 0x187   : > { %v2529_v32 = vmul.f32 %v3544_v39, %v4180_v55 }
 0x188   : > { %3169 = vst [vmem:[%s4125_s4 + $0x68] sm:$0xff] %v3145_v46   ;;  %v3546_v8 = vpop.eup %3545 }
 0x189   : > { %v3140_v38 = vpack.c.bf16 %v2529_v32, %v2528_v7  ;;  %v2534_v47 = vmul.f32 %v3546_v8, %v4190_v59 }
 0x18a   : > { %v3548_v11 = vpop.eup %3547 }
 0x18b   : > { %v3550_v29 = vpop.eup %3549  ;;  %3168 = vst [vmem:[%s4125_s4 + $0x60] sm:$0xff] %v3140_v38   ;;  %v2532_v14 = vmul.f32 %v3548_v11, %v4197_v33 }
 0x18c   : > { %v2535_v27 = vmul.f32 %v3550_v29, %v4200_v2 }
 0x18d   : > { %v3552_v42 = vpop.eup %3551 }
 0x18e   : > { %v3155_v49 = vpack.c.bf16 %v2535_v27, %v2534_v47  ;;  %v2533_v10 = vmul.f32 %v3552_v42, %v4208_v1 }
 0x190   : > { %3171 = vst [vmem:[%s4125_s4 + $0x78] sm:$0xff] %v3155_v49   ;;  %v3150_v20 = vpack.c.bf16 %v2533_v10, %v2532_v14 }
 0x192   : > { %3170 = vst [vmem:[%s4125_s4 + $0x70] sm:$0xff] %v3150_v20  }
 0x193 PF: > { %s13_s12 = sadd.s32 1, %s3559_s12  }
 0x194   : > { %p10_p4 = scmp.ge.s32.totalorder %s13_s12, 4  }
 0x196   :  { %12 = sbr.rel (!%p10_p4) target bundleno = 1 (0x1), region = 66 }

// kernel: _lambda_.7
= control target key start
LH: loop header
LB: loop body
LE: loop exit
PB: predicated region body
PF: predicated region fallthrough
CT: control target
= control target key end

     0   :  { %s1354_s12 = smov 0   ;;  %s1514_s0 = inlined_call_operand.vmem [shape: bf16[2,9,9,32], index: 0, kind: input, shape index: {}]   ;;  %s1515_s1 = inlined_call_operand.vmem [shape: bf16[4,32,128], index: 1, kind: input, shape index: {}]   ;;  %s1516_s2 = inlined_call_operand.vmem [shape: f32[1,128], index: 2, kind: input, shape index: {}]   ;;  %s1517_s3 = inlined_call_operand.vmem [shape: bf16[2,64,128], index: 3, kind: output, shape index: {}]  }
   0x1 LB: > { %s1062_s13 = sadd.s32 4294967295, %s1332_s12   ;;  %p1066_p0 = scmp.ge.s32.totalorder %s1332_s12, 1  ;;  %s1332_s12 = sphi %s1354_s12, %s13_s12  }
   0x2   : > { %p137_p1 = scmp.lt.s32.totalorder %s1332_s12, 3 }
   0x4   : > { %p138_p2 = pnand %p1066_p0, %p137_p1 }
   0x5   : > { %p161_p3 = scmp.lt.s32.totalorder (!%p138_p2), %s1062_s13, 1 }
   0x6   : > { %141 = sbr.rel (%p138_p2) target bundleno = 301 (0x12d), region = 32 }
   0xb   : > { %v1278_v0 = vld [vmem:[%s1515_s1 + $0x8] sm:$0xff]   ;;  %v1279_v1 = vld [vmem:[%s1515_s1 + $0x18] sm:$0xff]   ;;  %v1280_v2 = vld [vmem:[%s1515_s1] sm:$0xff]   ;;  %s1521_s13 = smov (!%p161_p3, %s1062_s13), 1  ;;  %vm192_vm0 = vsmask.f32 3328 }
   0xc   : > { %1233 = vmatprep.subr.bf16.mxu1 %v1278_v0  ;;  %1221 = vmatprep.subr.bf16.mxu0 %v1279_v1  ;;  %v1281_v3 = vld [vmem:[%s1515_s1 + $0x10] sm:$0xff]   ;;  %s1269_s22 = smul.u32 72, %s1521_s13  ;;  %vm193_vm1 = vsmask.f32 7440  ;;  %v1380_v4 = vld [vmem:[%s1515_s1 + $0x28] sm:$0xff]   ;;  %vm336_vm2 = vcmask 261120  }
   0xd   : > { %1234 = vmatpush3.bf16.msra.mxu1 %v1278_v0  ;;  %1222 = vmatpush3.bf16.msra.mxu0 %v1279_v1  ;;  %v1285_v5 = vld [vmem:[%s1515_s1 + $0x38] sm:$0xff]   ;;  %v1289_v34 = vld [vmem:[%s1515_s1 + $0x30] sm:$0xff]   ;;  %vm1405_vm3 = vmor %vm192_vm0, %vm193_vm1  ;;  %s1165_s9 = sshll.u32 %s1521_s13, 5 }
   0xe   : > { %1235 = vmatprep.subr.bf16.mxu1 %v1280_v2  ;;  %1223 = vmatprep.subr.bf16.mxu0 %v1281_v3  ;;  %s1385_s27 = scalar_lea.vmem %s1514_s0, %s1269_s22  ;;  %s170_s14 = scalar_lea.vmem %s1517_s3, %s1165_s9 }
   0xf   : > { %v172_v6 = vld [vmem:[%s1385_s27] sm:$0xf]  ;;  %v173_v7 = vld [vmem:[%s1385_s27 + $0x8] sm:$0xf]  ;;  %v174_v8 = vld [vmem:[%s1385_s27 + $0x10] sm:$0xf] }
  0x10   : > { %v196_v9 = vshrl.u32 %v172_v6, 16  ;;  %v199_v10 = vshll.u32 %v172_v6, 16  ;;  %v210_v11 = vshrl.u32 %v173_v7, 16  ;;  %v213_v12 = vshll.u32 %v173_v7, 16  ;;  %v175_v13 = vld [vmem:[%s1385_s27 + $0x18] sm:$0xf] }
  0x11   : > { %1236 = vmatpush3.bf16.msra.mxu1 %v1280_v2  ;;  %1224 = vmatpush3.bf16.msra.mxu0 %v1281_v3  ;;  %v1084_v14 = vcombine.low %v172_v6, %v173_v7  ;;  %v224_v15 = vshrl.u32 %v174_v8, 16  ;;  %v227_v16 = vshll.u32 %v174_v8, 16  ;;  %v238_v17 = vshrl.u32 %v175_v13, 16  ;;  %v184_v18 = vld [vmem:[%s1385_s27 + $0x4] sm:$0x1] }
  0x12   : > { %1257 = vmatprep.subr.bf16.mxu1 %v1285_v5  ;;  %1245 = vmatprep.subr.bf16.mxu0 %v1380_v4  ;;  %v198_v19 = vrot.slane %v196_v9, 4  ;;  %v201_v20 = vrot.slane %v199_v10, 5  ;;  %v212_v21 = vrot.slane %v210_v11, 4  ;;  %v215_v22 = vrot.slane %v213_v12, 5  ;;  %v185_v23 = vld [vmem:[%s1385_s27 + $0xc] sm:$0x1] }
  0x13   : > { %1237 = vmatprep.mubr.msk.bf16.mxu1 %vm336_vm2, %v1084_v14  ;;  %v226_v24 = vrot.slane %v224_v15, 4  ;;  %v229_v25 = vrot.slane %v227_v16, 5  ;;  %v240_v26 = vrot.slane %v238_v17, 4  ;;  %v241_v27 = vshll.u32 %v175_v13, 16  ;;  %v186_v28 = vld [vmem:[%s1385_s27 + $0x14] sm:$0x1] }
  0x14   : > { %v1085_v29 = vcombine.low %v174_v8, %v175_v13  ;;  %v202_v30 = vor.u32 %v201_v20, %v198_v19  ;;  %v205_v31 = vshll.u32 %v184_v18, 16  ;;  %v216_v32 = vor.u32 %v215_v22, %v212_v21  ;;  %v187_v33 = vld [vmem:[%s1385_s27 + $0x1c] sm:$0x1]  ;;  %v176_v40 = vld [vmem:[%s1385_s27 + $0x20] sm:$0xf] }
  0x15   : > { %v243_v35 = vrot.slane %v241_v27, 5  ;;  %v219_v37 = vshll.u32 %v185_v23, 16  ;;  %v230_v38 = vor.u32 %v229_v25, %v226_v24  ;;  %v233_v39 = vshll.u32 %v186_v28, 16  ;;  %v177_v45 = vld [vmem:[%s1385_s27 + $0x28] sm:$0xf]  ;;  %v1288_v13 = vld [vmem:[%s1515_s1 + $0x20] sm:$0xff]  }
  0x16   : > { %1238 = vmatmul.mubr.msk.bf16.vlgmr.msra.gmra.mxu1 %vm336_vm2, %v1085_v29  ;;  %v203_v41 = vrot.slane %v202_v30, 4  ;;  %v207_v42 = vrot.slane %v205_v31, 5  ;;  %v217_v43 = vrot.slane %v216_v32, 4  ;;  %v247_v44 = vshll.u32 %v187_v33, 16  ;;  %v178_v50 = vld [vmem:[%s1385_s27 + $0x30] sm:$0xf] }
  0x17   : > { %v221_v46 = vrot.slane %v219_v37, 5  ;;  %v231_v47 = vrot.slane %v230_v38, 4  ;;  %v235_v48 = vrot.slane %v233_v39, 5  ;;  %v244_v49 = vor.u32 %v243_v35, %v240_v26  ;;  %1258 = vmatpush3.bf16.msra.mxu1 %v1285_v5  ;;  %v179_v55 = vld [vmem:[%s1385_s27 + $0x38] sm:$0xf] }
  0x18   : > { %v208_v51 = vsel %vm1405_vm3, %v203_v41, %v207_v42  ;;  %v249_v52 = vrot.slane %v247_v44, 5  ;;  %v252_v53 = vshrl.u32 %v176_v40, 16  ;;  %v255_v54 = vshll.u32 %v176_v40, 16  ;;  %1259 = vmatprep.subr.bf16.mxu1 %v1289_v34  ;;  %v188_v60 = vld [vmem:[%s1385_s27 + $0x24] sm:$0x1] }
  0x19   : > { %v222_v56 = vsel %vm1405_vm3, %v217_v43, %v221_v46  ;;  %v236_v57 = vsel %vm1405_vm3, %v231_v47, %v235_v48  ;;  %v245_v58 = vrot.slane %v244_v49, 4  ;;  %v266_v59 = vshrl.u32 %v177_v45, 16  ;;  %v189_v1 = vld [vmem:[%s1385_s27 + $0x2c] sm:$0x1]  ;;  %v190_v7 = vld [vmem:[%s1385_s27 + $0x34] sm:$0x1] }
  0x1a   : > { %v1074_v61 = vcombine.low %v208_v51, %v222_v56  ;;  %v254_v62 = vrot.slane %v252_v53, 4  ;;  %v257_v63 = vrot.slane %v255_v54, 5  ;;  %v269_v0 = vshll.u32 %v177_v45, 16  ;;  %v191_v8 = vld [vmem:[%s1385_s27 + $0x3c] sm:$0x1] }
  0x1b   : > { %v250_v2 = vsel %vm1405_vm3, %v245_v58, %v249_v52  ;;  %v268_v3 = vrot.slane %v266_v59, 4  ;;  %v1086_v5 = vcombine.low %v176_v40, %v177_v45  ;;  %v280_v6 = vshrl.u32 %v178_v50, 16  ;;  %1260 = vmatpush3.bf16.msra.mxu1 %v1289_v34  ;;  %v1116_v18 = vld [vmem:[%s1385_s27 + $0x8] sm:$0xf]  ;;  %v1117_v23 = vld [vmem:[%s1385_s27 + $0xc] sm:$0x1] }
  0x1c   : > { %1225 = vmatprep.mubr.msk.bf16.mxu0 %vm336_vm2, %v1074_v61  ;;  %v1075_v9 = vcombine.low %v236_v57, %v250_v2  ;;  %v271_v10 = vrot.slane %v269_v0, 5  ;;  %v283_v11 = vshll.u32 %v178_v50, 16  ;;  %v294_v12 = vshrl.u32 %v179_v55, 16  ;;  %v1118_v28 = vld [vmem:[%s1385_s27 + $0x10] sm:$0xf] }
  0x1d   : > { %1241 = vmatprep.mubr.msk.bf16.mxu1 %vm336_vm2, %v1086_v5  ;;  %v282_v14 = vrot.slane %v280_v6, 4  ;;  %v297_v15 = vshll.u32 %v179_v55, 16  ;;  %v1087_v16 = vcombine.low %v178_v50, %v179_v55  ;;  %v258_v17 = vor.u32 %v257_v63, %v254_v62  ;;  %v1119_v33 = vld [vmem:[%s1385_s27 + $0x14] sm:$0x1]  ;;  %v1120_v38 = vld [vmem:[%s1385_s27 + $0x18] sm:$0xf] }
  0x1e   : > { %1226 = vmatmul.mubr.msk.bf16.vlgmr.msra.gmra.mxu0 %vm336_vm2, %v1075_v9  ;;  %v285_v19 = vrot.slane %v283_v11, 5  ;;  %v296_v20 = vrot.slane %v294_v12, 4  ;;  %v261_v21 = vshll.u32 %v188_v60, 16  ;;  %v272_v22 = vor.u32 %v271_v10, %v268_v3  ;;  %v1121_v43 = vld [vmem:[%s1385_s27 + $0x1c] sm:$0x1] }
  0x1f   : > { %1246 = vmatpush3.bf16.msra.mxu0 %v1380_v4  ;;  %v299_v24 = vrot.slane %v297_v15, 5  ;;  %1242 = vmatmul.mubr.msk.bf16.gmra.mxu1 %vm336_vm2, %v1087_v16  ;;  %v259_v25 = vrot.slane %v258_v17, 4  ;;  %v275_v26 = vshll.u32 %v189_v1, 16  ;;  %v289_v27 = vshll.u32 %v190_v7, 16  ;;  %v1122_v48 = vld [vmem:[%s1385_s27 + $0x20] sm:$0xf] }
  0x20   : > { %v263_v29 = vrot.slane %v261_v21, 5  ;;  %v273_v30 = vrot.slane %v272_v22, 4  ;;  %1247 = vmatprep.subr.bf16.mxu0 %v1288_v13  ;;  %v286_v31 = vor.u32 %v285_v19, %v282_v14  ;;  %v303_v32 = vshll.u32 %v191_v8, 16  ;;  %v1123_v53 = vld [vmem:[%s1385_s27 + $0x24] sm:$0x1] }
  0x21   : > { %v277_v34 = vrot.slane %v275_v26, 5  ;;  %v291_v35 = vrot.slane %v289_v27, 5  ;;  %v300_v37 = vor.u32 %v299_v24, %v296_v20  ;;  %v671_v4 = vshrl.u32 %v1116_v18, 16  ;;  %v1290_v62 = vld [vmem:[%s1385_s27 + $0x8] ss:$8 sps:$4 sm:$0xff]  }
  0x22   : > { %v264_v39 = vsel %vm1405_vm3, %v259_v25, %v263_v29  ;;  %v287_v40 = vrot.slane %v286_v31, 4  ;;  %v305_v41 = vrot.slane %v303_v32, 5  ;;  %v674_v42 = vshll.u32 %v1116_v18, 16  ;;  %v1124_v12 = vld [vmem:[%s1385_s27 + $0x28] sm:$0xf] }
  0x23   : > { %v278_v44 = vsel %vm1405_vm3, %v273_v30, %v277_v34  ;;  %v301_v45 = vrot.slane %v300_v37, 4  ;;  %1248 = vmatpush3.bf16.msra.mxu0 %v1288_v13  ;;  %v673_v46 = vrot.slane %v671_v4, 4  ;;  %v680_v47 = vshll.u32 %v1117_v23, 16  ;;  %v1291_v16 = vld [vmem:[%s1385_s27 + $0x18] ss:$8 sps:$4 sm:$0xff]  }
  0x24   : > { %v1076_v49 = vcombine.low %v264_v39, %v278_v44  ;;  %v292_v50 = vsel %vm1405_vm3, %v287_v40, %v291_v35  ;;  %v676_v51 = vrot.slane %v674_v42, 5  ;;  %v685_v52 = vshrl.u32 %v1118_v28, 16  ;;  %v1125_v17 = vld [vmem:[%s1385_s27 + $0x2c] sm:$0x1]  ;;  %v1126_v18 = vld [vmem:[%s1385_s27 + $0x30] sm:$0xf] }
  0x25   : > { %v306_v54 = vsel %vm1405_vm3, %v301_v45, %v305_v41  ;;  %v682_v55 = vrot.slane %v680_v47, 5  ;;  %v688_v56 = vshll.u32 %v1118_v28, 16  ;;  %v694_v57 = vshll.u32 %v1119_v33, 16  ;;  %v1127_v22 = vld [vmem:[%s1385_s27 + $0x34] sm:$0x1] }
  0x26   : > { %1229 = vmatprep.mubr.msk.bf16.mxu0 %vm336_vm2, %v1076_v49  ;;  %v1077_v58 = vcombine.low %v292_v50, %v306_v54  ;;  %v677_v59 = vor.u32 %v676_v51, %v673_v46  ;;  %v687_v60 = vrot.slane %v685_v52, 4  ;;  %v699_v61 = vshrl.u32 %v1120_v38, 16  ;;  %v1128_v28 = vld [vmem:[%s1385_s27 + $0x38] sm:$0xf]  ;;  %v1129_v33 = vld [vmem:[%s1385_s27 + $0x3c] sm:$0x1] }
  0x27   : > { %v690_v63 = vrot.slane %v688_v56, 5  ;;  %v696_v0 = vrot.slane %v694_v57, 5  ;;  %v702_v1 = vshll.u32 %v1120_v38, 16  ;;  %v708_v2 = vshll.u32 %v1121_v43, 16  ;;  %v1130_v38 = vld [vmem:[%s1385_s27 + $0x40] sm:$0xf] }
  0x28   : > { %1230 = vmatmul.mubr.msk.bf16.gmra.mxu0 %vm336_vm2, %v1077_v58  ;;  %v678_v3 = vrot.slane %v677_v59, 4  ;;  %v701_v5 = vrot.slane %v699_v61, 4  ;;  %v713_v6 = vshrl.u32 %v1122_v48, 16  ;;  %v716_v7 = vshll.u32 %v1122_v48, 16  ;;  %v1131_v43 = vld [vmem:[%s1385_s27 + $0x44] sm:$0x1] }
  0x29   : > { %v691_v8 = vor.u32 %v690_v63, %v687_v60  ;;  %v704_v9 = vrot.slane %v702_v1, 5  ;;  %v710_v10 = vrot.slane %v708_v2, 5  ;;  %v722_v11 = vshll.u32 %v1123_v53, 16  ;;  %1249 = vmatprep.mubr.msk.bf16.mxu0 %vm336_vm2, %v1290_v62  ;;  %v1292_v52 = vld [vmem:[%s1385_s27 + $0x28] ss:$8 sps:$4 sm:$0xff]  }
  0x2a   : > { %v683_v13 = vsel %vm1405_vm3, %v678_v3, %v682_v55  ;;  %v715_v14 = vrot.slane %v713_v6, 4  ;;  %v718_v15 = vrot.slane %v716_v7, 5  ;;  %v727_v23 = vshrl.u32 %v1124_v12, 16  ;;  %v1293_v63 = vld [vmem:[%s1385_s27 + $0x38] ss:$8 sps:$4 sm:$0xff]  }
  0x2b   : > { %v692_v19 = vrot.slane %v691_v8, 4  ;;  %v705_v20 = vor.u32 %v704_v9, %v701_v5  ;;  %v724_v21 = vrot.slane %v722_v11, 5  ;;  %v730_v25 = vshll.u32 %v1124_v12, 16 }
  0x2c   : > { %v719_v24 = vor.u32 %v718_v15, %v715_v14  ;;  %v736_v26 = vshll.u32 %v1125_v17, 16  ;;  %v741_v27 = vshrl.u32 %v1126_v18, 16  ;;  %v729_v31 = vrot.slane %v727_v23, 4 }
  0x2d   : > { %v697_v29 = vsel %vm1405_vm3, %v692_v19, %v696_v0  ;;  %v706_v30 = vrot.slane %v705_v20, 4  ;;  %v744_v32 = vshll.u32 %v1126_v18, 16  ;;  %v732_v37 = vrot.slane %v730_v25, 5 }
  0x2e   : > { %v1136_v34 = vcombine.low %v683_v13, %v697_v29  ;;  %v720_v35 = vrot.slane %v719_v24, 4  ;;  %v738_v4 = vrot.slane %v736_v26, 5  ;;  %v743_v40 = vrot.slane %v741_v27, 4 }
  0x2f   : > { %v711_v39 = vsel %vm1405_vm3, %v706_v30, %v710_v10  ;;  %v746_v41 = vrot.slane %v744_v32, 5  ;;  %v750_v42 = vshll.u32 %v1127_v22, 16  ;;  %v733_v45 = vor.u32 %v732_v37, %v729_v31 }
  0x30   : > { %1261 = vmatprep.mubr.msk.bf16.mxu1 %vm336_vm2, %v1136_v34  ;;  %v725_v44 = vsel %vm1405_vm3, %v720_v35, %v724_v21  ;;  %1250 = vmatmul.mubr.msk.bf16.vlgmr.msra.gmra.mxu0 %vm336_vm2, %v1291_v16  ;;  %v755_v46 = vshrl.u32 %v1128_v28, 16  ;;  %v758_v47 = vshll.u32 %v1128_v28, 16  ;;  %v764_v51 = vshll.u32 %v1129_v33, 16  ;;  %v1146_v34 = vld [vmem:[%s1516_s2] ss:$0 sm:$0xff] }
  0x31   : > { %v1137_v48 = vcombine.low %v711_v39, %v725_v44  ;;  %v747_v49 = vor.u32 %v746_v41, %v743_v40  ;;  %v752_v50 = vrot.slane %v750_v42, 5  ;;  %v734_v53 = vrot.slane %v733_v45, 4  ;;  %1253 = vmatprep.mubr.msk.bf16.mxu0 %vm336_vm2, %v1292_v52 }
  0x32   : > { %v757_v54 = vrot.slane %v755_v46, 4  ;;  %v760_v55 = vrot.slane %v758_v47, 5  ;;  %v769_v56 = vshrl.u32 %v1130_v38, 16  ;;  %v772_v58 = vshll.u32 %v1130_v38, 16 }
  0x33   : > { %1262 = vmatmul.mubr.msk.bf16.vlgmr.msra.gmra.mxu1 %vm336_vm2, %v1137_v48  ;;  %v748_v57 = vrot.slane %v747_v49, 4  ;;  %v778_v59 = vshll.u32 %v1131_v43, 16  ;;  %v739_v60 = vsel %vm1405_vm3, %v734_v53, %v738_v4  ;;  %v766_v1 = vrot.slane %v764_v51, 5 }
  0x34   : > { %v761_v61 = vor.u32 %v760_v55, %v757_v54  ;;  %v771_v62 = vrot.slane %v769_v56, 4  ;;  %v774_v2 = vrot.slane %v772_v58, 5 }
  0x35   : > { %v753_v0 = vsel %vm1405_vm3, %v748_v57, %v752_v50  ;;  %v780_v7 = vrot.slane %v778_v59, 5 }
  0x36   : > { %v1138_v3 = vcombine.low %v739_v60, %v753_v0  ;;  %v762_v5 = vrot.slane %v761_v61, 4  ;;  %v775_v6 = vor.u32 %v774_v2, %v771_v62 }
  0x38   : > { %1265 = vmatprep.mubr.msk.bf16.mxu1 %vm336_vm2, %v1138_v3  ;;  %1254 = vmatmul.mubr.msk.bf16.gmra.mxu0 %vm336_vm2, %v1293_v63  ;;  %v767_v8 = vsel %vm1405_vm3, %v762_v5, %v766_v1  ;;  %v776_v9 = vrot.slane %v775_v6, 4 }
  0x3a   : > { %v781_v10 = vsel %vm1405_vm3, %v776_v9, %v780_v7 }
  0x3b   : > { %v1139_v11 = vcombine.low %v767_v8, %v781_v10 }
  0x3d   : > { %1266 = vmatmul.mubr.msk.bf16.gmra.mxu1 %vm336_vm2, %v1139_v11 }
  0xd6   : > { %v1239_v12 = vpop.f32.mrf.mxu1 }
  0xd8   : > { %v492_v13 = vpop.f32.mrf.mxu1 }
  0xda   : > { %v1240_v14 = vpop.f32.mrf.mxu1 }
  0xdc   : > { %v495_v16 = vpop.f32.mrf.mxu1 }
  0xde   : > { %v1227_v15 = vpop.f32.mrf.mxu0 }
  0xdf   : > { %v1243_v19 = vpop.f32.mrf.mxu1  ;;  %v501_v36 = vadd.f32 %v1239_v12, %v1227_v15 }
  0xe0   : > { %v383_v17 = vpop.f32.mrf.mxu0 }
  0xe1   : > { %v508_v21 = vpop.f32.mrf.mxu1  ;;  %v493_v29 = vadd.f32 %v492_v13, %v383_v17 }
  0xe2   : > { %v1228_v18 = vpop.f32.mrf.mxu0 }
  0xe3   : > { %v1244_v24 = vpop.f32.mrf.mxu1  ;;  %v504_v32 = vadd.f32 %v1240_v14, %v1228_v18 }
  0xe4   : > { %v386_v20 = vpop.f32.mrf.mxu0 }
  0xe5   : > { %v511_v27 = vpop.f32.mrf.mxu1  ;;  %v496_v38 = vadd.f32 %v495_v16, %v386_v20 }
  0xe8   : > { %v1231_v22 = vpop.f32.mrf.mxu0 }
  0xe9   : > { %v517_v50 = vadd.f32 %v1243_v19, %v1231_v22 }
  0xea   : > { %v399_v23 = vpop.f32.mrf.mxu0 }
  0xeb   : > { %v509_v56 = vadd.f32 %v508_v21, %v399_v23 }
  0xec   : > { %v1232_v25 = vpop.f32.mrf.mxu0 }
  0xed   : > { %v520_v61 = vadd.f32 %v1244_v24, %v1232_v25 }
  0xee   : > { %v402_v26 = vpop.f32.mrf.mxu0 }
  0xef   : > { %v512_v2 = vadd.f32 %v511_v27, %v402_v26 }
  0xf0   : > { %v1251_v28 = vpop.f32.mrf.mxu0 }
  0xf1   : > { %v648_v30 = vadd.f32 %v1251_v28, %v501_v36 }
  0xf2   : > { %v615_v31 = vpop.f32.mrf.mxu0 }
  0xf3   : > { %v1263_v33 = vpop.f32.mrf.mxu1  ;;  %v646_v35 = vadd.f32 %v615_v31, %v493_v29 }
  0xf4   : > { %v890_v37 = vadd.f32 %v1263_v33, %v648_v30  ;;  %v1252_v4 = vpop.f32.mrf.mxu0 }
  0xf5   : > { %v857_v39 = vpop.f32.mrf.mxu1  ;;  %v649_v40 = vadd.f32 %v1252_v4, %v504_v32 }
  0xf6   : > { %v1491_v41 = vadd.f32 %v1146_v34, %v890_v37  ;;  %v888_v42 = vadd.f32 %v857_v39, %v646_v35  ;;  %v618_v43 = vpop.f32.mrf.mxu0 }
  0xf7   : > { %v1264_v44 = vpop.f32.mrf.mxu1  ;;  %v647_v45 = vadd.f32 %v618_v43, %v496_v38 }
  0xf8   : > { %v1149_v46 = vmul.f32 -1.442695, %v1491_v41  ;;  %v1494_v47 = vadd.f32 %v1146_v34, %v888_v42  ;;  %v891_v48 = vadd.f32 %v1264_v44, %v649_v40  ;;  %v1255_v49 = vpop.f32.mrf.mxu0 }
  0xf9   : > { %v860_v51 = vpop.f32.mrf.mxu1  ;;  %v652_v57 = vadd.f32 %v1255_v49, %v517_v50 }
  0xfa   : > { %1294 = vpow2.f32 %v1149_v46  ;;  %v1147_v52 = vmul.f32 -1.442695, %v1494_v47  ;;  %v1497_v53 = vadd.f32 %v1146_v34, %v891_v48  ;;  %v889_v54 = vadd.f32 %v860_v51, %v647_v45  ;;  %v631_v55 = vpop.f32.mrf.mxu0 }
  0xfb   : > { %v650_v62 = vadd.f32 %v631_v55, %v509_v56 }
  0xfc   : > { %1296 = vpow2.f32 %v1147_v52  ;;  %v1150_v58 = vmul.f32 -1.442695, %v1497_v53  ;;  %v1500_v59 = vadd.f32 %v1146_v34, %v889_v54  ;;  %v1256_v60 = vpop.f32.mrf.mxu0 }
  0xfd   : > { %v1267_v63 = vpop.f32.mrf.mxu1  ;;  %v653_v5 = vadd.f32 %v1256_v60, %v520_v61 }
  0xfe   : > { %1298 = vpow2.f32 %v1150_v58  ;;  %v1148_v0 = vmul.f32 -1.442695, %v1500_v59  ;;  %v634_v1 = vpop.f32.mrf.mxu0  ;;  %v894_v3 = vadd.f32 %v1267_v63, %v652_v57 }
  0xff   : > { %v873_v6 = vpop.f32.mrf.mxu1  ;;  %v651_v9 = vadd.f32 %v634_v1, %v512_v2 }
 0x100   : > { %1300 = vpow2.f32 %v1148_v0  ;;  %v909_v7 = vadd.f32 %v1146_v34, %v894_v3  ;;  %v892_v8 = vadd.f32 %v873_v6, %v650_v62 }
 0x101   : > { %v1268_v10 = vpop.f32.mrf.mxu1 }
 0x102   : > { %v1153_v11 = vmul.f32 -1.442695, %v909_v7  ;;  %v907_v12 = vadd.f32 %v1146_v34, %v892_v8  ;;  %v895_v13 = vadd.f32 %v1268_v10, %v653_v5 }
 0x103   : > { %v876_v14 = vpop.f32.mrf.mxu1 }
 0x104   : > { %1302 = vpow2.f32 %v1153_v11  ;;  %v1151_v15 = vmul.f32 -1.442695, %v907_v12  ;;  %v910_v16 = vadd.f32 %v1146_v34, %v895_v13  ;;  %v893_v17 = vadd.f32 %v876_v14, %v651_v9 }
 0x106   : > { %1304 = vpow2.f32 %v1151_v15  ;;  %v1154_v19 = vmul.f32 -1.442695, %v910_v16  ;;  %v908_v20 = vadd.f32 %v1146_v34, %v893_v17 }
 0x107   : > { %v1295_v18 = vpop.eup %1294 }
 0x108   : > { %v937_v21 = vadd.f32 1.0, %v1295_v18  ;;  %1306 = vpow2.f32 %v1154_v19  ;;  %v1152_v23 = vmul.f32 -1.442695, %v908_v20 }
 0x109   : > { %v1297_v22 = vpop.eup %1296 }
 0x10a   : > { %v935_v24 = vadd.f32 1.0, %v1297_v22  ;;  %1308 = vpow2.f32 %v1152_v23 }
 0x10b   : > { %v1299_v25 = vpop.eup %1298  ;;  %1310 = vrcp.f32 %v937_v21 }
 0x10c   : > { %v938_v26 = vadd.f32 1.0, %v1299_v25  ;;  %1312 = vrcp.f32 %v935_v24 }
 0x10d   : > { %v1301_v36 = vpop.eup %1300 }
 0x10e   : > { %1314 = vrcp.f32 %v938_v26  ;;  %v936_v27 = vadd.f32 1.0, %v1301_v36 }
 0x110   : > { %1316 = vrcp.f32 %v936_v27 }
 0x111   : > { %v1303_v28 = vpop.eup %1302 }
 0x112   : > { %v941_v29 = vadd.f32 1.0, %v1303_v28 }
 0x113   : > { %v1305_v30 = vpop.eup %1304 }
 0x114   : > { %v939_v31 = vadd.f32 1.0, %v1305_v30  ;;  %1318 = vrcp.f32 %v941_v29 }
 0x115   : > { %v1307_v32 = vpop.eup %1306 }
 0x116   : > { %v942_v33 = vadd.f32 1.0, %v1307_v32  ;;  %1320 = vrcp.f32 %v939_v31 }
 0x117   : > { %v1309_v34 = vpop.eup %1308 }
 0x118   : > { %v1311_v35 = vpop.eup %1310  ;;  %1322 = vrcp.f32 %v942_v33  ;;  %v940_v37 = vadd.f32 1.0, %v1309_v34 }
 0x119   : > { %v1313_v4 = vpop.eup %1312  ;;  %v961_v39 = vmul.f32 %v1311_v35, %v1491_v41 }
 0x11a   : > { %1324 = vrcp.f32 %v940_v37  ;;  %v959_v43 = vmul.f32 %v1313_v4, %v1494_v47 }
 0x11b   : > { %v1315_v38 = vpop.eup %1314 }
 0x11c   : > { %v962_v40 = vmul.f32 %v1315_v38, %v1497_v53 }
 0x11d   : > { %v1317_v42 = vpop.eup %1316 }
 0x11e   : > { %v1182_v44 = vpack.c.bf16 %v962_v40, %v961_v39  ;;  %v960_v45 = vmul.f32 %v1317_v42, %v1500_v59 }
 0x120   : > { %1194 = vst [vmem:[%s170_s14 + $0x8] sm:$0xff] %v1182_v44   ;;  %v1177_v46 = vpack.c.bf16 %v960_v45, %v959_v43 }
 0x121   : > { %v1319_v48 = vpop.eup %1318 }
 0x122   : > { %1178 = vst [vmem:[%s170_s14] sm:$0xff] %v1177_v46   ;;  %v965_v51 = vmul.f32 %v1319_v48, %v909_v7 }
 0x123   : > { %v1321_v49 = vpop.eup %1320 }
 0x124   : > { %v963_v53 = vmul.f32 %v1321_v49, %v907_v12 }
 0x125   : > { %v1323_v50 = vpop.eup %1322 }
 0x126   : > { %v966_v41 = vmul.f32 %v1323_v50, %v910_v16 }
 0x127   : > { %v1325_v52 = vpop.eup %1324 }
 0x128   : > { %v1192_v54 = vpack.c.bf16 %v966_v41, %v965_v51  ;;  %v964_v55 = vmul.f32 %v1325_v52, %v908_v20 }
 0x12a   : > { %1196 = vst [vmem:[%s170_s14 + $0x18] sm:$0xff] %v1192_v54   ;;  %v1187_v56 = vpack.c.bf16 %v964_v55, %v963_v53 }
 0x12c   : > { %1195 = vst [vmem:[%s170_s14 + $0x10] sm:$0xff] %v1187_v56  }
 0x12d PF: > { %s13_s12 = sadd.s32 1, %s1332_s12  }
 0x12e   : > { %p10_p4 = scmp.ge.s32.totalorder %s13_s12, 4  }
 0x130   :  { %12 = sbr.rel (!%p10_p4) target bundleno = 1 (0x1), region = 66 }

// kernel: _lambda_.8
= control target key start
LH: loop header
LB: loop body
LE: loop exit
PB: predicated region body
PF: predicated region fallthrough
CT: control target
= control target key end

     0   :  { %s2239_s12 = smov 0   ;;  %s2597_s0 = inlined_call_operand.vmem [shape: bf16[2,5,5,64], index: 0, kind: input, shape index: {}]   ;;  %s2598_s1 = inlined_call_operand.vmem [shape: bf16[4,64,128], index: 1, kind: input, shape index: {}]   ;;  %s2599_s2 = inlined_call_operand.vmem [shape: f32[1,128], index: 2, kind: input, shape index: {}]   ;;  %s2600_s3 = inlined_call_operand.vmem [shape: bf16[2,16,128], index: 3, kind: output, shape index: {}]  }
   0x1 LB: > { %s1617_s13 = sadd.s32 4294967295, %s2215_s12   ;;  %p1621_p0 = scmp.ge.s32.totalorder %s2215_s12, 1  ;;  %s2215_s12 = sphi %s2239_s12, %s13_s12  }
   0x2   : > { %p137_p1 = scmp.lt.s32.totalorder %s2215_s12, 3 }
   0x4   : > { %p138_p2 = pnand %p1621_p0, %p137_p1 }
   0x5   : > { %p161_p3 = scmp.lt.s32.totalorder (!%p138_p2), %s1617_s13, 1 }
   0x6   : > { %141 = sbr.rel (%p138_p2) target bundleno = 378 (0x17a), region = 32 }
   0xb   : > { %v2121_v0 = vld [vmem:[%s2598_s1 + $0x38] sm:$0xff]   ;;  %v2217_v1 = vmov 0.0   ;;  %v2123_v3 = vld [vmem:[%s2598_s1 + $0x30] sm:$0xff]   ;;  %vm2218_vm0 = vmmov 0   ;;  %s2602_s13 = smov (!%p161_p3, %s1617_s13), 1  ;;  %v2125_v5 = vld [vmem:[%s2598_s1 + $0x28] sm:$0xff]  }
   0xc   : > { %1918 = vmatprep.subr.bf16.mxu0 %v2217_v1  ;;  %1930 = vmatprep.subr.bf16.mxu1 %v2217_v1  ;;  %v2122_v2 = vld [vmem:[%s2598_s1 + $0x18] sm:$0xff]   ;;  %v2124_v4 = vld [vmem:[%s2598_s1 + $0x10] sm:$0xff]   ;;  %s2110_s24 = smul.u32 20, %s2602_s13  ;;  %v2126_v6 = vld [vmem:[%s2598_s1 + $0x8] sm:$0xff]   ;;  %vm225_vm1 = vcmask 523264   ;;  %s1835_s26 = sshll.u32 %s2602_s13, 3 }
   0xd   : > { %1919 = vmatpush3.bf16.msra.mxu0 %v2121_v0  ;;  %1926 = vmatprep.mubr.msk.bf16.mxu0 %vm2218_vm0, %v2217_v1  ;;  %v2127_v7 = vld [vmem:[%s2598_s1 + $0x20] sm:$0xff]   ;;  %v2130_v13 = vld [vmem:[%s2598_s1 + $0x58] sm:$0xff]   ;;  %v2132_v17 = vld [vmem:[%s2598_s1 + $0x50] sm:$0xff]   ;;  %s2586_s30 = scalar_lea.vmem %s2600_s3, %s1835_s26 }
   0xe   : > { %1931 = vmatpush3.bf16.msra.mxu1 %v2122_v2  ;;  %1920 = vmatprep.subr.bf16.mxu0 %v2217_v1  ;;  %s2281_s29 = scalar_lea.vmem %s2597_s0, %s2110_s24  ;;  %v2128_v9 = vld [vmem:[%s2598_s1] sm:$0xff]   ;;  %v2131_v14 = vld [vmem:[%s2598_s1 + $0x78] sm:$0xff]   ;;  %v2133_v18 = vld [vmem:[%s2598_s1 + $0x70] sm:$0xff]  }
   0xf   : > { %1932 = vmatprep.subr.bf16.mxu1 %v2217_v1  ;;  %1938 = vmatprep.mubr.msk.bf16.mxu1 %vm2218_vm0, %v2217_v1  ;;  %v2129_v8 = vld [vmem:[%s2281_s29] ss:$0 sps:$4 sm:$0x77]   ;;  %v2138_v19 = vld [vmem:[%s2281_s29 + $0x4] ss:$0 sps:$4 sm:$0x77]  }
  0x10   : > { %v195_v10 = vshrl.u32 %v2129_v8, 16  ;;  %v197_v11 = vshll.u32 %v2129_v8, 16  ;;  %v172_v16 = vld [vmem:[%s2281_s29] sm:$0x3]  ;;  %v2134_v20 = vld [vmem:[%s2598_s1 + $0x48] sm:$0xff]   ;;  %v431_v21 = vshll.u32 %v2138_v19, 16 }
  0x11   : > { %1921 = vmatpush3.bf16.msra.mxu0 %v2123_v3  ;;  %v2135_v22 = vld [vmem:[%s2598_s1 + $0x68] sm:$0xff]   ;;  %v2136_v23 = vld [vmem:[%s2598_s1 + $0x40] sm:$0xff]   ;;  %v429_v24 = vshrl.u32 %v2138_v19, 16  ;;  %v2139_v29 = vld [vmem:[%s2598_s1 + $0x38] sm:$0xff]  }
  0x12   : > { %1933 = vmatpush3.bf16.msra.mxu1 %v2124_v4  ;;  %1922 = vmatprep.subr.bf16.mxu0 %v2217_v1  ;;  %v199_v12 = vrot.slane %v197_v11, 1  ;;  %v433_v25 = vrot.slane %v431_v21, 1  ;;  %v2137_v26 = vld [vmem:[%s2598_s1 + $0x60] sm:$0xff]   ;;  %v2140_v31 = vld [vmem:[%s2598_s1 + $0x18] sm:$0xff]   ;;  %v2141_v32 = vld [vmem:[%s2598_s1 + $0x30] sm:$0xff]  }
  0x13   : > { %1934 = vmatprep.subr.bf16.mxu1 %v2217_v1  ;;  %v1644_v27 = vld [vmem:[%s2281_s29 + $0x4] sm:$0x3]  ;;  %v2142_v33 = vld [vmem:[%s2598_s1 + $0x10] sm:$0xff]   ;;  %v2143_v35 = vld [vmem:[%s2598_s1 + $0x28] sm:$0xff]  }
  0x14   : > { %v200_v15 = vor.u32 %v199_v12, %v195_v10  ;;  %v434_v28 = vor.u32 %v433_v25, %v429_v24  ;;  %v2147_v30 = vld [vmem:[%s2281_s29 + $0x4] ss:$0 sps:$4 sm:$0x77]   ;;  %v2144_v36 = vld [vmem:[%s2598_s1 + $0x8] sm:$0xff]   ;;  %v2148_v43 = vld [vmem:[%s2598_s1 + $0x58] sm:$0xff]  }
  0x15   : > { %1923 = vmatpush3.bf16.msra.mxu0 %v2125_v5  ;;  %v544_v34 = vshll.u32 %v2147_v30, 16  ;;  %v542_v37 = vshrl.u32 %v2147_v30, 16  ;;  %v2145_v39 = vld [vmem:[%s2598_s1 + $0x20] sm:$0xff]   ;;  %v2149_v44 = vld [vmem:[%s2598_s1 + $0x78] sm:$0xff]   ;;  %v2150_v46 = vld [vmem:[%s2598_s1 + $0x50] sm:$0xff]  }
  0x16   : > { %1935 = vmatpush3.bf16.msra.mxu1 %v2126_v6  ;;  %1924 = vmatprep.subr.bf16.mxu0 %v2217_v1  ;;  %v2146_v40 = vld [vmem:[%s2598_s1] sm:$0xff]   ;;  %v2156_v45 = vld [vmem:[%s2281_s29 + $0x8] ss:$0 sps:$4 sm:$0x77]   ;;  %v2151_v47 = vld [vmem:[%s2598_s1 + $0x70] sm:$0xff]  }
  0x17   : > { %1936 = vmatprep.subr.bf16.mxu1 %v2217_v1  ;;  %v546_v38 = vrot.slane %v544_v34, 1  ;;  %v1675_v42 = vld [vmem:[%s2281_s29 + $0x4] sm:$0x3]  ;;  %v2152_v48 = vld [vmem:[%s2598_s1 + $0x48] sm:$0xff]   ;;  %v775_v50 = vshll.u32 %v2156_v45, 16  ;;  %v773_v52 = vshrl.u32 %v2156_v45, 16 }
  0x18   : > { %v2153_v49 = vld [vmem:[%s2598_s1 + $0x68] sm:$0xff]   ;;  %v2154_v51 = vld [vmem:[%s2598_s1 + $0x40] sm:$0xff]   ;;  %v2157_v57 = vld [vmem:[%s2598_s1 + $0x38] sm:$0xff]  }
  0x19   : > { %1925 = vmatpush3.bf16.msra.mxu0 %v2127_v7  ;;  %v547_v41 = vor.u32 %v546_v38, %v542_v37  ;;  %v777_v53 = vrot.slane %v775_v50, 1  ;;  %v2155_v54 = vld [vmem:[%s2598_s1 + $0x60] sm:$0xff]   ;;  %v1696_v55 = vld [vmem:[%s2281_s29 + $0x8] sm:$0x3]  ;;  %v2158_v58 = vld [vmem:[%s2598_s1 + $0x18] sm:$0xff]  }
  0x1a   : > { %1937 = vmatpush3.bf16.msra.mxu1 %v2128_v9  ;;  %1942 = vmatprep.subr.bf16.mxu0 %v2217_v1  ;;  %v2165_v59 = vld [vmem:[%s2281_s29 + $0x8] ss:$0 sps:$4 sm:$0x77]   ;;  %v2159_v60 = vld [vmem:[%s2598_s1 + $0x30] sm:$0xff]   ;;  %v2163_v4 = vld [vmem:[%s2598_s1 + $0x20] sm:$0xff]  }
  0x1b   : > { %1954 = vmatprep.subr.bf16.mxu1 %v2217_v1  ;;  %v778_v56 = vor.u32 %v777_v53, %v773_v52  ;;  %v2160_v61 = vld [vmem:[%s2598_s1 + $0x10] sm:$0xff]   ;;  %v893_v62 = vshll.u32 %v2165_v59, 16  ;;  %v2161_v63 = vld [vmem:[%s2598_s1 + $0x28] sm:$0xff]   ;;  %v891_v2 = vshrl.u32 %v2165_v59, 16  ;;  %v2164_v5 = vld [vmem:[%s2598_s1] sm:$0xff]  }
  0x1c   : > { %1927 = vmatmul.mubr.msk.bf16.vlgmr.msra.gmra.mxu0 %vm225_vm1, %v200_v15  ;;  %v2162_v0 = vld [vmem:[%s2598_s1 + $0x8] sm:$0xff]   ;;  %v2166_v7 = vld [vmem:[%s2598_s1 + $0x58] sm:$0xff]   ;;  %v2168_v10 = vld [vmem:[%s2598_s1 + $0x50] sm:$0xff]  }
  0x1d   : > { %1939 = vmatmul.mubr.msk.bf16.vlgmr.msra.gmra.mxu1 %vm225_vm1, %v172_v16  ;;  %1943 = vmatpush3.bf16.msra.mxu0 %v2130_v13  ;;  %v895_v3 = vrot.slane %v893_v62, 1  ;;  %v1728_v8 = vld [vmem:[%s2281_s29 + $0x8] sm:$0x3]  ;;  %v2167_v9 = vld [vmem:[%s2598_s1 + $0x78] sm:$0xff]   ;;  %v2169_v12 = vld [vmem:[%s2598_s1 + $0x70] sm:$0xff]  }
  0x1e   : > { %1955 = vmatpush3.bf16.msra.mxu1 %v2131_v14  ;;  %1944 = vmatprep.subr.bf16.mxu0 %v2217_v1  ;;  %v2174_v11 = vld [vmem:[%s2281_s29 + $0xc] ss:$0 sps:$4 sm:$0x77]   ;;  %v2172_v16 = vld [vmem:[%s2598_s1 + $0x40] sm:$0xff]   ;;  %v2177_v25 = vld [vmem:[%s2598_s1 + $0x30] sm:$0xff]  }
  0x1f   : > { %1956 = vmatprep.subr.bf16.mxu1 %v2217_v1  ;;  %1950 = vmatprep.mubr.msk.bf16.mxu0 %vm2218_vm0, %v2217_v1  ;;  %v896_v6 = vor.u32 %v895_v3, %v891_v2  ;;  %v2170_v13 = vld [vmem:[%s2598_s1 + $0x48] sm:$0xff]   ;;  %v1124_v14 = vshll.u32 %v2174_v11, 16  ;;  %v2173_v19 = vld [vmem:[%s2598_s1 + $0x60] sm:$0xff]   ;;  %v2185_v37 = vld [vmem:[%s2598_s1 + $0x78] sm:$0xff]  }
  0x20   : > { %1962 = vmatprep.mubr.msk.bf16.mxu1 %vm2218_vm0, %v2217_v1  ;;  %v2171_v15 = vld [vmem:[%s2598_s1 + $0x68] sm:$0xff]   ;;  %v2186_v38 = vld [vmem:[%s2598_s1 + $0x50] sm:$0xff]  }
  0x21   : > { %1945 = vmatpush3.bf16.msra.mxu0 %v2132_v17  ;;  %v1122_v17 = vshrl.u32 %v2174_v11, 16  ;;  %v2183_v24 = vld [vmem:[%s2281_s29 + $0xc] ss:$0 sps:$4 sm:$0x77]  }
  0x22   : > { %1957 = vmatpush3.bf16.msra.mxu1 %v2133_v18  ;;  %1946 = vmatprep.subr.bf16.mxu0 %v2217_v1  ;;  %v1126_v18 = vrot.slane %v1124_v14, 1  ;;  %v1235_v30 = vshrl.u32 %v2183_v24, 16 }
  0x23   : > { %1958 = vmatprep.subr.bf16.mxu1 %v2217_v1 }
  0x24   : > { %v1127_v21 = vor.u32 %v1126_v18, %v1122_v17 }
  0x25   : > { %1947 = vmatpush3.bf16.msra.mxu0 %v2134_v20  ;;  %v1749_v20 = vld [vmem:[%s2281_s29 + $0xc] sm:$0x3] }
  0x26   : > { %1959 = vmatpush3.bf16.msra.mxu1 %v2135_v22  ;;  %1948 = vmatprep.subr.bf16.mxu0 %v2217_v1  ;;  %v2175_v22 = vld [vmem:[%s2598_s1 + $0x38] sm:$0xff]  }
  0x27   : > { %1960 = vmatprep.subr.bf16.mxu1 %v2217_v1 }
  0x29   : > { %1949 = vmatpush3.bf16.msra.mxu0 %v2136_v23  ;;  %v2176_v23 = vld [vmem:[%s2598_s1 + $0x18] sm:$0xff]  }
  0x2a   : > { %1961 = vmatpush3.bf16.msra.mxu1 %v2137_v26  ;;  %1966 = vmatprep.subr.bf16.mxu0 %v2217_v1  ;;  %v2178_v26 = vld [vmem:[%s2598_s1 + $0x10] sm:$0xff]  }
  0x2b   : > { %1978 = vmatprep.subr.bf16.mxu1 %v2217_v1 }
  0x2c   : > { %1951 = vmatmul.mubr.msk.bf16.vlgmr.msra.gmra.mxu0 %vm225_vm1, %v1644_v27  ;;  %v1237_v27 = vshll.u32 %v2183_v24, 16 }
  0x2d   : > { %1963 = vmatmul.mubr.msk.bf16.vlgmr.msra.gmra.mxu1 %vm225_vm1, %v434_v28  ;;  %1967 = vmatpush3.bf16.msra.mxu0 %v2139_v29  ;;  %v2179_v28 = vld [vmem:[%s2598_s1 + $0x28] sm:$0xff]  }
  0x2e   : > { %1979 = vmatpush3.bf16.msra.mxu1 %v2140_v31  ;;  %1968 = vmatprep.subr.bf16.mxu0 %v2217_v1  ;;  %v2180_v29 = vld [vmem:[%s2598_s1 + $0x8] sm:$0xff]   ;;  %v1239_v31 = vrot.slane %v1237_v27, 1 }
  0x2f   : > { %1980 = vmatprep.subr.bf16.mxu1 %v2217_v1  ;;  %1974 = vmatprep.mubr.msk.bf16.mxu0 %vm2218_vm0, %v2217_v1 }
  0x30   : > { %1986 = vmatprep.mubr.msk.bf16.mxu1 %vm2218_vm0, %v2217_v1  ;;  %v1240_v34 = vor.u32 %v1239_v31, %v1235_v30 }
  0x31   : > { %1969 = vmatpush3.bf16.msra.mxu0 %v2141_v32  ;;  %v2181_v32 = vld [vmem:[%s2598_s1 + $0x20] sm:$0xff]  }
  0x32   : > { %1981 = vmatpush3.bf16.msra.mxu1 %v2142_v33  ;;  %1970 = vmatprep.subr.bf16.mxu0 %v2217_v1  ;;  %v2182_v33 = vld [vmem:[%s2598_s1] sm:$0xff]  }
  0x33   : > { %1982 = vmatprep.subr.bf16.mxu1 %v2217_v1 }
  0x35   : > { %1971 = vmatpush3.bf16.msra.mxu0 %v2143_v35  ;;  %v2184_v35 = vld [vmem:[%s2598_s1 + $0x58] sm:$0xff]  }
  0x36   : > { %1983 = vmatpush3.bf16.msra.mxu1 %v2144_v36  ;;  %1972 = vmatprep.subr.bf16.mxu0 %v2217_v1  ;;  %v1780_v36 = vld [vmem:[%s2281_s29 + $0xc] sm:$0x3] }
  0x37   : > { %1984 = vmatprep.subr.bf16.mxu1 %v2217_v1 }
  0x39   : > { %1973 = vmatpush3.bf16.msra.mxu0 %v2145_v39  ;;  %v2192_v39 = vld [vmem:[%s2281_s29 + $0x10] ss:$0 sps:$4 sm:$0x77]  }
  0x3a   : > { %1985 = vmatpush3.bf16.msra.mxu1 %v2146_v40  ;;  %1990 = vmatprep.subr.bf16.mxu0 %v2217_v1  ;;  %v2187_v40 = vld [vmem:[%s2598_s1 + $0x70] sm:$0xff]   ;;  %v1466_v45 = vshrl.u32 %v2192_v39, 16 }
  0x3b   : > { %2002 = vmatprep.subr.bf16.mxu1 %v2217_v1 }
  0x3c   : > { %1975 = vmatmul.mubr.msk.bf16.vlgmr.msra.gmra.mxu0 %vm225_vm1, %v547_v41  ;;  %v2188_v41 = vld [vmem:[%s2598_s1 + $0x48] sm:$0xff]  }
  0x3d   : > { %1987 = vmatmul.mubr.msk.bf16.vlgmr.msra.gmra.mxu1 %vm225_vm1, %v1675_v42  ;;  %1991 = vmatpush3.bf16.msra.mxu0 %v2148_v43  ;;  %v1468_v42 = vshll.u32 %v2192_v39, 16  ;;  %v2189_v43 = vld [vmem:[%s2598_s1 + $0x68] sm:$0xff]  }
  0x3e   : > { %2003 = vmatpush3.bf16.msra.mxu1 %v2149_v44  ;;  %1992 = vmatprep.subr.bf16.mxu0 %v2217_v1  ;;  %v2190_v44 = vld [vmem:[%s2598_s1 + $0x40] sm:$0xff]  }
  0x3f   : > { %2004 = vmatprep.subr.bf16.mxu1 %v2217_v1  ;;  %1998 = vmatprep.mubr.msk.bf16.mxu0 %vm2218_vm0, %v2217_v1 }
  0x40   : > { %2010 = vmatprep.mubr.msk.bf16.mxu1 %vm2218_vm0, %v2217_v1 }
  0x41   : > { %1993 = vmatpush3.bf16.msra.mxu0 %v2150_v46  ;;  %v1470_v46 = vrot.slane %v1468_v42, 1 }
  0x42   : > { %2005 = vmatpush3.bf16.msra.mxu1 %v2151_v47  ;;  %1994 = vmatprep.subr.bf16.mxu0 %v2217_v1  ;;  %v2191_v47 = vld [vmem:[%s2598_s1 + $0x60] sm:$0xff]  }
  0x43   : > { %2006 = vmatprep.subr.bf16.mxu1 %v2217_v1 }
  0x45   : > { %1995 = vmatpush3.bf16.msra.mxu0 %v2152_v48  ;;  %v1801_v48 = vld [vmem:[%s2281_s29 + $0x10] sm:$0x3] }
  0x46   : > { %2007 = vmatpush3.bf16.msra.mxu1 %v2153_v49  ;;  %1996 = vmatprep.subr.bf16.mxu0 %v2217_v1  ;;  %v1471_v49 = vor.u32 %v1470_v46, %v1466_v45 }
  0x47   : > { %2008 = vmatprep.subr.bf16.mxu1 %v2217_v1 }
  0x49   : > { %1997 = vmatpush3.bf16.msra.mxu0 %v2154_v51 }
  0x4a   : > { %2009 = vmatpush3.bf16.msra.mxu1 %v2155_v54  ;;  %2014 = vmatprep.subr.bf16.mxu0 %v2217_v1 }
  0x4b   : > { %2026 = vmatprep.subr.bf16.mxu1 %v2217_v1 }
  0x4c   : > { %1999 = vmatmul.mubr.msk.bf16.vlgmr.msra.gmra.mxu0 %vm225_vm1, %v1696_v55 }
  0x4d   : > { %2011 = vmatmul.mubr.msk.bf16.vlgmr.msra.gmra.mxu1 %vm225_vm1, %v778_v56  ;;  %2015 = vmatpush3.bf16.msra.mxu0 %v2157_v57 }
  0x4e   : > { %2027 = vmatpush3.bf16.msra.mxu1 %v2158_v58  ;;  %2016 = vmatprep.subr.bf16.mxu0 %v2217_v1 }
  0x4f   : > { %2028 = vmatprep.subr.bf16.mxu1 %v2217_v1  ;;  %2022 = vmatprep.mubr.msk.bf16.mxu0 %vm2218_vm0, %v2217_v1 }
  0x50   : > { %2034 = vmatprep.mubr.msk.bf16.mxu1 %vm2218_vm0, %v2217_v1 }
  0x51   : > { %2017 = vmatpush3.bf16.msra.mxu0 %v2159_v60 }
  0x52   : > { %2029 = vmatpush3.bf16.msra.mxu1 %v2160_v61  ;;  %2018 = vmatprep.subr.bf16.mxu0 %v2217_v1  ;;  %v2578_v61 = vld [vmem:[%s2599_s2] ss:$0 sm:$0xff] }
  0x53   : > { %2030 = vmatprep.subr.bf16.mxu1 %v2217_v1 }
  0x55   : > { %2019 = vmatpush3.bf16.msra.mxu0 %v2161_v63 }
  0x56   : > { %2031 = vmatpush3.bf16.msra.mxu1 %v2162_v0  ;;  %2020 = vmatprep.subr.bf16.mxu0 %v2217_v1 }
  0x57   : > { %2032 = vmatprep.subr.bf16.mxu1 %v2217_v1 }
  0x59   : > { %2021 = vmatpush3.bf16.msra.mxu0 %v2163_v4 }
  0x5a   : > { %2033 = vmatpush3.bf16.msra.mxu1 %v2164_v5  ;;  %2038 = vmatprep.subr.bf16.mxu0 %v2217_v1 }
  0x5b   : > { %2050 = vmatprep.subr.bf16.mxu1 %v2217_v1 }
  0x5c   : > { %2023 = vmatmul.mubr.msk.bf16.vlgmr.msra.gmra.mxu0 %vm225_vm1, %v896_v6 }
  0x5d   : > { %2035 = vmatmul.mubr.msk.bf16.vlgmr.msra.gmra.mxu1 %vm225_vm1, %v1728_v8  ;;  %2039 = vmatpush3.bf16.msra.mxu0 %v2166_v7 }
  0x5e   : > { %2051 = vmatpush3.bf16.msra.mxu1 %v2167_v9  ;;  %2040 = vmatprep.subr.bf16.mxu0 %v2217_v1 }
  0x5f   : > { %2052 = vmatprep.subr.bf16.mxu1 %v2217_v1  ;;  %2046 = vmatprep.mubr.msk.bf16.mxu0 %vm2218_vm0, %v2217_v1 }
  0x60   : > { %2058 = vmatprep.mubr.msk.bf16.mxu1 %vm2218_vm0, %v2217_v1 }
  0x61   : > { %2041 = vmatpush3.bf16.msra.mxu0 %v2168_v10 }
  0x62   : > { %2053 = vmatpush3.bf16.msra.mxu1 %v2169_v12  ;;  %2042 = vmatprep.subr.bf16.mxu0 %v2217_v1 }
  0x63   : > { %2054 = vmatprep.subr.bf16.mxu1 %v2217_v1 }
  0x65   : > { %2043 = vmatpush3.bf16.msra.mxu0 %v2170_v13 }
  0x66   : > { %2055 = vmatpush3.bf16.msra.mxu1 %v2171_v15  ;;  %2044 = vmatprep.subr.bf16.mxu0 %v2217_v1 }
  0x67   : > { %2056 = vmatprep.subr.bf16.mxu1 %v2217_v1 }
  0x69   : > { %2045 = vmatpush3.bf16.msra.mxu0 %v2172_v16 }
  0x6a   : > { %2057 = vmatpush3.bf16.msra.mxu1 %v2173_v19  ;;  %2062 = vmatprep.subr.bf16.mxu0 %v2217_v1 }
  0x6b   : > { %2074 = vmatprep.subr.bf16.mxu1 %v2217_v1 }
  0x6c   : > { %2047 = vmatmul.mubr.msk.bf16.vlgmr.msra.gmra.mxu0 %vm225_vm1, %v1749_v20 }
  0x6d   : > { %2059 = vmatmul.mubr.msk.bf16.vlgmr.msra.gmra.mxu1 %vm225_vm1, %v1127_v21  ;;  %2063 = vmatpush3.bf16.msra.mxu0 %v2175_v22 }
  0x6e   : > { %2075 = vmatpush3.bf16.msra.mxu1 %v2176_v23  ;;  %2064 = vmatprep.subr.bf16.mxu0 %v2217_v1 }
  0x6f   : > { %2076 = vmatprep.subr.bf16.mxu1 %v2217_v1  ;;  %2070 = vmatprep.mubr.msk.bf16.mxu0 %vm2218_vm0, %v2217_v1 }
  0x70   : > { %2082 = vmatprep.mubr.msk.bf16.mxu1 %vm2218_vm0, %v2217_v1 }
  0x71   : > { %2065 = vmatpush3.bf16.msra.mxu0 %v2177_v25 }
  0x72   : > { %2077 = vmatpush3.bf16.msra.mxu1 %v2178_v26  ;;  %2066 = vmatprep.subr.bf16.mxu0 %v2217_v1 }
  0x73   : > { %2078 = vmatprep.subr.bf16.mxu1 %v2217_v1 }
  0x75   : > { %2067 = vmatpush3.bf16.msra.mxu0 %v2179_v28 }
  0x76   : > { %2079 = vmatpush3.bf16.msra.mxu1 %v2180_v29  ;;  %2068 = vmatprep.subr.bf16.mxu0 %v2217_v1 }
  0x77   : > { %2080 = vmatprep.subr.bf16.mxu1 %v2217_v1 }
  0x79   : > { %2069 = vmatpush3.bf16.msra.mxu0 %v2181_v32 }
  0x7a   : > { %2081 = vmatpush3.bf16.msra.mxu1 %v2182_v33  ;;  %2086 = vmatprep.subr.bf16.mxu0 %v2217_v1 }
  0x7b   : > { %2098 = vmatprep.subr.bf16.mxu1 %v2217_v1 }
  0x7c   : > { %2071 = vmatmul.mubr.msk.bf16.vlgmr.msra.gmra.mxu0 %vm225_vm1, %v1240_v34 }
  0x7d   : > { %2083 = vmatmul.mubr.msk.bf16.vlgmr.msra.gmra.mxu1 %vm225_vm1, %v1780_v36  ;;  %2087 = vmatpush3.bf16.msra.mxu0 %v2184_v35 }
  0x7e   : > { %2099 = vmatpush3.bf16.msra.mxu1 %v2185_v37  ;;  %2088 = vmatprep.subr.bf16.mxu0 %v2217_v1 }
  0x7f   : > { %2100 = vmatprep.subr.bf16.mxu1 %v2217_v1  ;;  %2094 = vmatprep.mubr.msk.bf16.mxu0 %vm2218_vm0, %v2217_v1 }
  0x80   : > { %2106 = vmatprep.mubr.msk.bf16.mxu1 %vm2218_vm0, %v2217_v1 }
  0x81   : > { %2089 = vmatpush3.bf16.msra.mxu0 %v2186_v38 }
  0x82   : > { %2101 = vmatpush3.bf16.msra.mxu1 %v2187_v40  ;;  %2090 = vmatprep.subr.bf16.mxu0 %v2217_v1 }
  0x83   : > { %2102 = vmatprep.subr.bf16.mxu1 %v2217_v1 }
  0x85   : > { %2091 = vmatpush3.bf16.msra.mxu0 %v2188_v41 }
  0x86   : > { %2103 = vmatpush3.bf16.msra.mxu1 %v2189_v43  ;;  %2092 = vmatprep.subr.bf16.mxu0 %v2217_v1 }
  0x87   : > { %2104 = vmatprep.subr.bf16.mxu1 %v2217_v1 }
  0x89   : > { %2093 = vmatpush3.bf16.msra.mxu0 %v2190_v44 }
  0x8a   : > { %2105 = vmatpush3.bf16.msra.mxu1 %v2191_v47 }
  0x8c   : > { %2095 = vmatmul.mubr.msk.bf16.vlgmr.msra.gmra.mxu0 %vm225_vm1, %v1801_v48 }
  0x8d   : > { %2107 = vmatmul.mubr.msk.bf16.vlgmr.msra.gmra.mxu1 %vm225_vm1, %v1471_v49 }
  0xdc   : > { %v263_v50 = vpop.f32.mrf.mxu0 }
  0xdd   : > { %v330_v51 = vpop.f32.mrf.mxu1 }
  0xde   : > { %v1928_v52 = vpop.f32.mrf.mxu0  ;;  %v331_v58 = vadd.f32 %v330_v51, %v263_v50 }
  0xdf   : > { %v1940_v53 = vpop.f32.mrf.mxu1 }
  0xe0   : > { %v266_v54 = vpop.f32.mrf.mxu0 }
  0xe1   : > { %v333_v55 = vpop.f32.mrf.mxu1 }
  0xe2   : > { %v1929_v56 = vpop.f32.mrf.mxu0 }
  0xe3   : > { %v1941_v57 = vpop.f32.mrf.mxu1 }
  0xec   : > { %v408_v59 = vpop.f32.mrf.mxu0 }
  0xed   : > { %v414_v60 = vadd.f32 %v408_v59, %v331_v58  ;;  %v496_v1 = vpop.f32.mrf.mxu1 }
  0xee   : > { %v1952_v62 = vpop.f32.mrf.mxu0 }
  0xef   : > { %v502_v63 = vadd.f32 %v496_v1, %v414_v60  ;;  %v1964_v0 = vpop.f32.mrf.mxu1 }
  0xf0   : > { %v411_v2 = vpop.f32.mrf.mxu0 }
  0xf1   : > { %v510_v3 = vadd.f32 %v2578_v61, %v502_v63  ;;  %v499_v4 = vpop.f32.mrf.mxu1 }
  0xf2   : > { %v1953_v5 = vpop.f32.mrf.mxu0 }
  0xf3   : > { %v1674_v6 = vmul.f32 -1.442695, %v510_v3  ;;  %v1965_v7 = vpop.f32.mrf.mxu1 }
  0xf5   : > { %2193 = vpow2.f32 %v1674_v6 }
  0xfc   : > { %v609_v8 = vpop.f32.mrf.mxu0 }
  0xfd   : > { %v676_v9 = vpop.f32.mrf.mxu1 }
  0xfe   : > { %v1976_v10 = vpop.f32.mrf.mxu0  ;;  %v677_v18 = vadd.f32 %v676_v9, %v609_v8 }
  0xff   : > { %v1988_v11 = vpop.f32.mrf.mxu1 }
 0x100   : > { %v612_v12 = vpop.f32.mrf.mxu0 }
 0x101   : > { %v679_v13 = vpop.f32.mrf.mxu1 }
 0x102   : > { %v2194_v14 = vpop.eup %2193  ;;  %v1977_v15 = vpop.f32.mrf.mxu0 }
 0x103   : > { %v514_v16 = vadd.f32 1.0, %v2194_v14  ;;  %v1989_v17 = vpop.f32.mrf.mxu1 }
 0x105   : > { %2195 = vrcp.f32 %v514_v16 }
 0x10c   : > { %v753_v19 = vpop.f32.mrf.mxu0 }
 0x10d   : > { %v759_v20 = vadd.f32 %v753_v19, %v677_v18  ;;  %v840_v21 = vpop.f32.mrf.mxu1 }
 0x10e   : > { %v2000_v22 = vpop.f32.mrf.mxu0 }
 0x10f   : > { %v846_v23 = vadd.f32 %v840_v21, %v759_v20  ;;  %v2012_v24 = vpop.f32.mrf.mxu1 }
 0x110   : > { %v756_v25 = vpop.f32.mrf.mxu0 }
 0x111   : > { %v854_v26 = vadd.f32 %v2578_v61, %v846_v23  ;;  %v843_v27 = vpop.f32.mrf.mxu1 }
 0x112   : > { %v2196_v28 = vpop.eup %2195  ;;  %v2001_v29 = vpop.f32.mrf.mxu0 }
 0x113   : > { %v517_v30 = vmul.f32 %v2196_v28, %v510_v3  ;;  %v1726_v31 = vmul.f32 -1.442695, %v854_v26  ;;  %v2013_v32 = vpop.f32.mrf.mxu1 }
 0x115   : > { %v518_v33 = vpack.c.bf16 %v517_v30, %v517_v30  ;;  %2197 = vpow2.f32 %v1726_v31 }
 0x117   : > { %519 = vst [vmem:[%s2586_s30] sm:$0x3] %v518_v33 }
 0x11c   : > { %v958_v34 = vpop.f32.mrf.mxu0 }
 0x11d   : > { %v1025_v35 = vpop.f32.mrf.mxu1 }
 0x11e   : > { %v2024_v36 = vpop.f32.mrf.mxu0  ;;  %v1026_v44 = vadd.f32 %v1025_v35, %v958_v34 }
 0x11f   : > { %v2036_v37 = vpop.f32.mrf.mxu1 }
 0x120   : > { %v961_v38 = vpop.f32.mrf.mxu0 }
 0x121   : > { %v1028_v39 = vpop.f32.mrf.mxu1 }
 0x122   : > { %v2198_v40 = vpop.eup %2197  ;;  %v2025_v41 = vpop.f32.mrf.mxu0 }
 0x123   : > { %v858_v42 = vadd.f32 1.0, %v2198_v40  ;;  %v2037_v43 = vpop.f32.mrf.mxu1 }
 0x125   : > { %2199 = vrcp.f32 %v858_v42 }
 0x12c   : > { %v1102_v45 = vpop.f32.mrf.mxu0 }
 0x12d   : > { %v1108_v46 = vadd.f32 %v1102_v45, %v1026_v44  ;;  %v1189_v47 = vpop.f32.mrf.mxu1 }
 0x12e   : > { %v2048_v48 = vpop.f32.mrf.mxu0 }
 0x12f   : > { %v1195_v49 = vadd.f32 %v1189_v47, %v1108_v46  ;;  %v2060_v50 = vpop.f32.mrf.mxu1 }
 0x130   : > { %v1105_v51 = vpop.f32.mrf.mxu0 }
 0x131   : > { %v1203_v52 = vadd.f32 %v2578_v61, %v1195_v49  ;;  %v1192_v53 = vpop.f32.mrf.mxu1 }
 0x132   : > { %v2200_v54 = vpop.eup %2199  ;;  %v2049_v55 = vpop.f32.mrf.mxu0 }
 0x133   : > { %v861_v56 = vmul.f32 %v2200_v54, %v854_v26  ;;  %v1779_v57 = vmul.f32 -1.442695, %v1203_v52  ;;  %v2061_v58 = vpop.f32.mrf.mxu1 }
 0x135   : > { %v1836_v59 = vpack.c.bf16 %v861_v56, %v861_v56  ;;  %2201 = vpow2.f32 %v1779_v57 }
 0x137   : > { %v866_v60 = vrot.slane %v1836_v59, 6 }
 0x139   : > { %868 = vst [vmem:[%s2586_s30] sm:$0xc] %v866_v60 }
 0x13c   : > { %v1302_v1 = vpop.f32.mrf.mxu0 }
 0x13d   : > { %v1369_v62 = vpop.f32.mrf.mxu1 }
 0x13e   : > { %v2072_v63 = vpop.f32.mrf.mxu0  ;;  %v1370_v8 = vadd.f32 %v1369_v62, %v1302_v1 }
 0x13f   : > { %v2084_v0 = vpop.f32.mrf.mxu1 }
 0x140   : > { %v1305_v2 = vpop.f32.mrf.mxu0 }
 0x141   : > { %v1372_v3 = vpop.f32.mrf.mxu1 }
 0x142   : > { %v2202_v4 = vpop.eup %2201  ;;  %v2073_v5 = vpop.f32.mrf.mxu0 }
 0x143   : > { %v1207_v6 = vadd.f32 1.0, %v2202_v4  ;;  %v2085_v7 = vpop.f32.mrf.mxu1 }
 0x145   : > { %2203 = vrcp.f32 %v1207_v6 }
 0x14c   : > { %v1446_v9 = vpop.f32.mrf.mxu0 }
 0x14d   : > { %v1452_v10 = vadd.f32 %v1446_v9, %v1370_v8  ;;  %v1533_v11 = vpop.f32.mrf.mxu1 }
 0x14e   : > { %v2096_v12 = vpop.f32.mrf.mxu0 }
 0x14f   : > { %v1539_v13 = vadd.f32 %v1533_v11, %v1452_v10  ;;  %v2108_v14 = vpop.f32.mrf.mxu1 }
 0x150   : > { %v1449_v15 = vpop.f32.mrf.mxu0 }
 0x151   : > { %v1547_v16 = vadd.f32 %v2578_v61, %v1539_v13  ;;  %v1536_v17 = vpop.f32.mrf.mxu1 }
 0x152   : > { %v2204_v18 = vpop.eup %2203  ;;  %v2097_v19 = vpop.f32.mrf.mxu0 }
 0x153   : > { %v1210_v20 = vmul.f32 %v2204_v18, %v1203_v52  ;;  %v1831_v21 = vmul.f32 -1.442695, %v1547_v16  ;;  %v2109_v22 = vpop.f32.mrf.mxu1 }
 0x155   : > { %v1211_v23 = vpack.c.bf16 %v1210_v20, %v1210_v20  ;;  %2205 = vpow2.f32 %v1831_v21 }
 0x157   : > { %1212 = vst [vmem:[%s2586_s30 + $0x4] sm:$0x3] %v1211_v23 }
 0x162   : > { %v2206_v24 = vpop.eup %2205 }
 0x163   : > { %v1551_v25 = vadd.f32 1.0, %v2206_v24 }
 0x165   : > { %2207 = vrcp.f32 %v1551_v25 }
 0x172   : > { %v2208_v26 = vpop.eup %2207 }
 0x173   : > { %v1554_v27 = vmul.f32 %v2208_v26, %v1547_v16 }
 0x175   : > { %v1837_v28 = vpack.c.bf16 %v1554_v27, %v1554_v27 }
 0x177   : > { %v1559_v29 = vrot.slane %v1837_v28, 6 }
 0x179   : > { %1561 = vst [vmem:[%s2586_s30 + $0x4] sm:$0xc] %v1559_v29 }
 0x17a PF: > { %s13_s12 = sadd.s32 1, %s2215_s12  }
 0x17b   : > { %p10_p4 = scmp.ge.s32.totalorder %s13_s12, 4  }
 0x17d   :  { %12 = sbr.rel (!%p10_p4) target bundleno = 1 (0x1), region = 69 }

// kernel: _lambda_.11
= control target key start
LH: loop header
LB: loop body
LE: loop exit
PB: predicated region body
PF: predicated region fallthrough
CT: control target
= control target key end

     0   :  { %s429_s12 = smov 0   ;;  %s465_s0 = inlined_call_operand.vmem [shape: bf16[2,4,64], index: 0, kind: input, shape index: {}]   ;;  %s466_s1 = inlined_call_operand.vmem [shape: bf16[64,128], index: 1, kind: input, shape index: {}]   ;;  %s467_s2 = inlined_call_operand.vmem [shape: f32[1,128], index: 2, kind: input, shape index: {}]   ;;  %s468_s3 = inlined_call_operand.vmem [shape: f32[2,4,128], index: 3, kind: output, shape index: {}]  }
   0x1 LB: > { %s343_s13 = sadd.s32 4294967295, %s403_s12   ;;  %p347_p0 = scmp.ge.s32.totalorder %s403_s12, 1  ;;  %s403_s12 = sphi %s429_s12, %s13_s12  }
   0x2   : > { %p136_p1 = scmp.lt.s32.totalorder %s403_s12, 3 }
   0x4   : > { %p137_p2 = pnand %p347_p0, %p136_p1 }
   0x5   : > { %p158_p3 = scmp.lt.s32.totalorder (!%p137_p2), %s343_s13, 1 }
   0x6   : > { %140 = sbr.rel (%p137_p2) target bundleno = 265 (0x109), region = 32 }
   0xb   : > { %v389_v0 = vld [vmem:[%s466_s1 + $0x18] sm:$0xff]   ;;  %v405_v1 = vmov 0.0   ;;  %v390_v2 = vld [vmem:[%s466_s1 + $0x10] sm:$0xff]   ;;  %vm406_vm0 = vmmov 0   ;;  %s470_s13 = smov (!%p158_p3, %s343_s13), 1  ;;  %v391_v3 = vld [vmem:[%s466_s1 + $0x8] sm:$0xff]   ;;  %v257_v13 = vlaneseq }
   0xc   : > { %365 = vmatprep.subr.bf16.mxu0 %v405_v1  ;;  %373 = vmatprep.mubr.msk.bf16.mxu0 %vm406_vm0, %v405_v1  ;;  %s348_s20 = sshll.u32 %s470_s13, 1  ;;  %v392_v4 = vld [vmem:[%s466_s1] sm:$0xff]   ;;  %vm207_vm1 = vcmask 523264   ;;  %v407_v24 = vmov 59.0   ;;  %v408_v26 = vmov 119.0   ;;  %s349_s28 = sshll.u32 %s470_s13, 2 }
   0xd   : > { %366 = vmatpush3.bf16.msra.mxu0 %v389_v0  ;;  %s161_s25 = scalar_lea.vmem %s465_s0, %s348_s20  ;;  %v350_v6 = vld [vmem:[%s467_s2] ss:$0 sm:$0xff]  ;;  %v260_v14 = vshrl.u32 %v257_v13, 7  ;;  %v258_v18 = vand.u32 127, %v257_v13  ;;  %s165_s4 = scalar_lea.vmem %s468_s3, %s349_s28 }
   0xe   : > { %367 = vmatprep.subr.bf16.mxu0 %v405_v1  ;;  %v167_v5 = vld [vmem:[%s161_s25] sm:$0x3] }
   0xf   : > { %v263_v15 = vcvt.s32.f32 %v260_v14  ;;  %v262_v20 = vshra.s32 %v258_v18, 4  ;;  %v261_v23 = vand.u32 15, %v258_v18 }
  0x11   : > { %368 = vmatpush3.bf16.msra.mxu0 %v390_v2  ;;  %v265_v19 = vmul.f32 0.5, %v263_v15  ;;  %vm276_vm2 = vcmp.eq.s32.totalorder %v262_v20, 1  ;;  %vm275_vm3 = vcmp.eq.s32.totalorder %v262_v20, 0  ;;  %vm269_vm4 = vcmp.eq.s32.totalorder %v261_v23, 0 }
  0x12   : > { %369 = vmatprep.subr.bf16.mxu0 %v405_v1  ;;  %v277_v25 = vsel %vm276_vm2, 62.0, %v407_v24  ;;  %v279_v27 = vsel %vm276_vm2, 45.0, %v408_v26  ;;  %vm282_vm5 = vcmp.eq.s32.totalorder %v261_v23, 2  ;;  %vm286_vm6 = vcmp.lt.s32.totalorder %v261_v23, 4 }
  0x13   : > { %v266_v21 = vfloor.f32 %v265_v19  ;;  %v278_v29 = vsel %vm275_vm3, 30.0, %v277_v25  ;;  %v280_v30 = vsel %vm275_vm3, 61.0, %v279_v27  ;;  %vm285_vm7 = vcmp.lt.s32.totalorder %v261_v23, 2 }
  0x14   : > { %v283_v34 = vsel %vm282_vm5, %v278_v29, %v280_v30 }
  0x15   : > { %370 = vmatpush3.bf16.msra.mxu0 %v391_v3  ;;  %v267_v22 = vmul.f32 2.0, %v266_v21 }
  0x16   : > { %371 = vmatprep.subr.bf16.mxu0 %v405_v1 }
  0x17   : > { %v268_v28 = vsub.f32 %v263_v15, %v267_v22 }
  0x19   : > { %372 = vmatpush3.bf16.msra.mxu0 %v392_v4  ;;  %v270_v33 = vsel %vm269_vm4, %v268_v28, %v266_v21 }
  0x1c   : > { %374 = vmatmul.mubr.msk.bf16.vlgmr.msra.gmra.mxu0 %vm207_vm1, %v167_v5 }
  0xdc   : > { %v245_v7 = vpop.f32.mrf.mxu0 }
  0xdd   : > { %v246_v8 = vadd.f32 %v350_v6, %v245_v7 }
  0xde   : > { %v375_v9 = vpop.f32.mrf.mxu0 }
  0xdf   : > { %v356_v10 = vmul.f32 -1.442695, %v246_v8 }
  0xe0   : > { %v248_v11 = vpop.f32.mrf.mxu0 }
  0xe1   : > { %393 = vpow2.f32 %v356_v10 }
  0xe2   : > { %v376_v12 = vpop.f32.mrf.mxu0 }
  0xee   : > { %v394_v16 = vpop.eup %393 }
  0xef   : > { %v254_v17 = vadd.f32 1.0, %v394_v16 }
  0xf1   : > { %395 = vrcp.f32 %v254_v17 }
  0xfe   : > { %v396_v31 = vpop.eup %395 }
  0xff   : > { %v271_v32 = vmul.f32 2.0, %v396_v31 }
 0x101   : > { %v357_v35 = vadd.f32 -0.5, %v271_v32  ;;  %v281_v36 = vmul.f32 %v271_v32, %v271_v32 }
 0x103   : > { %v273_v37 = vadd.f32 %v357_v35, %v270_v33  ;;  %v284_v38 = vmul.f32 %v283_v34, %v281_v36 }
 0x105   : > { %v274_v39 = vmul.f32 16.0, %v273_v37  ;;  %v287_v40 = vsel %vm286_vm6, %v284_v38, %v396_v31 }
 0x107   : > { %v288_v41 = vsel %vm285_vm7, %v274_v39, %v287_v40 }
 0x108   : > { %289 = vst [vmem:[%s165_s4] sm:$0xf] %v288_v41 }
 0x109 PF: > { %s13_s12 = sadd.s32 1, %s403_s12  }
 0x10a   : > { %p10_p4 = scmp.ge.s32.totalorder %s13_s12, 4  }
 0x10c   :  { %12 = sbr.rel (!%p10_p4) target bundleno = 1 (0x1), region = 62 }

// kernel: _lambda_.9
= control target key start
LH: loop header
LB: loop body
LE: loop exit
PB: predicated region body
PF: predicated region fallthrough
CT: control target
= control target key end

     0   :  { %s1710_s12 = smov 0   ;;  %s2019_s0 = inlined_call_operand.vmem [shape: bf16[2,3,3,128], index: 0, kind: input, shape index: {}]   ;;  %s2020_s1 = inlined_call_operand.vmem [shape: bf16[4,128,128], index: 1, kind: input, shape index: {}]   ;;  %s2021_s2 = inlined_call_operand.vmem [shape: f32[1,128], index: 2, kind: input, shape index: {}]   ;;  %s2022_s3 = inlined_call_operand.vmem [shape: bf16[2,4,128], index: 3, kind: output, shape index: {}]  }
   0x1 LB: > { %s1180_s13 = sadd.s32 4294967295, %s1685_s12   ;;  %p1184_p0 = scmp.ge.s32.totalorder %s1685_s12, 1  ;;  %s1685_s12 = sphi %s1710_s12, %s13_s12  }
   0x2   : > { %p137_p1 = scmp.lt.s32.totalorder %s1685_s12, 3 }
   0x4   : > { %p138_p2 = pnand %p1184_p0, %p137_p1 }
   0x5   : > { %p160_p3 = scmp.lt.s32.totalorder (!%p138_p2), %s1180_s13, 1 }
   0x6   : > { %141 = sbr.rel (%p138_p2) target bundleno = 380 (0x17c), region = 32 }
   0xb   : > { %v1607_v0 = vld [vmem:[%s2020_s1 + $0x78] sm:$0xff]   ;;  %v1687_v1 = vmov 0.0   ;;  %v1609_v3 = vld [vmem:[%s2020_s1 + $0x70] sm:$0xff]   ;;  %vm1688_vm0 = vmmov 0   ;;  %s2024_s13 = smov (!%p160_p3, %s1180_s13), 1  ;;  %v1611_v5 = vld [vmem:[%s2020_s1 + $0x68] sm:$0xff]  }
   0xc   : > { %1435 = vmatprep.subr.bf16.mxu0 %v1687_v1  ;;  %1455 = vmatprep.subr.bf16.mxu1 %v1687_v1  ;;  %v1608_v2 = vld [vmem:[%s2020_s1 + $0x38] sm:$0xff]   ;;  %v1610_v4 = vld [vmem:[%s2020_s1 + $0x30] sm:$0xff]   ;;  %v1612_v6 = vld [vmem:[%s2020_s1 + $0x28] sm:$0xff]   ;;  %s1595_s26 = smul.u32 6, %s2024_s13 }
   0xd   : > { %1436 = vmatpush3.bf16.msra.mxu0 %v1607_v0  ;;  %1451 = vmatprep.mubr.msk.bf16.mxu0 %vm1688_vm0, %v1687_v1  ;;  %v1613_v7 = vld [vmem:[%s2020_s1 + $0x60] sm:$0xff]   ;;  %v1615_v9 = vld [vmem:[%s2020_s1 + $0x58] sm:$0xff]   ;;  %v1617_v12 = vld [vmem:[%s2020_s1 + $0x50] sm:$0xff]  }
   0xe   : > { %1456 = vmatpush3.bf16.msra.mxu1 %v1608_v2  ;;  %1437 = vmatprep.subr.bf16.mxu0 %v1687_v1  ;;  %v1614_v8 = vld [vmem:[%s2020_s1 + $0x20] sm:$0xff]   ;;  %s1760_s6 = scalar_lea.vmem %s2019_s0, %s1595_s26  ;;  %v1616_v10 = vld [vmem:[%s2020_s1 + $0x18] sm:$0xff]   ;;  %v1618_v13 = vld [vmem:[%s2020_s1 + $0x10] sm:$0xff]  }
   0xf   : > { %1457 = vmatprep.subr.bf16.mxu1 %v1687_v1  ;;  %1471 = vmatprep.mubr.msk.bf16.mxu1 %vm1688_vm0, %v1687_v1  ;;  %v1203_v11 = vld.sshfl [vmem:[%s1760_s6] sm:$0x3 pattern:$0x76325410]  ;;  %v1619_v15 = vld [vmem:[%s2020_s1 + $0x48] sm:$0xff]   ;;  %v1623_v23 = vld [vmem:[%s2020_s1 + $0xb8] sm:$0xff]  }
  0x10   : > { %v216_v14 = vshll.u32 %v1203_v11, 16  ;;  %v1620_v16 = vld [vmem:[%s2020_s1 + $0x8] sm:$0xff]   ;;  %v214_v17 = vshrl.u32 %v1203_v11, 16  ;;  %v1621_v19 = vld [vmem:[%s2020_s1 + $0x40] sm:$0xff]   ;;  %v1624_v24 = vld [vmem:[%s2020_s1 + $0xf8] sm:$0xff]  }
  0x11   : > { %1438 = vmatpush3.bf16.msra.mxu0 %v1609_v3  ;;  %v1622_v20 = vld [vmem:[%s2020_s1] sm:$0xff]   ;;  %v1625_v25 = vld [vmem:[%s2020_s1 + $0xb0] sm:$0xff]   ;;  %v1627_v27 = vld [vmem:[%s2020_s1 + $0xa8] sm:$0xff]  }
  0x12   : > { %1458 = vmatpush3.bf16.msra.mxu1 %v1610_v4  ;;  %1439 = vmatprep.subr.bf16.mxu0 %v1687_v1  ;;  %v218_v18 = vrot.slane %v216_v14, 1  ;;  %v170_v22 = vld [vmem:[%s1760_s6] sm:$0x1]  ;;  %v1626_v26 = vld [vmem:[%s2020_s1 + $0xf0] sm:$0xff]   ;;  %v1628_v28 = vld [vmem:[%s2020_s1 + $0xe8] sm:$0xff]  }
  0x13   : > { %1459 = vmatprep.subr.bf16.mxu1 %v1687_v1  ;;  %v1629_v29 = vld [vmem:[%s2020_s1 + $0xa0] sm:$0xff]   ;;  %v1631_v31 = vld [vmem:[%s2020_s1 + $0x98] sm:$0xff]   ;;  %v1633_v33 = vld [vmem:[%s2020_s1 + $0x90] sm:$0xff]  }
  0x14   : > { %v219_v21 = vor.u32 %v218_v18, %v214_v17  ;;  %v1630_v30 = vld [vmem:[%s2020_s1 + $0xe0] sm:$0xff]   ;;  %v1632_v32 = vld [vmem:[%s2020_s1 + $0xd8] sm:$0xff]   ;;  %v1634_v35 = vld [vmem:[%s2020_s1 + $0xd0] sm:$0xff]  }
  0x15   : > { %1440 = vmatpush3.bf16.msra.mxu0 %v1611_v5  ;;  %v1262_v34 = vld.sshfl [vmem:[%s1760_s6 + $0x2] sm:$0x3 pattern:$0x76325410]  ;;  %v1635_v36 = vld [vmem:[%s2020_s1 + $0x88] sm:$0xff]   ;;  %v1639_v45 = vld [vmem:[%s2020_s1 + $0x78] sm:$0xff]  }
  0x16   : > { %1460 = vmatpush3.bf16.msra.mxu1 %v1612_v6  ;;  %1441 = vmatprep.subr.bf16.mxu0 %v1687_v1  ;;  %v534_v37 = vshll.u32 %v1262_v34, 16  ;;  %v1636_v38 = vld [vmem:[%s2020_s1 + $0xc8] sm:$0xff]   ;;  %v1637_v39 = vld [vmem:[%s2020_s1 + $0x80] sm:$0xff]   ;;  %v532_v40 = vshrl.u32 %v1262_v34, 16  ;;  %v1640_v46 = vld [vmem:[%s2020_s1 + $0x38] sm:$0xff]  }
  0x17   : > { %1461 = vmatprep.subr.bf16.mxu1 %v1687_v1  ;;  %v1638_v42 = vld [vmem:[%s2020_s1 + $0xc0] sm:$0xff]   ;;  %v1641_v47 = vld [vmem:[%s2020_s1 + $0x70] sm:$0xff]   ;;  %v1643_v49 = vld [vmem:[%s2020_s1 + $0x68] sm:$0xff]  }
  0x18   : > { %v536_v41 = vrot.slane %v534_v37, 1  ;;  %v1220_v43 = vld [vmem:[%s1760_s6 + $0x2] sm:$0x1]  ;;  %v1642_v48 = vld [vmem:[%s2020_s1 + $0x30] sm:$0xff]   ;;  %v1644_v50 = vld [vmem:[%s2020_s1 + $0x28] sm:$0xff]  }
  0x19   : > { %1442 = vmatpush3.bf16.msra.mxu0 %v1613_v7  ;;  %v1645_v51 = vld [vmem:[%s2020_s1 + $0x60] sm:$0xff]   ;;  %v1647_v53 = vld [vmem:[%s2020_s1 + $0x58] sm:$0xff]   ;;  %v1649_v55 = vld [vmem:[%s2020_s1 + $0x50] sm:$0xff]  }
  0x1a   : > { %1462 = vmatpush3.bf16.msra.mxu1 %v1614_v8  ;;  %1443 = vmatprep.subr.bf16.mxu0 %v1687_v1  ;;  %v537_v44 = vor.u32 %v536_v41, %v532_v40  ;;  %v1646_v52 = vld [vmem:[%s2020_s1 + $0x20] sm:$0xff]   ;;  %v1648_v54 = vld [vmem:[%s2020_s1 + $0x18] sm:$0xff]   ;;  %v1650_v56 = vld [vmem:[%s2020_s1 + $0x10] sm:$0xff]  }
  0x1b   : > { %1463 = vmatprep.subr.bf16.mxu1 %v1687_v1  ;;  %v1651_v57 = vld [vmem:[%s2020_s1 + $0x48] sm:$0xff]   ;;  %v1653_v59 = vld [vmem:[%s2020_s1 + $0x40] sm:$0xff]   ;;  %v1655_v61 = vld [vmem:[%s2020_s1 + $0xb8] sm:$0xff]  }
  0x1c   : > { %v1652_v58 = vld [vmem:[%s2020_s1 + $0x8] sm:$0xff]   ;;  %v1654_v60 = vld [vmem:[%s2020_s1] sm:$0xff]   ;;  %v1656_v63 = vld [vmem:[%s2020_s1 + $0xf8] sm:$0xff]  }
  0x1d   : > { %1444 = vmatpush3.bf16.msra.mxu0 %v1615_v9  ;;  %v1273_v62 = vld [vmem:[%s1760_s6 + $0x2] sm:$0x1]  ;;  %v1657_v0 = vld [vmem:[%s2020_s1 + $0xb0] sm:$0xff]   ;;  %v1659_v3 = vld [vmem:[%s2020_s1 + $0xa8] sm:$0xff]  }
  0x1e   : > { %1464 = vmatpush3.bf16.msra.mxu1 %v1616_v10  ;;  %1445 = vmatprep.subr.bf16.mxu0 %v1687_v1  ;;  %v1658_v2 = vld [vmem:[%s2020_s1 + $0xf0] sm:$0xff]   ;;  %v1660_v4 = vld [vmem:[%s2020_s1 + $0xe8] sm:$0xff]   ;;  %v1661_v5 = vld [vmem:[%s2020_s1 + $0xa0] sm:$0xff]  }
  0x1f   : > { %1465 = vmatprep.subr.bf16.mxu1 %v1687_v1  ;;  %v1662_v6 = vld [vmem:[%s2020_s1 + $0xe0] sm:$0xff]   ;;  %v1663_v7 = vld [vmem:[%s2020_s1 + $0x98] sm:$0xff]   ;;  %v1665_v9 = vld [vmem:[%s2020_s1 + $0x90] sm:$0xff]  }
  0x20   : > { %v1664_v8 = vld [vmem:[%s2020_s1 + $0xd8] sm:$0xff]   ;;  %v1666_v10 = vld [vmem:[%s2020_s1 + $0xd0] sm:$0xff]   ;;  %v1350_v11 = vld.sshfl [vmem:[%s1760_s6 + $0x4] sm:$0x3 pattern:$0x76325410] }
  0x21   : > { %1446 = vmatpush3.bf16.msra.mxu0 %v1617_v12  ;;  %v1667_v12 = vld [vmem:[%s2020_s1 + $0x88] sm:$0xff]   ;;  %v1670_v18 = vld [vmem:[%s2020_s1 + $0xc0] sm:$0xff]  }
  0x22   : > { %1466 = vmatpush3.bf16.msra.mxu1 %v1618_v13  ;;  %1447 = vmatprep.subr.bf16.mxu0 %v1687_v1  ;;  %v1006_v13 = vshll.u32 %v1350_v11, 16  ;;  %v1668_v14 = vld [vmem:[%s2020_s1 + $0xc8] sm:$0xff]  }
  0x23   : > { %1467 = vmatprep.subr.bf16.mxu1 %v1687_v1 }
  0x24   : > { %v1008_v17 = vrot.slane %v1006_v13, 1 }
  0x25   : > { %1448 = vmatpush3.bf16.msra.mxu0 %v1619_v15  ;;  %v1669_v15 = vld [vmem:[%s2020_s1 + $0x80] sm:$0xff]  }
  0x26   : > { %1468 = vmatpush3.bf16.msra.mxu1 %v1620_v16  ;;  %1449 = vmatprep.subr.bf16.mxu0 %v1687_v1  ;;  %v1004_v16 = vshrl.u32 %v1350_v11, 16 }
  0x27   : > { %1469 = vmatprep.subr.bf16.mxu1 %v1687_v1 }
  0x29   : > { %1450 = vmatpush3.bf16.msra.mxu0 %v1621_v19  ;;  %v1308_v19 = vld [vmem:[%s1760_s6 + $0x4] sm:$0x1]  ;;  %s1186_s6 = sshll.u32 %s2024_s13, 1 }
  0x2a   : > { %1470 = vmatpush3.bf16.msra.mxu1 %v1622_v20  ;;  %1475 = vmatprep.subr.bf16.mxu0 %v1687_v1  ;;  %v1009_v20 = vor.u32 %v1008_v17, %v1004_v16  ;;  %s2012_s29 = scalar_lea.vmem %s2022_s3, %s1186_s6 }
  0x2b   : > { %1495 = vmatprep.subr.bf16.mxu1 %v1687_v1 }
  0x2c   : > { %1452 = vmatmul.mubr.bf16.vlgmr.msra.gmra.mxu0 %v219_v21 }
  0x2d   : > { %1472 = vmatmul.mubr.bf16.vlgmr.msra.gmra.mxu1 %v170_v22  ;;  %1476 = vmatpush3.bf16.msra.mxu0 %v1623_v23 }
  0x2e   : > { %1496 = vmatpush3.bf16.msra.mxu1 %v1624_v24  ;;  %1477 = vmatprep.subr.bf16.mxu0 %v1687_v1 }
  0x2f   : > { %1497 = vmatprep.subr.bf16.mxu1 %v1687_v1  ;;  %1491 = vmatprep.mubr.msk.bf16.mxu0 %vm1688_vm0, %v1687_v1 }
  0x30   : > { %1511 = vmatprep.mubr.msk.bf16.mxu1 %vm1688_vm0, %v1687_v1 }
  0x31   : > { %1478 = vmatpush3.bf16.msra.mxu0 %v1625_v25 }
  0x32   : > { %1498 = vmatpush3.bf16.msra.mxu1 %v1626_v26  ;;  %1479 = vmatprep.subr.bf16.mxu0 %v1687_v1 }
  0x33   : > { %1499 = vmatprep.subr.bf16.mxu1 %v1687_v1 }
  0x35   : > { %1480 = vmatpush3.bf16.msra.mxu0 %v1627_v27 }
  0x36   : > { %1500 = vmatpush3.bf16.msra.mxu1 %v1628_v28  ;;  %1481 = vmatprep.subr.bf16.mxu0 %v1687_v1 }
  0x37   : > { %1501 = vmatprep.subr.bf16.mxu1 %v1687_v1 }
  0x39   : > { %1482 = vmatpush3.bf16.msra.mxu0 %v1629_v29 }
  0x3a   : > { %1502 = vmatpush3.bf16.msra.mxu1 %v1630_v30  ;;  %1483 = vmatprep.subr.bf16.mxu0 %v1687_v1 }
  0x3b   : > { %1503 = vmatprep.subr.bf16.mxu1 %v1687_v1 }
  0x3d   : > { %1484 = vmatpush3.bf16.msra.mxu0 %v1631_v31 }
  0x3e   : > { %1504 = vmatpush3.bf16.msra.mxu1 %v1632_v32  ;;  %1485 = vmatprep.subr.bf16.mxu0 %v1687_v1 }
  0x3f   : > { %1505 = vmatprep.subr.bf16.mxu1 %v1687_v1 }
  0x41   : > { %1486 = vmatpush3.bf16.msra.mxu0 %v1633_v33 }
  0x42   : > { %1506 = vmatpush3.bf16.msra.mxu1 %v1634_v35  ;;  %1487 = vmatprep.subr.bf16.mxu0 %v1687_v1 }
  0x43   : > { %1507 = vmatprep.subr.bf16.mxu1 %v1687_v1 }
  0x45   : > { %1488 = vmatpush3.bf16.msra.mxu0 %v1635_v36 }
  0x46   : > { %1508 = vmatpush3.bf16.msra.mxu1 %v1636_v38  ;;  %1489 = vmatprep.subr.bf16.mxu0 %v1687_v1 }
  0x47   : > { %1509 = vmatprep.subr.bf16.mxu1 %v1687_v1 }
  0x49   : > { %1490 = vmatpush3.bf16.msra.mxu0 %v1637_v39 }
  0x4a   : > { %1510 = vmatpush3.bf16.msra.mxu1 %v1638_v42  ;;  %1515 = vmatprep.subr.bf16.mxu0 %v1687_v1 }
  0x4b   : > { %1535 = vmatprep.subr.bf16.mxu1 %v1687_v1 }
  0x4c   : > { %1492 = vmatmul.mubr.bf16.vlgmr.msra.gmra.mxu0 %v1220_v43 }
  0x4d   : > { %1512 = vmatmul.mubr.bf16.vlgmr.msra.gmra.mxu1 %v537_v44  ;;  %1516 = vmatpush3.bf16.msra.mxu0 %v1639_v45 }
  0x4e   : > { %1536 = vmatpush3.bf16.msra.mxu1 %v1640_v46  ;;  %1517 = vmatprep.subr.bf16.mxu0 %v1687_v1 }
  0x4f   : > { %1537 = vmatprep.subr.bf16.mxu1 %v1687_v1  ;;  %1531 = vmatprep.mubr.msk.bf16.mxu0 %vm1688_vm0, %v1687_v1 }
  0x50   : > { %1551 = vmatprep.mubr.msk.bf16.mxu1 %vm1688_vm0, %v1687_v1 }
  0x51   : > { %1518 = vmatpush3.bf16.msra.mxu0 %v1641_v47 }
  0x52   : > { %1538 = vmatpush3.bf16.msra.mxu1 %v1642_v48  ;;  %1519 = vmatprep.subr.bf16.mxu0 %v1687_v1 }
  0x53   : > { %1539 = vmatprep.subr.bf16.mxu1 %v1687_v1 }
  0x55   : > { %1520 = vmatpush3.bf16.msra.mxu0 %v1643_v49 }
  0x56   : > { %1540 = vmatpush3.bf16.msra.mxu1 %v1644_v50  ;;  %1521 = vmatprep.subr.bf16.mxu0 %v1687_v1 }
  0x57   : > { %1541 = vmatprep.subr.bf16.mxu1 %v1687_v1 }
  0x59   : > { %1522 = vmatpush3.bf16.msra.mxu0 %v1645_v51 }
  0x5a   : > { %1542 = vmatpush3.bf16.msra.mxu1 %v1646_v52  ;;  %1523 = vmatprep.subr.bf16.mxu0 %v1687_v1 }
  0x5b   : > { %1543 = vmatprep.subr.bf16.mxu1 %v1687_v1 }
  0x5d   : > { %1524 = vmatpush3.bf16.msra.mxu0 %v1647_v53 }
  0x5e   : > { %1544 = vmatpush3.bf16.msra.mxu1 %v1648_v54  ;;  %1525 = vmatprep.subr.bf16.mxu0 %v1687_v1 }
  0x5f   : > { %1545 = vmatprep.subr.bf16.mxu1 %v1687_v1 }
  0x61   : > { %1526 = vmatpush3.bf16.msra.mxu0 %v1649_v55 }
  0x62   : > { %1546 = vmatpush3.bf16.msra.mxu1 %v1650_v56  ;;  %1527 = vmatprep.subr.bf16.mxu0 %v1687_v1 }
  0x63   : > { %1547 = vmatprep.subr.bf16.mxu1 %v1687_v1 }
  0x65   : > { %1528 = vmatpush3.bf16.msra.mxu0 %v1651_v57 }
  0x66   : > { %1548 = vmatpush3.bf16.msra.mxu1 %v1652_v58  ;;  %1529 = vmatprep.subr.bf16.mxu0 %v1687_v1 }
  0x67   : > { %1549 = vmatprep.subr.bf16.mxu1 %v1687_v1 }
  0x69   : > { %1530 = vmatpush3.bf16.msra.mxu0 %v1653_v59 }
  0x6a   : > { %1550 = vmatpush3.bf16.msra.mxu1 %v1654_v60  ;;  %1555 = vmatprep.subr.bf16.mxu0 %v1687_v1 }
  0x6b   : > { %1575 = vmatprep.subr.bf16.mxu1 %v1687_v1 }
  0x6c   : > { %1532 = vmatmul.mubr.bf16.vlgmr.msra.gmra.mxu0 %v537_v44 }
  0x6d   : > { %1552 = vmatmul.mubr.bf16.vlgmr.msra.gmra.mxu1 %v1273_v62  ;;  %1556 = vmatpush3.bf16.msra.mxu0 %v1655_v61 }
  0x6e   : > { %1576 = vmatpush3.bf16.msra.mxu1 %v1656_v63  ;;  %1557 = vmatprep.subr.bf16.mxu0 %v1687_v1 }
  0x6f   : > { %1577 = vmatprep.subr.bf16.mxu1 %v1687_v1  ;;  %1571 = vmatprep.mubr.msk.bf16.mxu0 %vm1688_vm0, %v1687_v1 }
  0x70   : > { %1591 = vmatprep.mubr.msk.bf16.mxu1 %vm1688_vm0, %v1687_v1 }
  0x71   : > { %1558 = vmatpush3.bf16.msra.mxu0 %v1657_v0 }
  0x72   : > { %1578 = vmatpush3.bf16.msra.mxu1 %v1658_v2  ;;  %1559 = vmatprep.subr.bf16.mxu0 %v1687_v1 }
  0x73   : > { %1579 = vmatprep.subr.bf16.mxu1 %v1687_v1 }
  0x75   : > { %1560 = vmatpush3.bf16.msra.mxu0 %v1659_v3 }
  0x76   : > { %1580 = vmatpush3.bf16.msra.mxu1 %v1660_v4  ;;  %1561 = vmatprep.subr.bf16.mxu0 %v1687_v1 }
  0x77   : > { %1581 = vmatprep.subr.bf16.mxu1 %v1687_v1 }
  0x79   : > { %1562 = vmatpush3.bf16.msra.mxu0 %v1661_v5 }
  0x7a   : > { %1582 = vmatpush3.bf16.msra.mxu1 %v1662_v6  ;;  %1563 = vmatprep.subr.bf16.mxu0 %v1687_v1 }
  0x7b   : > { %1583 = vmatprep.subr.bf16.mxu1 %v1687_v1 }
  0x7d   : > { %1564 = vmatpush3.bf16.msra.mxu0 %v1663_v7  ;;  %v1689_v7 = vmov 1983009808  }
  0x7e   : > { %1584 = vmatpush3.bf16.msra.mxu1 %v1664_v8  ;;  %1565 = vmatprep.subr.bf16.mxu0 %v1687_v1  ;;  %v1118_v8 = vunpack.c.l.s4 %v1689_v7 }
  0x7f   : > { %1585 = vmatprep.subr.bf16.mxu1 %v1687_v1 }
  0x81   : > { %1566 = vmatpush3.bf16.msra.mxu0 %v1665_v9  ;;  %v1120_v9 = vlaneseq }
  0x82   : > { %1586 = vmatpush3.bf16.msra.mxu1 %v1666_v10  ;;  %1567 = vmatprep.subr.bf16.mxu0 %v1687_v1  ;;  %v1119_v10 = vunpack.c.0.s8 %v1118_v8 }
  0x83   : > { %1587 = vmatprep.subr.bf16.mxu1 %v1687_v1  ;;  %v1121_v11 = vshrl.u32 %v1120_v9, 7 }
  0x85   : > { %1568 = vmatpush3.bf16.msra.mxu0 %v1667_v12 }
  0x86   : > { %1588 = vmatpush3.bf16.msra.mxu1 %v1668_v14  ;;  %1569 = vmatprep.subr.bf16.mxu0 %v1687_v1  ;;  %v1122_v14 = vsub.s32 %v1119_v10, %v1121_v11 }
  0x87   : > { %1589 = vmatprep.subr.bf16.mxu1 %v1687_v1  ;;  %v1271_v1 = vld [vmem:[%s2021_s2] ss:$0 sm:$0xff] }
  0x89   : > { %1570 = vmatpush3.bf16.msra.mxu0 %v1669_v15 }
  0x8a   : > { %1590 = vmatpush3.bf16.msra.mxu1 %v1670_v18 }
  0x8c   : > { %1572 = vmatmul.mubr.bf16.vlgmr.msra.gmra.mxu0 %v1308_v19 }
  0x8d   : > { %1592 = vmatmul.mubr.bf16.vlgmr.msra.gmra.mxu1 %v1009_v20 }
  0xec   : > { %v303_v21 = vpop.f32.mrf.mxu0 }
  0xed   : > { %v391_v22 = vpop.f32.mrf.mxu1 }
  0xee   : > { %v1453_v23 = vpop.f32.mrf.mxu0  ;;  %v392_v29 = vadd.f32 %v391_v22, %v303_v21 }
  0xef   : > { %v1473_v24 = vpop.f32.mrf.mxu1 }
  0xf0   : > { %v306_v25 = vpop.f32.mrf.mxu0 }
  0xf1   : > { %v394_v26 = vpop.f32.mrf.mxu1 }
  0xf2   : > { %v1454_v27 = vpop.f32.mrf.mxu0 }
  0xf3   : > { %v1474_v28 = vpop.f32.mrf.mxu1 }
 0x10c   : > { %v498_v30 = vpop.f32.mrf.mxu0 }
 0x10d   : > { %v504_v31 = vadd.f32 %v498_v30, %v392_v29  ;;  %v621_v32 = vpop.f32.mrf.mxu1 }
 0x10e   : > { %v1493_v33 = vpop.f32.mrf.mxu0 }
 0x10f   : > { %v627_v34 = vadd.f32 %v621_v32, %v504_v31  ;;  %v1513_v35 = vpop.f32.mrf.mxu1 }
 0x110   : > { %v501_v36 = vpop.f32.mrf.mxu0 }
 0x111   : > { %v635_v37 = vadd.f32 %v1271_v1, %v627_v34  ;;  %v624_v38 = vpop.f32.mrf.mxu1 }
 0x112   : > { %v1494_v39 = vpop.f32.mrf.mxu0 }
 0x113   : > { %v1272_v40 = vmul.f32 -1.442695, %v635_v37  ;;  %v1514_v41 = vpop.f32.mrf.mxu1 }
 0x115   : > { %1671 = vpow2.f32 %v1272_v40 }
 0x122   : > { %v1672_v42 = vpop.eup %1671 }
 0x123   : > { %v639_v43 = vadd.f32 1.0, %v1672_v42 }
 0x125   : > { %1673 = vrcp.f32 %v639_v43 }
 0x12c   : > { %v777_v44 = vpop.f32.mrf.mxu0 }
 0x12d   : > { %v865_v45 = vpop.f32.mrf.mxu1 }
 0x12e   : > { %v1533_v46 = vpop.f32.mrf.mxu0  ;;  %v866_v55 = vadd.f32 %v865_v45, %v777_v44 }
 0x12f   : > { %v1553_v47 = vpop.f32.mrf.mxu1 }
 0x130   : > { %v780_v48 = vpop.f32.mrf.mxu0 }
 0x131   : > { %v868_v49 = vpop.f32.mrf.mxu1 }
 0x132   : > { %v1674_v50 = vpop.eup %1673  ;;  %v1534_v51 = vpop.f32.mrf.mxu0 }
 0x133   : > { %v642_v52 = vmul.f32 %v1674_v50, %v635_v37  ;;  %v1554_v53 = vpop.f32.mrf.mxu1 }
 0x135   : > { %v643_v54 = vpack.c.bf16 %v642_v52, %v642_v52 }
 0x137   : > { %644 = vst [vmem:[%s2012_s29] sm:$0x1] %v643_v54 }
 0x14c   : > { %v971_v56 = vpop.f32.mrf.mxu0 }
 0x14d   : > { %v977_v57 = vadd.f32 %v971_v56, %v866_v55  ;;  %v1093_v58 = vpop.f32.mrf.mxu1 }
 0x14e   : > { %v1573_v59 = vpop.f32.mrf.mxu0 }
 0x14f   : > { %v1099_v60 = vadd.f32 %v1093_v58, %v977_v57  ;;  %v1593_v61 = vpop.f32.mrf.mxu1 }
 0x150   : > { %v974_v62 = vpop.f32.mrf.mxu0 }
 0x151   : > { %v1107_v63 = vadd.f32 %v1271_v1, %v1099_v60  ;;  %v1096_v0 = vpop.f32.mrf.mxu1 }
 0x152   : > { %v1574_v2 = vpop.f32.mrf.mxu0 }
 0x153   : > { %v1360_v3 = vmul.f32 -1.442695, %v1107_v63  ;;  %v1594_v4 = vpop.f32.mrf.mxu1 }
 0x155   : > { %1675 = vpow2.f32 %v1360_v3 }
 0x162   : > { %v1676_v5 = vpop.eup %1675 }
 0x163   : > { %v1111_v6 = vadd.f32 1.0, %v1676_v5 }
 0x165   : > { %1677 = vrcp.f32 %v1111_v6 }
 0x172   : > { %v1678_v12 = vpop.eup %1677 }
 0x173   : > { %v1114_v13 = vmul.f32 %v1678_v12, %v1107_v63 }
 0x175   : > { %v1115_v15 = vpack.c.bf16 %v1114_v13, %v1114_v13 }
 0x177   : > { %v1123_v16 = vrot.slane %v1115_v15, %v1122_v14 }
 0x179   : > { %v1124_v17 = vrot.slane %v1123_v16, 7 }
 0x17b   : > { %1126 = vst [vmem:[%s2012_s29] sm:$0x2] %v1124_v17 }
 0x17c PF: > { %s13_s12 = sadd.s32 1, %s1685_s12  }
 0x17d   : > { %p10_p4 = scmp.ge.s32.totalorder %s13_s12, 4  }
 0x17f   :  { %12 = sbr.rel (!%p10_p4) target bundleno = 1 (0x1), region = 67 }

// kernel: _lambda_.10
= control target key start
LH: loop header
LB: loop body
LE: loop exit
PB: predicated region body
PF: predicated region fallthrough
CT: control target
= control target key end

     0   :  { %s451_s12 = smov 0   ;;  %s485_s0 = inlined_call_operand.vmem [shape: bf16[2,16,32], index: 0, kind: input, shape index: {}]   ;;  %s486_s1 = inlined_call_operand.vmem [shape: bf16[32,128], index: 1, kind: input, shape index: {}]   ;;  %s487_s2 = inlined_call_operand.vmem [shape: f32[1,128], index: 2, kind: input, shape index: {}]   ;;  %s488_s3 = inlined_call_operand.vmem [shape: f32[2,16,128], index: 3, kind: output, shape index: {}]  }
   0x1 LB: > { %s363_s13 = sadd.s32 4294967295, %s425_s12   ;;  %p367_p0 = scmp.ge.s32.totalorder %s425_s12, 1  ;;  %s425_s12 = sphi %s451_s12, %s13_s12  }
   0x2   : > { %p137_p1 = scmp.lt.s32.totalorder %s425_s12, 3 }
   0x4   : > { %p138_p2 = pnand %p367_p0, %p137_p1 }
   0x5   : > { %p161_p3 = scmp.lt.s32.totalorder (!%p138_p2), %s363_s13, 1 }
   0x6   : > { %141 = sbr.rel (%p138_p2) target bundleno = 261 (0x105), region = 32 }
   0xb   : > { %v408_v0 = vld [vmem:[%s486_s1 + $0x8] sm:$0xff]   ;;  %v427_v1 = vmov 0.0   ;;  %v409_v2 = vld [vmem:[%s486_s1] sm:$0xff]   ;;  %vm428_vm0 = vmmov 0   ;;  %s490_s13 = smov (!%p161_p3, %s363_s13), 1  ;;  %vm202_vm1 = vcmask 261120   ;;  %v259_v13 = vlaneseq }
   0xc   : > { %388 = vmatprep.subr.bf16.mxu0 %v427_v1  ;;  %392 = vmatprep.mubr.msk.bf16.mxu0 %vm428_vm0, %v427_v1  ;;  %s383_s18 = sshll.u32 %s490_s13, 3  ;;  %v372_v4 = vld [vmem:[%s487_s2] ss:$0 sm:$0xff]  ;;  %v429_v30 = vmov 33.0   ;;  %v430_v32 = vmov 23.0   ;;  %s384_s24 = sshll.u32 %s490_s13, 4 }
   0xd   : > { %389 = vmatpush3.bf16.msra.mxu0 %v408_v0  ;;  %s165_s21 = scalar_lea.vmem %s485_s0, %s383_s18  ;;  %v262_v14 = vshrl.u32 %v259_v13, 7  ;;  %v260_v19 = vand.u32 127, %v259_v13  ;;  %s170_s27 = scalar_lea.vmem %s488_s3, %s384_s24 }
   0xe   : > { %390 = vmatprep.subr.bf16.mxu0 %v427_v1  ;;  %v410_v3 = vld [vmem:[%s165_s21] sm:$0xff]  }
   0xf   : > { %v266_v15 = vcvt.s32.f32 %v262_v14  ;;  %v263_v16 = vadd.s32 8, %v262_v14  ;;  %v265_v23 = vshra.s32 %v260_v19, 4  ;;  %v264_v29 = vand.u32 15, %v260_v19 }
  0x11   : > { %391 = vmatpush3.bf16.msra.mxu0 %v409_v2  ;;  %v269_v20 = vmul.f32 0.25, %v266_v15  ;;  %v267_v21 = vcvt.s32.f32 %v263_v16  ;;  %vm289_vm2 = vcmp.eq.s32.totalorder %v265_v23, 1  ;;  %vm288_vm3 = vcmp.eq.s32.totalorder %v265_v23, 0 }
  0x12   : > { %v290_v31 = vsel %vm289_vm2, 16.0, %v429_v30  ;;  %v292_v33 = vsel %vm289_vm2, 30.0, %v430_v32  ;;  %vm277_vm4 = vcmp.eq.s32.totalorder %v264_v29, 0  ;;  %vm296_vm5 = vcmp.eq.s32.totalorder %v264_v29, 2 }
  0x13   : > { %v271_v25 = vfloor.f32 %v269_v20  ;;  %v270_v26 = vmul.f32 0.25, %v267_v21  ;;  %v291_v36 = vsel %vm288_vm3, 10.0, %v290_v31  ;;  %v293_v37 = vsel %vm288_vm3, 13.0, %v292_v33 }
  0x14   : > { %393 = vmatmul.mubr.msk.bf16.vlgmr.msra.gmra.mxu0 %vm202_vm1, %v410_v3  ;;  %v297_v41 = vsel %vm296_vm5, %v291_v36, %v293_v37  ;;  %vm301_vm6 = vcmp.lt.s32.totalorder %v264_v29, 4  ;;  %vm300_vm7 = vcmp.lt.s32.totalorder %v264_v29, 2 }
  0x15   : > { %v273_v27 = vmul.f32 4.0, %v271_v25  ;;  %v272_v28 = vfloor.f32 %v270_v26 }
  0x17   : > { %v275_v34 = vsub.f32 %v266_v15, %v273_v27  ;;  %v274_v35 = vmul.f32 4.0, %v272_v28 }
  0x19   : > { %v278_v40 = vsel %vm277_vm4, %v275_v34, %v271_v25  ;;  %v276_v42 = vsub.f32 %v267_v21, %v274_v35 }
  0x1b   : > { %v279_v49 = vsel %vm277_vm4, %v276_v42, %v272_v28 }
  0xd4   : > { %v240_v5 = vpop.f32.mrf.mxu0 }
  0xd5   : > { %v241_v6 = vadd.f32 %v372_v4, %v240_v5 }
  0xd6   : > { %v394_v7 = vpop.f32.mrf.mxu0 }
  0xd7   : > { %v377_v8 = vmul.f32 -1.442695, %v241_v6 }
  0xd8   : > { %v243_v9 = vpop.f32.mrf.mxu0 }
  0xd9   : > { %411 = vpow2.f32 %v377_v8  ;;  %v244_v10 = vadd.f32 %v372_v4, %v243_v9 }
  0xda   : > { %v395_v11 = vpop.f32.mrf.mxu0 }
  0xdb   : > { %v378_v12 = vmul.f32 -1.442695, %v244_v10 }
  0xdd   : > { %413 = vpow2.f32 %v378_v12 }
  0xe6   : > { %v412_v17 = vpop.eup %411 }
  0xe7   : > { %v253_v18 = vadd.f32 1.0, %v412_v17 }
  0xe9   : > { %415 = vrcp.f32 %v253_v18 }
  0xea   : > { %v414_v22 = vpop.eup %413 }
  0xeb   : > { %v254_v24 = vadd.f32 1.0, %v414_v22 }
  0xed   : > { %417 = vrcp.f32 %v254_v24 }
  0xf6   : > { %v416_v38 = vpop.eup %415 }
  0xf7   : > { %v280_v39 = vmul.f32 2.0, %v416_v38 }
  0xf9   : > { %v379_v43 = vadd.f32 -0.5, %v280_v39  ;;  %v294_v44 = vmul.f32 %v280_v39, %v280_v39 }
  0xfa   : > { %v418_v45 = vpop.eup %417 }
  0xfb   : > { %v284_v46 = vadd.f32 %v379_v43, %v278_v40  ;;  %v298_v47 = vmul.f32 %v297_v41, %v294_v44  ;;  %v281_v48 = vmul.f32 2.0, %v418_v45 }
  0xfd   : > { %v286_v50 = vmul.f32 8.0, %v284_v46  ;;  %v302_v51 = vsel %vm301_vm6, %v298_v47, %v416_v38  ;;  %v380_v52 = vadd.f32 -0.5, %v281_v48  ;;  %v295_v53 = vmul.f32 %v281_v48, %v281_v48 }
  0xff   : > { %v304_v54 = vsel %vm300_vm7, %v286_v50, %v302_v51  ;;  %v285_v55 = vadd.f32 %v380_v52, %v279_v49  ;;  %v299_v56 = vmul.f32 %v297_v41, %v295_v53 }
 0x100   : > { %306 = vst [vmem:[%s170_s27] sm:$0xff] %v304_v54 }
 0x101   : > { %v287_v57 = vmul.f32 8.0, %v285_v55  ;;  %v303_v58 = vsel %vm301_vm6, %v299_v56, %v418_v45 }
 0x103   : > { %v305_v59 = vsel %vm300_vm7, %v287_v57, %v303_v58 }
 0x104   : > { %307 = vst [vmem:[%s170_s27 + $0x8] sm:$0xff] %v305_v59 }
 0x105 PF: > { %s13_s12 = sadd.s32 1, %s425_s12  }
 0x106   : > { %p10_p4 = scmp.ge.s32.totalorder %s13_s12, 4  }
 0x108   :  { %12 = sbr.rel (!%p10_p4) target bundleno = 1 (0x1), region = 62 }

</bundles_post_ra>
